<compile_context>
chip_gen: v5e
topology: v5e:2x2
jax: 0.10.0
libtpu: 0.0.40
codegen_flags: <defaults>
</compile_context>

<pallas_src>
import functools

import numpy as np
import jax
import jax.numpy as jnp
from jax.experimental import pallas as pl
from jax.experimental.pallas import tpu as pltpu


def _round_up(v, m):
    return ((v + m - 1) // m) * m


def _grad_lstm_kernel(inv_gn_ref, x_ref, h_ref, c_ref, mask_ref, wg_ref, wo_ref,
                      grad_ref, hid_ref, cell_ref,
                      stacked_ref, gates_ref,
                      *, Ch, Chp, CinP, H, W, BB):
    HW = H * W
    C = x_ref.shape[1]
    Cin = C + Ch
    inv_gn = inv_gn_ref[0, 0]

    # Bias row: the packed gate weight carries the bias as its last column, so a
    # constant-1 row in the stacked input folds the bias add into the MXU matmul.
    stacked_ref[pl.ds(9 * CinP, 1), :] = jnp.ones((1, BB * HW), jnp.bfloat16)

    # ---- phase 1: build the rolled+masked stacked conv input in VMEM --------------
    # 3x3 "same" cross-correlation as 9 taps: a lane roll (XLU) of the stacked
    # [x ; h] tile + a precomputed {0,1} boundary mask per tap.  Each tap occupies a
    # 16-row-aligned 32-row slot in the bf16 scratch (rows Cin..CinP-1 are zero).
    for s in range(BB):
        xs = x_ref[s] * inv_gn                      # (C,  HW)  grad_ / gradnorm
        hs = h_ref[s]                               # (Ch, HW)  previous hidden
        parts = [xs, hs]
        if CinP > Cin:
            parts.append(jnp.zeros((CinP - Cin, HW), jnp.float32))
        base = jnp.concatenate(parts, axis=0)       # (CinP, HW)
        cols = pl.ds(s * HW, HW)
        for ky in range(3):
            for kx in range(3):
                t = ky * 3 + kx
                k = (ky - 1) * W + (kx - 1)
                if k == 0:
                    tap = base
                else:
                    shift = (-k) % HW               # out[p] = in[p + k]
                    tap = pltpu.roll(base, shift=shift, axis=1) * mask_ref[t:t + 1, :]
                stacked_ref[pl.ds(t * CinP, CinP), cols] = tap.astype(jnp.bfloat16)

    # ---- phase 2: ONE bf16 MXU matmul for all 9 taps, 4 gates, BB samples ---------
    gates_ref[...] = jnp.dot(wg_ref[...], stacked_ref[...],
                             preferred_element_type=jnp.float32)

    # ---- phase 3: gate nonlinearities, cell/hidden update, 1x1 output conv --------
    for s in range(BB):
        cols = pl.ds(s * HW, HW)
        # per-gate rows start at sublane-tile-aligned offsets (Chp multiple of 8)
        in_g = jax.nn.sigmoid(gates_ref[pl.ds(0 * Chp, Ch), cols])
        rem_g = jax.nn.sigmoid(gates_ref[pl.ds(1 * Chp, Ch), cols])
        out_g = jax.nn.sigmoid(gates_ref[pl.ds(2 * Chp, Ch), cols])
        cg = jnp.tanh(gates_ref[pl.ds(3 * Chp, Ch), cols])

        c_new = rem_g * c_ref[s] + in_g * cg        # (Ch, HW)
        h_new = out_g * jnp.tanh(c_new)             # (Ch, HW)

        # 1x1 output conv (dim_state -> C, no bias); kept f32 (K=Ch is tiny and this
        # avoids an extra bf16 rounding of h_new on the output path).
        g_out = jnp.dot(wo_ref[...], h_new, preferred_element_type=jnp.float32)

        grad_ref[s] = g_out.astype(grad_ref.dtype)
        hid_ref[s] = h_new.astype(hid_ref.dtype)
        cell_ref[s] = c_new.astype(cell_ref.dtype)


def _prep_gate_weights(params, C, Ch, Chp, CinP):
    """Pack the PyTorch-layout ConvLSTM gate weights into a single lane-dense bf16
    matrix (4*Chp, 9*CinP + 1): columns are tap-major ([x | h | zero-pad] per tap),
    the last column is the gate bias; each gate's output rows are padded to Chp."""
    wg = params["w_gates"].astype(jnp.float32)      # (4*Ch, C+Ch, 3, 3)
    bg = params["b_gates"].astype(jnp.float32)      # (4*Ch,)
    wo = params["w_out"].astype(jnp.float32)        # (C, Ch, 1, 1)
    Cin = C + Ch

    wg4 = wg.reshape(4, Ch, Cin, 3, 3)
    wg4 = jnp.pad(wg4, ((0, 0), (0, Chp - Ch), (0, 0), (0, 0), (0, 0)))
    # (gate, out_row, ky, kx, in_ch), pad in_ch to the aligned per-tap slot, flatten taps
    w_cols = jnp.transpose(wg4, (0, 1, 3, 4, 2))
    w_cols = jnp.pad(w_cols, ((0, 0), (0, 0), (0, 0), (0, 0), (0, CinP - Cin)))
    w_cols = w_cols.reshape(4 * Chp, 9 * CinP)
    b_col = jnp.pad(bg.reshape(4, Ch), ((0, 0), (0, Chp - Ch))).reshape(4 * Chp, 1)
    wg_packed = jnp.concatenate([w_cols, b_col], axis=1).astype(jnp.bfloat16)
    wo_k = wo.reshape(C, Ch)                        # (C, Ch) f32
    return wg_packed, wo_k


def _conv_boundary_masks(H, W):
    """Per-tap validity mask (1 inside the image after a (dy,dx) shift)."""
    yy, xx = np.mgrid[0:H, 0:W]
    masks = np.zeros((9, H, W), np.float32)
    for ky in range(3):
        for kx in range(3):
            dy, dx = ky - 1, kx - 1
            ok = ((yy + dy >= 0) & (yy + dy <= H - 1) &
                  (xx + dx >= 0) & (xx + dx <= W - 1))
            masks[ky * 3 + kx] = ok.astype(np.float32)
    return jnp.asarray(masks.reshape(9, H * W))


def _pick_grid_blocks(B):
    """v7x has 2 TensorCores/chip -> split the batch into 2 'parallel' grid blocks;
    single-TC v5e/v6e prefer one grid step with the whole batch folded into lanes."""
    try:
        kind = jax.devices()[0].device_kind.lower()
    except Exception:
        kind = ""
    n_tc = 2 if "v7" in kind else 1
    g = n_tc if B % n_tc == 0 else 1
    while B // g > 8:                               # bound per-step unroll / scratch size
        g += 1
        while B % g != 0:
            g += 1
    return g


def grad_update_lstm_forward(params, hidden, cell, grad_, gradnorm=1.0, grid_blocks=None):
    """model_GradUpdateLSTM.forward for 3-D ShapeData (Conv2d/ConvLSTM2d branch),
    periodicBnd=False, rateDropout=0.0, asymptotic_term=False.
    Returns (grad, hidden, cell), all NCHW float32."""
    B, C, H, W = grad_.shape
    Ch = params["w_gates"].shape[0] // 4            # dim_state (= 5*C by default)
    Chp = _round_up(Ch, 8)                          # per-gate rows, sublane aligned
    Cin = C + Ch
    CinP = _round_up(Cin, 16)                       # per-tap row slot, bf16-tile aligned
    Kp = 9 * CinP + 1                               # + bias row
    HW = H * W

    if grid_blocks is None:
        grid_blocks = _pick_grid_blocks(B)
    assert B % grid_blocks == 0, (B, grid_blocks)
    BB = B // grid_blocks

    x = grad_.reshape(B, C, HW).astype(jnp.float32)     # free reshape, no transpose
    if hidden is None:                                  # prev_state is None -> zeros
        h = jnp.zeros((B, Ch, HW), jnp.float32)
        c = jnp.zeros((B, Ch, HW), jnp.float32)
    else:
        h = hidden.reshape(B, Ch, HW).astype(jnp.float32)
        c = cell.reshape(B, Ch, HW).astype(jnp.float32)

    wg_k, wo_k = _prep_gate_weights(params, C, Ch, Chp, CinP)
    masks = _conv_boundary_masks(H, W)
    inv_gn = (1.0 / jnp.asarray(gradnorm, jnp.float32)).reshape(1, 1)

    kernel = functools.partial(_grad_lstm_kernel, Ch=Ch, Chp=Chp, CinP=CinP,
                               H=H, W=W, BB=BB)

    grad_o, hid_o, cell_o = pl.pallas_call(
        kernel,
        out_shape=(jax.ShapeDtypeStruct((B, C, HW), jnp.float32),
                   jax.ShapeDtypeStruct((B, Ch, HW), jnp.float32),
                   jax.ShapeDtypeStruct((B, Ch, HW), jnp.float32)),
        grid_spec=pltpu.PrefetchScalarGridSpec(
            num_scalar_prefetch=0,
            grid=(grid_blocks,),
            in_specs=[
                pl.BlockSpec(memory_space=pltpu.MemorySpace.SMEM),      # 1/gradnorm scalar
                pl.BlockSpec((BB, C, HW), lambda g: (g, 0, 0)),         # x   (grad_)
                pl.BlockSpec((BB, Ch, HW), lambda g: (g, 0, 0)),        # prev hidden
                pl.BlockSpec((BB, Ch, HW), lambda g: (g, 0, 0)),        # prev cell
                pl.BlockSpec((9, HW), lambda g: (0, 0)),                # tap boundary masks
                pl.BlockSpec((4 * Chp, Kp), lambda g: (0, 0)),          # packed gate weight + bias (bf16)
                pl.BlockSpec((C, Ch), lambda g: (0, 0)),                # 1x1 output conv weight
            ],
            out_specs=[
                pl.BlockSpec((BB, C, HW), lambda g: (g, 0, 0)),
                pl.BlockSpec((BB, Ch, HW), lambda g: (g, 0, 0)),
                pl.BlockSpec((BB, Ch, HW), lambda g: (g, 0, 0)),
            ],
            scratch_shapes=[
                pltpu.VMEM((Kp, BB * HW), jnp.bfloat16),                # stacked rolled taps (+ ones row)
                pltpu.VMEM((4 * Chp, BB * HW), jnp.float32),            # gate pre-activations
            ]),
        compiler_params=pltpu.CompilerParams(
            dimension_semantics=("parallel",)),     # batch blocks across both TCs on v7x
    )(inv_gn, x, h, c, masks, wg_k, wo_k)

    return (grad_o.reshape(B, C, H, W),
            hid_o.reshape(B, Ch, H, W),
            cell_o.reshape(B, Ch, H, W))


# ----------------------------------------------------------------------------
# parameter init + pure-JAX reference (for the numeric check)
# ----------------------------------------------------------------------------
def init_grad_update_lstm_params(key, shape_data, dim_lstm=0):
    """Deterministic init mirroring model_GradUpdateLSTM.__init__ for 3-D ShapeData:
    ConvLSTM2d gate conv (C+5C -> 4*5C, 3x3, bias) and the 1x1 bias-free output conv."""
    C = shape_data[0]
    Ch = 5 * C if dim_lstm == 0 else dim_lstm
    kg, kb, ko = jax.random.split(key, 3)
    lim_g = 1.0 / np.sqrt((C + Ch) * 9)
    lim_o = 1.0 / np.sqrt(Ch)
    return {
        "w_gates": jax.random.uniform(kg, (4 * Ch, C + Ch, 3, 3), jnp.float32, -lim_g, lim_g),
        "b_gates": jax.random.uniform(kb, (4 * Ch,), jnp.float32, -lim_g, lim_g),
        "w_out":   jax.random.uniform(ko, (C, Ch, 1, 1), jnp.float32, -lim_o, lim_o),
    }


def _ref_forward(params, hidden, cell, grad_, gradnorm=1.0):
    B, C, H, W = grad_.shape
    wg = params["w_gates"].astype(jnp.float32)
    bg = params["b_gates"].astype(jnp.float32)
    wo = params["w_out"].astype(jnp.float32)
    Ch = wg.shape[0] // 4
    x = grad_.astype(jnp.float32) / gradnorm
    if hidden is None:
        hidden = jnp.zeros((B, Ch, H, W), jnp.float32)
        cell = jnp.zeros((B, Ch, H, W), jnp.float32)
    stacked = jnp.concatenate([x, hidden.astype(jnp.float32)], axis=1)
    gates = jax.lax.conv_general_dilated(
        stacked, wg, window_strides=(1, 1), padding=((1, 1), (1, 1)),
        dimension_numbers=("NCHW", "OIHW", "NCHW"),
        precision=jax.lax.Precision.HIGHEST)
    gates = gates + bg[None, :, None, None]
    in_g, rem_g, out_g, cg = jnp.split(gates, 4, axis=1)
    c_new = jax.nn.sigmoid(rem_g) * cell.astype(jnp.float32) \
        + jax.nn.sigmoid(in_g) * jnp.tanh(cg)
    h_new = jax.nn.sigmoid(out_g) * jnp.tanh(c_new)
    grad = jax.lax.conv_general_dilated(
        h_new, wo, window_strides=(1, 1), padding=((0, 0), (0, 0)),
        dimension_numbers=("NCHW", "OIHW", "NCHW"),
        precision=jax.lax.Precision.HIGHEST)
    return grad, h_new, c_new


def _bf16_round(a):
    # round to bf16-representable values so MXU (bf16-mantissa) matmuls are exact
    # and the kernel/reference comparison is precision-agnostic
    return a.astype(jnp.bfloat16).astype(jnp.float32)


if __name__ == "__main__":
    # ShapeData = (C, H, W) = (4, 16, 16), dim_state = 5*C = 20, batch = 2
    B, C, H, W = 2, 4, 16, 16
    Ch = 5 * C

    key = jax.random.PRNGKey(0)
    kp, kx1, kx2, kh, kc = jax.random.split(key, 5)
    params = jax.tree_util.tree_map(
        _bf16_round, init_grad_update_lstm_params(kp, (C, H, W)))
    g1 = _bf16_round(jax.random.normal(kx1, (B, C, H, W), jnp.float32))
    g2 = _bf16_round(jax.random.normal(kx2, (B, C, H, W), jnp.float32))
    h0 = _bf16_round(0.5 * jax.random.normal(kh, (B, Ch, H, W), jnp.float32))
    c0 = _bf16_round(0.5 * jax.random.normal(kc, (B, Ch, H, W), jnp.float32))

    # cold-start path (prev_state is None, gradnorm=1.0)
    out1 = jax.block_until_ready(
        grad_update_lstm_forward(params, None, None, g1, gradnorm=1.0))
    ref1 = jax.block_until_ready(_ref_forward(params, None, None, g1, gradnorm=1.0))

    # warm path (given hidden/cell, gradnorm != 1)
    out2 = jax.block_until_ready(
        grad_update_lstm_forward(params, h0, c0, g2, gradnorm=2.0))
    ref2 = jax.block_until_ready(_ref_forward(params, h0, c0, g2, gradnorm=2.0))

    for o, r in zip(out1 + out2, ref1 + ref2):
        assert o.shape == r.shape, (o.shape, r.shape)
        np.testing.assert_allclose(np.asarray(o), np.asarray(r),
                                   rtol=5e-3, atol=5e-3)
    print("KERNEL_OK")
</pallas_src>

<mosaic_0001>
module attributes {stable_mosaic.version = 11 : i64} {
  func.func @_grad_lstm_kernel(%arg0: i32, %arg1: memref<1x1xf32, #tpu.memory_space<smem>>, %arg2: memref<2x4x256xf32, #tpu.memory_space<vmem>>, %arg3: memref<2x20x256xf32, #tpu.memory_space<vmem>>, %arg4: memref<2x20x256xf32, #tpu.memory_space<vmem>>, %arg5: memref<9x256xf32, #tpu.memory_space<vmem>>, %arg6: memref<96x289xbf16, #tpu.memory_space<vmem>>, %arg7: memref<4x20xf32, #tpu.memory_space<vmem>>, %arg8: memref<2x4x256xf32, #tpu.memory_space<vmem>>, %arg9: memref<2x20x256xf32, #tpu.memory_space<vmem>>, %arg10: memref<2x20x256xf32, #tpu.memory_space<vmem>>, %arg11: memref<289x512xbf16, #tpu.memory_space<vmem>>, %arg12: memref<96x512xf32, #tpu.memory_space<vmem>>) attributes {dimension_semantics = [#tpu.dimension_semantics<parallel>], iteration_bounds = array<i64: 1>, scalar_prefetch = 0 : i64, scratch_operands = 2 : i64, tpu.core_type = #tpu.core_type<tc>, window_params = [{transform_indices = @transform_0, window_bounds = array<i64: 1, 1>}, {transform_indices = @transform_1, window_bounds = array<i64: 2, 4, 256>}, {transform_indices = @transform_2, window_bounds = array<i64: 2, 20, 256>}, {transform_indices = @transform_3, window_bounds = array<i64: 2, 20, 256>}, {pipeline_mode = #tpu.pipeline_mode<synchronous>, transform_indices = @transform_4, window_bounds = array<i64: 9, 256>}, {pipeline_mode = #tpu.pipeline_mode<synchronous>, transform_indices = @transform_5, window_bounds = array<i64: 96, 289>}, {pipeline_mode = #tpu.pipeline_mode<synchronous>, transform_indices = @transform_6, window_bounds = array<i64: 4, 20>}, {transform_indices = @transform_7, window_bounds = array<i64: 2, 4, 256>}, {transform_indices = @transform_8, window_bounds = array<i64: 2, 20, 256>}, {transform_indices = @transform_9, window_bounds = array<i64: 2, 20, 256>}]} {
    %c0 = arith.constant 0 : index
    %c0_0 = arith.constant 0 : index
    %0 = memref.load %arg1[%c0, %c0_0] : memref<1x1xf32, #tpu.memory_space<smem>>
    %cst = arith.constant 1.000000e+00 : bf16
    %1 = vector.broadcast %cst : bf16 to vector<1x512xbf16>
    %c288 = arith.constant 288 : index
    %c0_1 = arith.constant 0 : index
    %2 = vector.load %arg11[%c288, %c0_1] : memref<289x512xbf16, #tpu.memory_space<vmem>>, vector<1x512xbf16>
    tpu.vector_store %arg11[%c288, %c0_1], %1 {strides = array<i32>} : memref<289x512xbf16, #tpu.memory_space<vmem>>, vector<1x512xbf16>,
    %c0_2 = arith.constant 0 : index
    %c0_3 = arith.constant 0 : index
    %c0_4 = arith.constant 0 : index
    %3 = vector.load %arg2[%c0_2, %c0_3, %c0_4] : memref<2x4x256xf32, #tpu.memory_space<vmem>>, vector<1x4x256xf32>
    %4 = vector.shape_cast %3 : vector<1x4x256xf32> to vector<4x256xf32>
    %5 = vector.broadcast %0 : f32 to vector<4x256xf32>
    %6 = arith.mulf %4, %5 : vector<4x256xf32>
    %c0_5 = arith.constant 0 : index
    %c0_6 = arith.constant 0 : index
    %c0_7 = arith.constant 0 : index
    %7 = vector.load %arg3[%c0_5, %c0_6, %c0_7] : memref<2x20x256xf32, #tpu.memory_space<vmem>>, vector<1x20x256xf32>
    %8 = vector.shape_cast %7 : vector<1x20x256xf32> to vector<20x256xf32>
    %cst_8 = arith.constant 0.000000e+00 : f32
    %9 = vector.broadcast %cst_8 : f32 to vector<8x256xf32>
    %10 = tpu.concatenate %6, %8, %9 in 0 : vector<4x256xf32>, vector<20x256xf32>, vector<8x256xf32> -> vector<32x256xf32>
    %c17_i32 = arith.constant 17 : i32
    %11 = tpu.dynamic_rotate %10 by %c17_i32 dim 1 : vector<32x256xf32>, i32 -> vector<32x256xf32>
    %c0_9 = arith.constant 0 : index
    %c0_10 = arith.constant 0 : index
    %12 = vector.load %arg5[%c0_9, %c0_10] : memref<9x256xf32, #tpu.memory_space<vmem>>, vector<1x256xf32>
    %13 = vector.broadcast %12 : vector<1x256xf32> to vector<32x256xf32>
    %14 = arith.mulf %11, %13 : vector<32x256xf32>
    %15 = arith.truncf %14 : vector<32x256xf32> to vector<32x256xbf16>
    %c0_11 = arith.constant 0 : index
    %c0_12 = arith.constant 0 : index
    %16 = vector.load %arg11[%c0_11, %c0_12] : memref<289x512xbf16, #tpu.memory_space<vmem>>, vector<32x256xbf16>
    tpu.vector_store %arg11[%c0_11, %c0_12], %15 {strides = array<i32>} : memref<289x512xbf16, #tpu.memory_space<vmem>>, vector<32x256xbf16>,
    %c16_i32 = arith.constant 16 : i32
    %17 = tpu.dynamic_rotate %10 by %c16_i32 dim 1 : vector<32x256xf32>, i32 -> vector<32x256xf32>
    %c1 = arith.constant 1 : index
    %c0_13 = arith.constant 0 : index
    %18 = vector.load %arg5[%c1, %c0_13] : memref<9x256xf32, #tpu.memory_space<vmem>>, vector<1x256xf32>
    %19 = vector.broadcast %18 : vector<1x256xf32> to vector<32x256xf32>
    %20 = arith.mulf %17, %19 : vector<32x256xf32>
    %21 = arith.truncf %20 : vector<32x256xf32> to vector<32x256xbf16>
    %c32 = arith.constant 32 : index
    %c0_14 = arith.constant 0 : index
    %22 = vector.load %arg11[%c32, %c0_14] : memref<289x512xbf16, #tpu.memory_space<vmem>>, vector<32x256xbf16>
    tpu.vector_store %arg11[%c32, %c0_14], %21 {strides = array<i32>} : memref<289x512xbf16, #tpu.memory_space<vmem>>, vector<32x256xbf16>,
    %c15_i32 = arith.constant 15 : i32
    %23 = tpu.dynamic_rotate %10 by %c15_i32 dim 1 : vector<32x256xf32>, i32 -> vector<32x256xf32>
    %c2 = arith.constant 2 : index
    %c0_15 = arith.constant 0 : index
    %24 = vector.load %arg5[%c2, %c0_15] : memref<9x256xf32, #tpu.memory_space<vmem>>, vector<1x256xf32>
    %25 = vector.broadcast %24 : vector<1x256xf32> to vector<32x256xf32>
    %26 = arith.mulf %23, %25 : vector<32x256xf32>
    %27 = arith.truncf %26 : vector<32x256xf32> to vector<32x256xbf16>
    %c64 = arith.constant 64 : index
    %c0_16 = arith.constant 0 : index
    %28 = vector.load %arg11[%c64, %c0_16] : memref<289x512xbf16, #tpu.memory_space<vmem>>, vector<32x256xbf16>
    tpu.vector_store %arg11[%c64, %c0_16], %27 {strides = array<i32>} : memref<289x512xbf16, #tpu.memory_space<vmem>>, vector<32x256xbf16>,
    %c1_i32 = arith.constant 1 : i32
    %29 = tpu.dynamic_rotate %10 by %c1_i32 dim 1 : vector<32x256xf32>, i32 -> vector<32x256xf32>
    %c3 = arith.constant 3 : index
    %c0_17 = arith.constant 0 : index
    %30 = vector.load %arg5[%c3, %c0_17] : memref<9x256xf32, #tpu.memory_space<vmem>>, vector<1x256xf32>
    %31 = vector.broadcast %30 : vector<1x256xf32> to vector<32x256xf32>
    %32 = arith.mulf %29, %31 : vector<32x256xf32>
    %33 = arith.truncf %32 : vector<32x256xf32> to vector<32x256xbf16>
    %c96 = arith.constant 96 : index
    %c0_18 = arith.constant 0 : index
    %34 = vector.load %arg11[%c96, %c0_18] : memref<289x512xbf16, #tpu.memory_space<vmem>>, vector<32x256xbf16>
    tpu.vector_store %arg11[%c96, %c0_18], %33 {strides = array<i32>} : memref<289x512xbf16, #tpu.memory_space<vmem>>, vector<32x256xbf16>,
    %35 = arith.truncf %10 : vector<32x256xf32> to vector<32x256xbf16>
    %c128 = arith.constant 128 : index
    %c0_19 = arith.constant 0 : index
    %36 = vector.load %arg11[%c128, %c0_19] : memref<289x512xbf16, #tpu.memory_space<vmem>>, vector<32x256xbf16>
    tpu.vector_store %arg11[%c128, %c0_19], %35 {strides = array<i32>} : memref<289x512xbf16, #tpu.memory_space<vmem>>, vector<32x256xbf16>,
    %c255_i32 = arith.constant 255 : i32
    %37 = tpu.dynamic_rotate %10 by %c255_i32 dim 1 : vector<32x256xf32>, i32 -> vector<32x256xf32>
    %c5 = arith.constant 5 : index
    %c0_20 = arith.constant 0 : index
    %38 = vector.load %arg5[%c5, %c0_20] : memref<9x256xf32, #tpu.memory_space<vmem>>, vector<1x256xf32>
    %39 = vector.broadcast %38 : vector<1x256xf32> to vector<32x256xf32>
    %40 = arith.mulf %37, %39 : vector<32x256xf32>
    %41 = arith.truncf %40 : vector<32x256xf32> to vector<32x256xbf16>
    %c160 = arith.constant 160 : index
    %c0_21 = arith.constant 0 : index
    %42 = vector.load %arg11[%c160, %c0_21] : memref<289x512xbf16, #tpu.memory_space<vmem>>, vector<32x256xbf16>
    tpu.vector_store %arg11[%c160, %c0_21], %41 {strides = array<i32>} : memref<289x512xbf16, #tpu.memory_space<vmem>>, vector<32x256xbf16>,
    %c241_i32 = arith.constant 241 : i32
    %43 = tpu.dynamic_rotate %10 by %c241_i32 dim 1 : vector<32x256xf32>, i32 -> vector<32x256xf32>
    %c6 = arith.constant 6 : index
    %c0_22 = arith.constant 0 : index
    %44 = vector.load %arg5[%c6, %c0_22] : memref<9x256xf32, #tpu.memory_space<vmem>>, vector<1x256xf32>
    %45 = vector.broadcast %44 : vector<1x256xf32> to vector<32x256xf32>
    %46 = arith.mulf %43, %45 : vector<32x256xf32>
    %47 = arith.truncf %46 : vector<32x256xf32> to vector<32x256xbf16>
    %c192 = arith.constant 192 : index
    %c0_23 = arith.constant 0 : index
    %48 = vector.load %arg11[%c192, %c0_23] : memref<289x512xbf16, #tpu.memory_space<vmem>>, vector<32x256xbf16>
    tpu.vector_store %arg11[%c192, %c0_23], %47 {strides = array<i32>} : memref<289x512xbf16, #tpu.memory_space<vmem>>, vector<32x256xbf16>,
    %c240_i32 = arith.constant 240 : i32
    %49 = tpu.dynamic_rotate %10 by %c240_i32 dim 1 : vector<32x256xf32>, i32 -> vector<32x256xf32>
    %c7 = arith.constant 7 : index
    %c0_24 = arith.constant 0 : index
    %50 = vector.load %arg5[%c7, %c0_24] : memref<9x256xf32, #tpu.memory_space<vmem>>, vector<1x256xf32>
    %51 = vector.broadcast %50 : vector<1x256xf32> to vector<32x256xf32>
    %52 = arith.mulf %49, %51 : vector<32x256xf32>
    %53 = arith.truncf %52 : vector<32x256xf32> to vector<32x256xbf16>
    %c224 = arith.constant 224 : index
    %c0_25 = arith.constant 0 : index
    %54 = vector.load %arg11[%c224, %c0_25] : memref<289x512xbf16, #tpu.memory_space<vmem>>, vector<32x256xbf16>
    tpu.vector_store %arg11[%c224, %c0_25], %53 {strides = array<i32>} : memref<289x512xbf16, #tpu.memory_space<vmem>>, vector<32x256xbf16>,
    %c239_i32 = arith.constant 239 : i32
    %55 = tpu.dynamic_rotate %10 by %c239_i32 dim 1 : vector<32x256xf32>, i32 -> vector<32x256xf32>
    %c8 = arith.constant 8 : index
    %c0_26 = arith.constant 0 : index
    %56 = vector.load %arg5[%c8, %c0_26] : memref<9x256xf32, #tpu.memory_space<vmem>>, vector<1x256xf32>
    %57 = vector.broadcast %56 : vector<1x256xf32> to vector<32x256xf32>
    %58 = arith.mulf %55, %57 : vector<32x256xf32>
    %59 = arith.truncf %58 : vector<32x256xf32> to vector<32x256xbf16>
    %c256 = arith.constant 256 : index
    %c0_27 = arith.constant 0 : index
    %60 = vector.load %arg11[%c256, %c0_27] : memref<289x512xbf16, #tpu.memory_space<vmem>>, vector<32x256xbf16>
    tpu.vector_store %arg11[%c256, %c0_27], %59 {strides = array<i32>} : memref<289x512xbf16, #tpu.memory_space<vmem>>, vector<32x256xbf16>,
    %c1_28 = arith.constant 1 : index
    %c0_29 = arith.constant 0 : index
    %c0_30 = arith.constant 0 : index
    %61 = vector.load %arg2[%c1_28, %c0_29, %c0_30] : memref<2x4x256xf32, #tpu.memory_space<vmem>>, vector<1x4x256xf32>
    %62 = vector.shape_cast %61 : vector<1x4x256xf32> to vector<4x256xf32>
    %63 = vector.broadcast %0 : f32 to vector<4x256xf32>
    %64 = arith.mulf %62, %63 : vector<4x256xf32>
    %c1_31 = arith.constant 1 : index
    %c0_32 = arith.constant 0 : index
    %c0_33 = arith.constant 0 : index
    %65 = vector.load %arg3[%c1_31, %c0_32, %c0_33] : memref<2x20x256xf32, #tpu.memory_space<vmem>>, vector<1x20x256xf32>
    %66 = vector.shape_cast %65 : vector<1x20x256xf32> to vector<20x256xf32>
    %cst_34 = arith.constant 0.000000e+00 : f32
    %67 = vector.broadcast %cst_34 : f32 to vector<8x256xf32>
    %68 = tpu.concatenate %64, %66, %67 in 0 : vector<4x256xf32>, vector<20x256xf32>, vector<8x256xf32> -> vector<32x256xf32>
    %c17_i32_35 = arith.constant 17 : i32
    %69 = tpu.dynamic_rotate %68 by %c17_i32_35 dim 1 : vector<32x256xf32>, i32 -> vector<32x256xf32>
    %c0_36 = arith.constant 0 : index
    %c0_37 = arith.constant 0 : index
    %70 = vector.load %arg5[%c0_36, %c0_37] : memref<9x256xf32, #tpu.memory_space<vmem>>, vector<1x256xf32>
    %71 = vector.broadcast %70 : vector<1x256xf32> to vector<32x256xf32>
    %72 = arith.mulf %69, %71 : vector<32x256xf32>
    %73 = arith.truncf %72 : vector<32x256xf32> to vector<32x256xbf16>
    %c0_38 = arith.constant 0 : index
    %c256_39 = arith.constant 256 : index
    %74 = vector.load %arg11[%c0_38, %c256_39] : memref<289x512xbf16, #tpu.memory_space<vmem>>, vector<32x256xbf16>
    tpu.vector_store %arg11[%c0_38, %c256_39], %73 {strides = array<i32>} : memref<289x512xbf16, #tpu.memory_space<vmem>>, vector<32x256xbf16>,
    %c16_i32_40 = arith.constant 16 : i32
    %75 = tpu.dynamic_rotate %68 by %c16_i32_40 dim 1 : vector<32x256xf32>, i32 -> vector<32x256xf32>
    %c1_41 = arith.constant 1 : index
    %c0_42 = arith.constant 0 : index
    %76 = vector.load %arg5[%c1_41, %c0_42] : memref<9x256xf32, #tpu.memory_space<vmem>>, vector<1x256xf32>
    %77 = vector.broadcast %76 : vector<1x256xf32> to vector<32x256xf32>
    %78 = arith.mulf %75, %77 : vector<32x256xf32>
    %79 = arith.truncf %78 : vector<32x256xf32> to vector<32x256xbf16>
    %c32_43 = arith.constant 32 : index
    %c256_44 = arith.constant 256 : index
    %80 = vector.load %arg11[%c32_43, %c256_44] : memref<289x512xbf16, #tpu.memory_space<vmem>>, vector<32x256xbf16>
    tpu.vector_store %arg11[%c32_43, %c256_44], %79 {strides = array<i32>} : memref<289x512xbf16, #tpu.memory_space<vmem>>, vector<32x256xbf16>,
    %c15_i32_45 = arith.constant 15 : i32
    %81 = tpu.dynamic_rotate %68 by %c15_i32_45 dim 1 : vector<32x256xf32>, i32 -> vector<32x256xf32>
    %c2_46 = arith.constant 2 : index
    %c0_47 = arith.constant 0 : index
    %82 = vector.load %arg5[%c2_46, %c0_47] : memref<9x256xf32, #tpu.memory_space<vmem>>, vector<1x256xf32>
    %83 = vector.broadcast %82 : vector<1x256xf32> to vector<32x256xf32>
    %84 = arith.mulf %81, %83 : vector<32x256xf32>
    %85 = arith.truncf %84 : vector<32x256xf32> to vector<32x256xbf16>
    %c64_48 = arith.constant 64 : index
    %c256_49 = arith.constant 256 : index
    %86 = vector.load %arg11[%c64_48, %c256_49] : memref<289x512xbf16, #tpu.memory_space<vmem>>, vector<32x256xbf16>
    tpu.vector_store %arg11[%c64_48, %c256_49], %85 {strides = array<i32>} : memref<289x512xbf16, #tpu.memory_space<vmem>>, vector<32x256xbf16>,
    %c1_i32_50 = arith.constant 1 : i32
    %87 = tpu.dynamic_rotate %68 by %c1_i32_50 dim 1 : vector<32x256xf32>, i32 -> vector<32x256xf32>
    %c3_51 = arith.constant 3 : index
    %c0_52 = arith.constant 0 : index
    %88 = vector.load %arg5[%c3_51, %c0_52] : memref<9x256xf32, #tpu.memory_space<vmem>>, vector<1x256xf32>
    %89 = vector.broadcast %88 : vector<1x256xf32> to vector<32x256xf32>
    %90 = arith.mulf %87, %89 : vector<32x256xf32>
    %91 = arith.truncf %90 : vector<32x256xf32> to vector<32x256xbf16>
    %c96_53 = arith.constant 96 : index
    %c256_54 = arith.constant 256 : index
    %92 = vector.load %arg11[%c96_53, %c256_54] : memref<289x512xbf16, #tpu.memory_space<vmem>>, vector<32x256xbf16>
    tpu.vector_store %arg11[%c96_53, %c256_54], %91 {strides = array<i32>} : memref<289x512xbf16, #tpu.memory_space<vmem>>, vector<32x256xbf16>,
    %93 = arith.truncf %68 : vector<32x256xf32> to vector<32x256xbf16>
    %c128_55 = arith.constant 128 : index
    %c256_56 = arith.constant 256 : index
    %94 = vector.load %arg11[%c128_55, %c256_56] : memref<289x512xbf16, #tpu.memory_space<vmem>>, vector<32x256xbf16>
    tpu.vector_store %arg11[%c128_55, %c256_56], %93 {strides = array<i32>} : memref<289x512xbf16, #tpu.memory_space<vmem>>, vector<32x256xbf16>,
    %c255_i32_57 = arith.constant 255 : i32
    %95 = tpu.dynamic_rotate %68 by %c255_i32_57 dim 1 : vector<32x256xf32>, i32 -> vector<32x256xf32>
    %c5_58 = arith.constant 5 : index
    %c0_59 = arith.constant 0 : index
    %96 = vector.load %arg5[%c5_58, %c0_59] : memref<9x256xf32, #tpu.memory_space<vmem>>, vector<1x256xf32>
    %97 = vector.broadcast %96 : vector<1x256xf32> to vector<32x256xf32>
    %98 = arith.mulf %95, %97 : vector<32x256xf32>
    %99 = arith.truncf %98 : vector<32x256xf32> to vector<32x256xbf16>
    %c160_60 = arith.constant 160 : index
    %c256_61 = arith.constant 256 : index
    %100 = vector.load %arg11[%c160_60, %c256_61] : memref<289x512xbf16, #tpu.memory_space<vmem>>, vector<32x256xbf16>
    tpu.vector_store %arg11[%c160_60, %c256_61], %99 {strides = array<i32>} : memref<289x512xbf16, #tpu.memory_space<vmem>>, vector<32x256xbf16>,
    %c241_i32_62 = arith.constant 241 : i32
    %101 = tpu.dynamic_rotate %68 by %c241_i32_62 dim 1 : vector<32x256xf32>, i32 -> vector<32x256xf32>
    %c6_63 = arith.constant 6 : index
    %c0_64 = arith.constant 0 : index
    %102 = vector.load %arg5[%c6_63, %c0_64] : memref<9x256xf32, #tpu.memory_space<vmem>>, vector<1x256xf32>
    %103 = vector.broadcast %102 : vector<1x256xf32> to vector<32x256xf32>
    %104 = arith.mulf %101, %103 : vector<32x256xf32>
    %105 = arith.truncf %104 : vector<32x256xf32> to vector<32x256xbf16>
    %c192_65 = arith.constant 192 : index
    %c256_66 = arith.constant 256 : index
    %106 = vector.load %arg11[%c192_65, %c256_66] : memref<289x512xbf16, #tpu.memory_space<vmem>>, vector<32x256xbf16>
    tpu.vector_store %arg11[%c192_65, %c256_66], %105 {strides = array<i32>} : memref<289x512xbf16, #tpu.memory_space<vmem>>, vector<32x256xbf16>,
    %c240_i32_67 = arith.constant 240 : i32
    %107 = tpu.dynamic_rotate %68 by %c240_i32_67 dim 1 : vector<32x256xf32>, i32 -> vector<32x256xf32>
    %c7_68 = arith.constant 7 : index
    %c0_69 = arith.constant 0 : index
    %108 = vector.load %arg5[%c7_68, %c0_69] : memref<9x256xf32, #tpu.memory_space<vmem>>, vector<1x256xf32>
    %109 = vector.broadcast %108 : vector<1x256xf32> to vector<32x256xf32>
    %110 = arith.mulf %107, %109 : vector<32x256xf32>
    %111 = arith.truncf %110 : vector<32x256xf32> to vector<32x256xbf16>
    %c224_70 = arith.constant 224 : index
    %c256_71 = arith.constant 256 : index
    %112 = vector.load %arg11[%c224_70, %c256_71] : memref<289x512xbf16, #tpu.memory_space<vmem>>, vector<32x256xbf16>
    tpu.vector_store %arg11[%c224_70, %c256_71], %111 {strides = array<i32>} : memref<289x512xbf16, #tpu.memory_space<vmem>>, vector<32x256xbf16>,
    %c239_i32_72 = arith.constant 239 : i32
    %113 = tpu.dynamic_rotate %68 by %c239_i32_72 dim 1 : vector<32x256xf32>, i32 -> vector<32x256xf32>
    %c8_73 = arith.constant 8 : index
    %c0_74 = arith.constant 0 : index
    %114 = vector.load %arg5[%c8_73, %c0_74] : memref<9x256xf32, #tpu.memory_space<vmem>>, vector<1x256xf32>
    %115 = vector.broadcast %114 : vector<1x256xf32> to vector<32x256xf32>
    %116 = arith.mulf %113, %115 : vector<32x256xf32>
    %117 = arith.truncf %116 : vector<32x256xf32> to vector<32x256xbf16>
    %c256_75 = arith.constant 256 : index
    %c256_76 = arith.constant 256 : index
    %118 = vector.load %arg11[%c256_75, %c256_76] : memref<289x512xbf16, #tpu.memory_space<vmem>>, vector<32x256xbf16>
    tpu.vector_store %arg11[%c256_75, %c256_76], %117 {strides = array<i32>} : memref<289x512xbf16, #tpu.memory_space<vmem>>, vector<32x256xbf16>,
    %c0_77 = arith.constant 0 : index
    %c0_78 = arith.constant 0 : index
    %119 = vector.load %arg6[%c0_77, %c0_78] : memref<96x289xbf16, #tpu.memory_space<vmem>>, vector<96x289xbf16>
    %c0_79 = arith.constant 0 : index
    %c0_80 = arith.constant 0 : index
    %120 = vector.load %arg11[%c0_79, %c0_80] : memref<289x512xbf16, #tpu.memory_space<vmem>>, vector<289x512xbf16>
    %cst_81 = arith.constant dense<0.000000e+00> : vector<96x512xf32>
    %121 = tpu.matmul %119, %120, %cst_81 {dimension_numbers = #tpu.dot_dimension_numbers<[1], [0], [0], [1], [0, 0, 1, 1], [], []>} : vector<96x289xbf16>, vector<289x512xbf16>, vector<96x512xf32> -> vector<96x512xf32>
    %c0_82 = arith.constant 0 : index
    %c0_83 = arith.constant 0 : index
    %122 = vector.load %arg12[%c0_82, %c0_83] : memref<96x512xf32, #tpu.memory_space<vmem>>, vector<96x512xf32>
    tpu.vector_store %arg12[%c0_82, %c0_83], %121 {strides = array<i32>} : memref<96x512xf32, #tpu.memory_space<vmem>>, vector<96x512xf32>,
    %c0_84 = arith.constant 0 : index
    %c0_85 = arith.constant 0 : index
    %123 = vector.load %arg12[%c0_84, %c0_85] : memref<96x512xf32, #tpu.memory_space<vmem>>, vector<20x256xf32>
    %124 = arith.negf %123 : vector<20x256xf32>
    %125 = math.exp %124 : vector<20x256xf32>
    %cst_86 = arith.constant 1.000000e+00 : f32
    %126 = vector.broadcast %cst_86 : f32 to vector<20x256xf32>
    %127 = arith.addf %126, %125 : vector<20x256xf32>
    %128 = arith.divf %126, %127 : vector<20x256xf32>
    %c24 = arith.constant 24 : index
    %c0_87 = arith.constant 0 : index
    %129 = vector.load %arg12[%c24, %c0_87] : memref<96x512xf32, #tpu.memory_space<vmem>>, vector<20x256xf32>
    %130 = arith.negf %129 : vector<20x256xf32>
    %131 = math.exp %130 : vector<20x256xf32>
    %cst_88 = arith.constant 1.000000e+00 : f32
    %132 = vector.broadcast %cst_88 : f32 to vector<20x256xf32>
    %133 = arith.addf %132, %131 : vector<20x256xf32>
    %134 = arith.divf %132, %133 : vector<20x256xf32>
    %c48 = arith.constant 48 : index
    %c0_89 = arith.constant 0 : index
    %135 = vector.load %arg12[%c48, %c0_89] : memref<96x512xf32, #tpu.memory_space<vmem>>, vector<20x256xf32>
    %136 = arith.negf %135 : vector<20x256xf32>
    %137 = math.exp %136 : vector<20x256xf32>
    %cst_90 = arith.constant 1.000000e+00 : f32
    %138 = vector.broadcast %cst_90 : f32 to vector<20x256xf32>
    %139 = arith.addf %138, %137 : vector<20x256xf32>
    %140 = arith.divf %138, %139 : vector<20x256xf32>
    %c72 = arith.constant 72 : index
    %c0_91 = arith.constant 0 : index
    %141 = vector.load %arg12[%c72, %c0_91] : memref<96x512xf32, #tpu.memory_space<vmem>>, vector<20x256xf32>
    %142 = math.tanh %141 : vector<20x256xf32>
    %c0_92 = arith.constant 0 : index
    %c0_93 = arith.constant 0 : index
    %c0_94 = arith.constant 0 : index
    %143 = vector.load %arg4[%c0_92, %c0_93, %c0_94] : memref<2x20x256xf32, #tpu.memory_space<vmem>>, vector<1x20x256xf32>
    %144 = vector.shape_cast %143 : vector<1x20x256xf32> to vector<20x256xf32>
    %145 = arith.mulf %134, %144 : vector<20x256xf32>
    %146 = arith.mulf %128, %142 : vector<20x256xf32>
    %147 = arith.addf %145, %146 : vector<20x256xf32>
    %148 = math.tanh %147 : vector<20x256xf32>
    %149 = arith.mulf %140, %148 : vector<20x256xf32>
    %c0_95 = arith.constant 0 : index
    %c0_96 = arith.constant 0 : index
    %150 = vector.load %arg7[%c0_95, %c0_96] : memref<4x20xf32, #tpu.memory_space<vmem>>, vector<4x20xf32>
    %cst_97 = arith.constant dense<0.000000e+00> : vector<4x256xf32>
    %151 = tpu.matmul %150, %149, %cst_97 {dimension_numbers = #tpu.dot_dimension_numbers<[1], [0], [0], [1], [0, 0, 1, 1], [], []>} : vector<4x20xf32>, vector<20x256xf32>, vector<4x256xf32> -> vector<4x256xf32>
    %c0_98 = arith.constant 0 : index
    %c0_99 = arith.constant 0 : index
    %c0_100 = arith.constant 0 : index
    %152 = vector.load %arg8[%c0_98, %c0_99, %c0_100] : memref<2x4x256xf32, #tpu.memory_space<vmem>>, vector<1x4x256xf32>
    %153 = vector.shape_cast %152 : vector<1x4x256xf32> to vector<4x256xf32>
    %154 = vector.shape_cast %151 : vector<4x256xf32> to vector<1x4x256xf32>
    tpu.vector_store %arg8[%c0_98, %c0_99, %c0_100], %154 {strides = array<i32>} : memref<2x4x256xf32, #tpu.memory_space<vmem>>, vector<1x4x256xf32>,
    %c0_101 = arith.constant 0 : index
    %c0_102 = arith.constant 0 : index
    %c0_103 = arith.constant 0 : index
    %155 = vector.load %arg9[%c0_101, %c0_102, %c0_103] : memref<2x20x256xf32, #tpu.memory_space<vmem>>, vector<1x20x256xf32>
    %156 = vector.shape_cast %155 : vector<1x20x256xf32> to vector<20x256xf32>
    %157 = vector.shape_cast %149 : vector<20x256xf32> to vector<1x20x256xf32>
    tpu.vector_store %arg9[%c0_101, %c0_102, %c0_103], %157 {strides = array<i32>} : memref<2x20x256xf32, #tpu.memory_space<vmem>>, vector<1x20x256xf32>,
    %c0_104 = arith.constant 0 : index
    %c0_105 = arith.constant 0 : index
    %c0_106 = arith.constant 0 : index
    %158 = vector.load %arg10[%c0_104, %c0_105, %c0_106] : memref<2x20x256xf32, #tpu.memory_space<vmem>>, vector<1x20x256xf32>
    %159 = vector.shape_cast %158 : vector<1x20x256xf32> to vector<20x256xf32>
    %160 = vector.shape_cast %147 : vector<20x256xf32> to vector<1x20x256xf32>
    tpu.vector_store %arg10[%c0_104, %c0_105, %c0_106], %160 {strides = array<i32>} : memref<2x20x256xf32, #tpu.memory_space<vmem>>, vector<1x20x256xf32>,
    %c0_107 = arith.constant 0 : index
    %c256_108 = arith.constant 256 : index
    %161 = vector.load %arg12[%c0_107, %c256_108] : memref<96x512xf32, #tpu.memory_space<vmem>>, vector<20x256xf32>
    %162 = arith.negf %161 : vector<20x256xf32>
    %163 = math.exp %162 : vector<20x256xf32>
    %cst_109 = arith.constant 1.000000e+00 : f32
    %164 = vector.broadcast %cst_109 : f32 to vector<20x256xf32>
    %165 = arith.addf %164, %163 : vector<20x256xf32>
    %166 = arith.divf %164, %165 : vector<20x256xf32>
    %c24_110 = arith.constant 24 : index
    %c256_111 = arith.constant 256 : index
    %167 = vector.load %arg12[%c24_110, %c256_111] : memref<96x512xf32, #tpu.memory_space<vmem>>, vector<20x256xf32>
    %168 = arith.negf %167 : vector<20x256xf32>
    %169 = math.exp %168 : vector<20x256xf32>
    %cst_112 = arith.constant 1.000000e+00 : f32
    %170 = vector.broadcast %cst_112 : f32 to vector<20x256xf32>
    %171 = arith.addf %170, %169 : vector<20x256xf32>
    %172 = arith.divf %170, %171 : vector<20x256xf32>
    %c48_113 = arith.constant 48 : index
    %c256_114 = arith.constant 256 : index
    %173 = vector.load %arg12[%c48_113, %c256_114] : memref<96x512xf32, #tpu.memory_space<vmem>>, vector<20x256xf32>
    %174 = arith.negf %173 : vector<20x256xf32>
    %175 = math.exp %174 : vector<20x256xf32>
    %cst_115 = arith.constant 1.000000e+00 : f32
    %176 = vector.broadcast %cst_115 : f32 to vector<20x256xf32>
    %177 = arith.addf %176, %175 : vector<20x256xf32>
    %178 = arith.divf %176, %177 : vector<20x256xf32>
    %c72_116 = arith.constant 72 : index
    %c256_117 = arith.constant 256 : index
    %179 = vector.load %arg12[%c72_116, %c256_117] : memref<96x512xf32, #tpu.memory_space<vmem>>, vector<20x256xf32>
    %180 = math.tanh %179 : vector<20x256xf32>
    %c1_118 = arith.constant 1 : index
    %c0_119 = arith.constant 0 : index
    %c0_120 = arith.constant 0 : index
    %181 = vector.load %arg4[%c1_118, %c0_119, %c0_120] : memref<2x20x256xf32, #tpu.memory_space<vmem>>, vector<1x20x256xf32>
    %182 = vector.shape_cast %181 : vector<1x20x256xf32> to vector<20x256xf32>
    %183 = arith.mulf %172, %182 : vector<20x256xf32>
    %184 = arith.mulf %166, %180 : vector<20x256xf32>
    %185 = arith.addf %183, %184 : vector<20x256xf32>
    %186 = math.tanh %185 : vector<20x256xf32>
    %187 = arith.mulf %178, %186 : vector<20x256xf32>
    %c0_121 = arith.constant 0 : index
    %c0_122 = arith.constant 0 : index
    %188 = vector.load %arg7[%c0_121, %c0_122] : memref<4x20xf32, #tpu.memory_space<vmem>>, vector<4x20xf32>
    %cst_123 = arith.constant dense<0.000000e+00> : vector<4x256xf32>
    %189 = tpu.matmul %188, %187, %cst_123 {dimension_numbers = #tpu.dot_dimension_numbers<[1], [0], [0], [1], [0, 0, 1, 1], [], []>} : vector<4x20xf32>, vector<20x256xf32>, vector<4x256xf32> -> vector<4x256xf32>
    %c1_124 = arith.constant 1 : index
    %c0_125 = arith.constant 0 : index
    %c0_126 = arith.constant 0 : index
    %190 = vector.load %arg8[%c1_124, %c0_125, %c0_126] : memref<2x4x256xf32, #tpu.memory_space<vmem>>, vector<1x4x256xf32>
    %191 = vector.shape_cast %190 : vector<1x4x256xf32> to vector<4x256xf32>
    %192 = vector.shape_cast %189 : vector<4x256xf32> to vector<1x4x256xf32>
    tpu.vector_store %arg8[%c1_124, %c0_125, %c0_126], %192 {strides = array<i32>} : memref<2x4x256xf32, #tpu.memory_space<vmem>>, vector<1x4x256xf32>,
    %c1_127 = arith.constant 1 : index
    %c0_128 = arith.constant 0 : index
    %c0_129 = arith.constant 0 : index
    %193 = vector.load %arg9[%c1_127, %c0_128, %c0_129] : memref<2x20x256xf32, #tpu.memory_space<vmem>>, vector<1x20x256xf32>
    %194 = vector.shape_cast %193 : vector<1x20x256xf32> to vector<20x256xf32>
    %195 = vector.shape_cast %187 : vector<20x256xf32> to vector<1x20x256xf32>
    tpu.vector_store %arg9[%c1_127, %c0_128, %c0_129], %195 {strides = array<i32>} : memref<2x20x256xf32, #tpu.memory_space<vmem>>, vector<1x20x256xf32>,
    %c1_130 = arith.constant 1 : index
    %c0_131 = arith.constant 0 : index
    %c0_132 = arith.constant 0 : index
    %196 = vector.load %arg10[%c1_130, %c0_131, %c0_132] : memref<2x20x256xf32, #tpu.memory_space<vmem>>, vector<1x20x256xf32>
    %197 = vector.shape_cast %196 : vector<1x20x256xf32> to vector<20x256xf32>
    %198 = vector.shape_cast %185 : vector<20x256xf32> to vector<1x20x256xf32>
    tpu.vector_store %arg10[%c1_130, %c0_131, %c0_132], %198 {strides = array<i32>} : memref<2x20x256xf32, #tpu.memory_space<vmem>>, vector<1x20x256xf32>,
    return
  }
  func.func @transform_0(%arg0: i32) -> (i32, i32) {
    %c0_i32 = arith.constant 0 : i32
    %c0_i32_0 = arith.constant 0 : i32
    %c0_i32_1 = arith.constant 0 : i32
    return %c0_i32, %c0_i32_0 : i32, i32
  }
  func.func @transform_1(%arg0: i32) -> (i32, i32, i32) {
    %c0_i32 = arith.constant 0 : i32
    %c0_i32_0 = arith.constant 0 : i32
    %c0_i32_1 = arith.constant 0 : i32
    return %arg0, %c0_i32, %c0_i32_0 : i32, i32, i32
  }
  func.func @transform_2(%arg0: i32) -> (i32, i32, i32) {
    %c0_i32 = arith.constant 0 : i32
    %c0_i32_0 = arith.constant 0 : i32
    %c0_i32_1 = arith.constant 0 : i32
    return %arg0, %c0_i32, %c0_i32_0 : i32, i32, i32
  }
  func.func @transform_3(%arg0: i32) -> (i32, i32, i32) {
    %c0_i32 = arith.constant 0 : i32
    %c0_i32_0 = arith.constant 0 : i32
    %c0_i32_1 = arith.constant 0 : i32
    return %arg0, %c0_i32, %c0_i32_0 : i32, i32, i32
  }
  func.func @transform_4(%arg0: i32) -> (i32, i32) {
    %c0_i32 = arith.constant 0 : i32
    %c0_i32_0 = arith.constant 0 : i32
    %c0_i32_1 = arith.constant 0 : i32
    return %c0_i32, %c0_i32_0 : i32, i32
  }
  func.func @transform_5(%arg0: i32) -> (i32, i32) {
    %c0_i32 = arith.constant 0 : i32
    %c0_i32_0 = arith.constant 0 : i32
    %c0_i32_1 = arith.constant 0 : i32
    return %c0_i32, %c0_i32_0 : i32, i32
  }
  func.func @transform_6(%arg0: i32) -> (i32, i32) {
    %c0_i32 = arith.constant 0 : i32
    %c0_i32_0 = arith.constant 0 : i32
    %c0_i32_1 = arith.constant 0 : i32
    return %c0_i32, %c0_i32_0 : i32, i32
  }
  func.func @transform_7(%arg0: i32) -> (i32, i32, i32) {
    %c0_i32 = arith.constant 0 : i32
    %c0_i32_0 = arith.constant 0 : i32
    %c0_i32_1 = arith.constant 0 : i32
    return %arg0, %c0_i32, %c0_i32_0 : i32, i32, i32
  }
  func.func @transform_8(%arg0: i32) -> (i32, i32, i32) {
    %c0_i32 = arith.constant 0 : i32
    %c0_i32_0 = arith.constant 0 : i32
    %c0_i32_1 = arith.constant 0 : i32
    return %arg0, %c0_i32, %c0_i32_0 : i32, i32, i32
  }
  func.func @transform_9(%arg0: i32) -> (i32, i32, i32) {
    %c0_i32 = arith.constant 0 : i32
    %c0_i32_0 = arith.constant 0 : i32
    %c0_i32_1 = arith.constant 0 : i32
    return %arg0, %c0_i32, %c0_i32_0 : i32, i32, i32
  }
}

</mosaic_0001>

<bundles_post_ra>
// kernel: tpu_custom_call.1
= control target key start
LH: loop header
LB: loop body
LE: loop exit
PB: predicated region body
PF: predicated region fallthrough
CT: control target
= control target key end

     0   :  { %vm68_vm0 = vcmask 1043456   ;;  %v3695_v3 = vmov 0.0   ;;  %s3696_s15 = smov 1   ;;  %s5991_s0 = inlined_call_operand.<no memory space> [shape: f32[1,1], index: 0, kind: input, shape index: {}]   ;;  %s5992_s1 = inlined_call_operand.vmem [shape: f32[2,4,256], index: 1, kind: input, shape index: {}]   ;;  %s5993_s2 = inlined_call_operand.vmem [shape: f32[2,20,256], index: 2, kind: input, shape index: {}]   ;;  %s5994_s3 = inlined_call_operand.vmem [shape: f32[2,20,256], index: 3, kind: input, shape index: {}]   ;;  %s5995_s4 = inlined_call_operand.vmem [shape: f32[9,256], index: 4, kind: input, shape index: {}]   ;;  %s5996_s5 = inlined_call_operand.vmem [shape: bf16[96,289], index: 5, kind: input, shape index: {}]   ;;  %s5997_s6 = inlined_call_operand.vmem [shape: f32[4,20], index: 6, kind: input, shape index: {}]   ;;  %s5998_s7 = inlined_call_operand.hbm [shape: f32[2,4,256], index: 7, kind: output, shape index: {0}]   ;;  %s5999_s8 = inlined_call_operand.vmem [shape: f32[2,20,256], index: 8, kind: output, shape index: {1}]   ;;  %s6000_s9 = inlined_call_operand.vmem [shape: f32[2,20,256], index: 9, kind: output, shape index: {2}]  }
   0x1   :  { %v52_v0 = vld [vmem:[%s5993_s2 + $0x10] sm:$0xff]  ;;  %v54_v1 = vld [vmem:[%s5993_s2 + $0x20] sm:$0xf]  ;;  %v48_v2 = vstv %s5991_s0  ;;  %226 = vrot.lane.b32.xlu1 %v3695_v3, %s3696_s15 }
   0x2   :  { %v71_v4 = vrot.slane %v52_v0, 4  ;;  %v75_v5 = vrot.slane %v54_v1, 4  ;;  %v47_v6 = vld [vmem:[%s5992_s1] sm:$0xff]  ;;  %v53_v7 = vld [vmem:[%s5993_s2 + $0x18] sm:$0xff]  ;;  %v55_v8 = vld [vmem:[%s5993_s2 + $0x28] sm:$0xf] }
   0x3   :  { %v49_v9 = vmul.f32 %v48_v2, %v47_v6  ;;  %v50_v10 = vld [vmem:[%s5993_s2] sm:$0xff] }
   0x4   :  { %v3783_v11 = vsel %vm68_vm0, %v71_v4, %v75_v5  ;;  %v69_v12 = vrot.slane %v50_v10, 4 }
   0x5   :  { %224 = vrot.lane.b32.xlu0 %v3783_v11, %s3696_s15  ;;  %57 = vst [vmem:[#allocation1] ss:$2 sm:$0xff] %v49_v9 }
   0x6   :  { %16 = vsyncpa [#allocation6], 0  ;;  %v73_v13 = vrot.slane %v53_v7, 4  ;;  %v77_v14 = vrot.slane %v55_v8, 4  ;;  %v3788_v15 = vsel %vm68_vm0, %v69_v12, %v71_v4  ;;  %v2913_v16 = vld [vmem:[%s5992_s1 + $0x8] sm:$0xff]  ;;  %s3697_s1 = smov 112   ;;  %v101_v36 = vlaneseq }
   0x7   :  { %222 = vrot.lane.b32.xlu2 %v3788_v15, %s3696_s15  ;;  %v51_v17 = vld [vmem:[%s5993_s2 + $0x8] sm:$0xff]  ;;  %v450_v18 = vmul.f32 %v2913_v16, %v48_v2  ;;  %s3698_s27 = smov 15   ;;  %s3699_s28 = smov 113   ;;  %vm34_vm6 = vcmask 1040384   ;;  %vm35_vm7 = vsmask.f32 256 }
   0x8   :  { %v3799_v19 = vsel %vm68_vm0, %v73_v13, %v77_v14  ;;  %v70_v20 = vrot.slane %v51_v17, 4  ;;  %s3700_s29 = smov 16   ;;  %s3701_s30 = smov 127   ;;  %v2908_v28 = vld [vmem:[%s5995_s4 + $0x3] ss:$8 sm:$0x3]  ;;  %vm4161_vm9 = vmand %vm34_vm6, %vm35_vm7 }
   0x9   :  { %s3702_s10 = smov 111   ;;  %v2922_v29 = vld [vmem:[%s5995_s4 + $0x3] ss:$8 sm:$0x3]  ;;  %s3703_s16 = smov 17   ;;  %v244_v30 = vperm.slane %v2908_v28, 0 }
   0xa   :  { %v3814_v25 = vsel %vm68_vm0, %v70_v20, %v73_v13  ;;  %v245_v31 = vperm.slane %v2908_v28, 1  ;;  %v3896_v32 = vperm.slane %v2922_v29, 0  ;;  %v3898_v33 = vperm.slane %v2922_v29, 1  ;;  %v2911_v58 = vld [vmem:[%s5995_s4 + $0x7] ss:$8 sm:$0x3] }
   0xb   :  { %v3908_v44 = vand.u32 127, %v101_v36  ;;  %v3937_v60 = vperm.slane %v2911_v58, 0  ;;  %v3939_v61 = vperm.slane %v2911_v58, 1  ;;  %v2925_v63 = vld [vmem:[%s5995_s4 + $0x7] ss:$8 sm:$0x3] }
   0xc   :  { %v58_v21 = vld.sshfl [vmem:[#allocation1] sm:$0xff pattern:$0x75316420]  ;;  %v59_v22 = vld.sshfl [vmem:[#allocation1 + $0x8] sm:$0xff pattern:$0x75316420] }
   0xd   :  { %232 = vrot.lane.b32.xlu0 %v3799_v19, %s3696_s15  ;;  %v3804_v23 = vsel %vm68_vm0, %v58_v21, %v69_v12  ;;  %v3807_v24 = vsel %vm68_vm0, %v59_v22, %v70_v20  ;;  %459 = vst [vmem:[#allocation1] ss:$2 sm:$0xff] %v450_v18  ;;  %vm234_vm1 = vcmp.lt.s32.totalorder %v3908_v44, 1  ;;  %vm374_vm2 = vcmp.lt.s32.totalorder %v3908_v44, 112  ;;  %s2886_s18 = sshll.u32 %s5998_s7, 4  ;;  %s2887_s18 = int_to_ptr.hbm [resolvable:$true] %s2886_s18 }
   0xe   :  { %220 = vrot.lane.b32.xlu1 %v3804_v23, %s3696_s15  ;;  %v3960_v12 = vperm.slane %v2925_v63, 0  ;;  %v3962_v16 = vperm.slane %v2925_v63, 1  ;;  %v2907_v17 = vld [vmem:[%s5995_s4 + $0x2] ss:$8 sm:$0x3]  ;;  %vm190_vm3 = vcmp.lt.s32.totalorder %v3908_v44, 15 }
   0xf   :  { %228 = vrot.lane.b32.xlu2 %v3807_v24, %s3696_s15  ;;  %v3972_v28 = vperm.slane %v2907_v17, 0  ;;  %v3974_v29 = vperm.slane %v2907_v17, 1  ;;  %vm330_vm4 = vcmp.lt.s32.totalorder %v3908_v44, 113  ;;  %vm146_vm5 = vcmp.lt.s32.totalorder %v3908_v44, 16 }
  0x10   :  { %vm37_vm8 = vcmask 1044484   ;;  %vm38_vm10 = vsmask.f32 4352  ;;  %vm286_vm13 = vcmp.lt.s32.totalorder %v3908_v44, 127  ;;  %vm418_vm14 = vcmp.lt.s32.totalorder %v3908_v44, 111 }
  0x11   :  { %vm4167_vm11 = vmand %vm37_vm8, %vm38_vm10  ;;  %vm103_vm15 = vcmp.lt.s32.totalorder %v3908_v44, 17 }
  0x12   :  { %vm40_vm12 = vmor %vm4167_vm11, %vm4161_vm9 }
  0x15   :  { %230 = vrot.lane.b32.xlu0 %v3814_v25, %s3696_s15 }
  0x16   :  { %364 = vrot.lane.b32.xlu1 %v3783_v11, %s3697_s1 }
  0x17   :  { %372 = vrot.lane.b32.xlu2 %v3799_v19, %s3697_s1 }
  0x1d   :  { %366 = vrot.lane.b32.xlu0 %v3695_v3, %s3697_s1 }
  0x1e   :  { %180 = vrot.lane.b32.xlu1 %v3783_v11, %s3698_s27 }
  0x1f   :  { %188 = vrot.lane.b32.xlu2 %v3799_v19, %s3698_s27 }
  0x25   :  { %360 = vrot.lane.b32.xlu0 %v3804_v23, %s3697_s1 }
  0x26   :  { %362 = vrot.lane.b32.xlu1 %v3788_v15, %s3697_s1 }
  0x27   :  { %368 = vrot.lane.b32.xlu2 %v3807_v24, %s3697_s1 }
  0x2d   :  { %370 = vrot.lane.b32.xlu0 %v3814_v25, %s3697_s1 }
  0x2e   :  { %182 = vrot.lane.b32.xlu1 %v3695_v3, %s3698_s27 }
  0x2f   :  { %176 = vrot.lane.b32.xlu2 %v3804_v23, %s3698_s27 }
  0x35   :  { %178 = vrot.lane.b32.xlu0 %v3788_v15, %s3698_s27 }
  0x36   :  { %184 = vrot.lane.b32.xlu1 %v3807_v24, %s3698_s27 }
  0x37   :  { %186 = vrot.lane.b32.xlu2 %v3814_v25, %s3698_s27 }
  0x3d   :  { %320 = vrot.lane.b32.xlu0 %v3783_v11, %s3699_s28 }
  0x3e   :  { %328 = vrot.lane.b32.xlu1 %v3799_v19, %s3699_s28 }
  0x3f   :  { %322 = vrot.lane.b32.xlu2 %v3695_v3, %s3699_s28 }
  0x45   :  { %136 = vrot.lane.b32.xlu0 %v3783_v11, %s3700_s29 }
  0x46   :  { %144 = vrot.lane.b32.xlu1 %v3799_v19, %s3700_s29 }
  0x47   :  { %316 = vrot.lane.b32.xlu2 %v3804_v23, %s3699_s28 }
  0x4d   :  { %318 = vrot.lane.b32.xlu0 %v3788_v15, %s3699_s28 }
  0x4e   :  { %324 = vrot.lane.b32.xlu1 %v3807_v24, %s3699_s28 }
  0x4f   :  { %326 = vrot.lane.b32.xlu2 %v3814_v25, %s3699_s28 }
  0x55   :  { %138 = vrot.lane.b32.xlu0 %v3695_v3, %s3700_s29 }
  0x56   :  { %132 = vrot.lane.b32.xlu1 %v3804_v23, %s3700_s29 }
  0x57   :  { %134 = vrot.lane.b32.xlu2 %v3788_v15, %s3700_s29 }
  0x5d   :  { %140 = vrot.lane.b32.xlu0 %v3807_v24, %s3700_s29 }
  0x5e   :  { %142 = vrot.lane.b32.xlu1 %v3814_v25, %s3700_s29 }
  0x5f   :  { %276 = vrot.lane.b32.xlu2 %v3783_v11, %s3701_s30 }
  0x61   :  { %v3876_v26 = vpop.permute.xlu2 %222 }
  0x65   :  { %284 = vrot.lane.b32.xlu0 %v3799_v19, %s3701_s30 }
  0x66   :  { %408 = vrot.lane.b32.xlu1 %v3783_v11, %s3702_s10 }
  0x67   :  { %416 = vrot.lane.b32.xlu2 %v3799_v19, %s3702_s10 }
  0x69   :  { %v229_v27 = vpop.permute.xlu2 %228 }
  0x6d   :  { %278 = vrot.lane.b32.xlu0 %v3695_v3, %s3701_s30 }
  0x6e   :  { %410 = vrot.lane.b32.xlu1 %v3695_v3, %s3702_s10 }
  0x6f   :  { %91 = vrot.lane.b32.xlu2 %v3783_v11, %s3703_s16 }
  0x71   :  { %v373_v34 = vpop.permute.xlu2 %372 }
  0x73   :  { %v227_v35 = vpop.permute.xlu1 %226 }
  0x74   :  { %v254_v37 = vmul.f32 %v244_v30, %v227_v35  ;;  %v255_v38 = vmul.f32 %v245_v31, %v227_v35  ;;  %v638_v39 = vmul.f32 %v3896_v32, %v227_v35  ;;  %v639_v40 = vmul.f32 %v3898_v33, %v227_v35 }
  0x75   :  { %99 = vrot.lane.b32.xlu0 %v3799_v19, %s3703_s16 }
  0x76   :  { %272 = vrot.lane.b32.xlu1 %v3804_v23, %s3701_s30  ;;  %v259_v41 = vpack.c.bf16 %v255_v38, %v254_v37  ;;  %v643_v42 = vpack.c.bf16 %v639_v40, %v638_v39 }
  0x77   :  { %v225_v43 = vpop.permute.xlu0 %224  ;;  %274 = vrot.lane.b32.xlu2 %v3788_v15, %s3701_s30 }
  0x78   :  { %263 = vst [vmem:[#allocation2 + $0xf0] sm:$0xff] %v259_v41  ;;  %v3999_v41 = vld [vmem:[%s5993_s2 + $0x48] sm:$0xff] }
  0x79   :  { %v3910_v45 = vpop.permute.xlu2 %188  ;;  %647 = vst [vmem:[#allocation2 + $0xf8] sm:$0xff] %v643_v42  ;;  %v474_v63 = vrot.slane %v3999_v41, 4 }
  0x7d   :  { %280 = vrot.lane.b32.xlu0 %v3807_v24, %s3701_s30 }
  0x7e   :  { %282 = vrot.lane.b32.xlu1 %v3814_v25, %s3701_s30 }
  0x7f   :  { %v233_v46 = vpop.permute.xlu0 %232  ;;  %404 = vrot.lane.b32.xlu2 %v3804_v23, %s3702_s10  ;;  %v3421_v14 = vld [vmem:[#allocation2 + $0xec] sm:$0xf0]  ;;  %v3115_v22 = vld [vmem:[#allocation2 + $0xf0] sm:$0xf0] }
  0x80   :  { %v237_v47 = vsel %vm234_vm1, %v225_v43, %v233_v46  ;;  %v240_v48 = vsel %vm234_vm1, %v233_v46, %v225_v43  ;;  %v221_v49 = vpop.permute.xlu1 %220 }
  0x81   :  { %v252_v50 = vmul.f32 %v244_v30, %v240_v48  ;;  %v253_v51 = vmul.f32 %v245_v31, %v237_v47  ;;  %v235_v52 = vsel %vm234_vm1, %v221_v49, %v229_v27  ;;  %v238_v53 = vsel %vm234_vm1, %v229_v27, %v221_v49  ;;  %v3927_v54 = vpop.permute.xlu2 %368 }
  0x82   :  { %v248_v55 = vmul.f32 %v244_v30, %v238_v53  ;;  %v249_v56 = vmul.f32 %v245_v31, %v235_v52  ;;  %v2910_v53 = vld [vmem:[%s5995_s4 + $0x6] ss:$8 sm:$0x3] }
  0x83   :  { %v258_v57 = vpack.c.bf16 %v253_v51, %v252_v50 }
  0x84   :  { %v256_v59 = vpack.c.bf16 %v249_v56, %v248_v55  ;;  %v2924_v55 = vld [vmem:[%s5995_s4 + $0x6] ss:$8 sm:$0x3] }
  0x85   :  { %262 = vst [vmem:[#allocation2 + $0xe0] sm:$0xff] %v258_v57  ;;  %406 = vrot.lane.b32.xlu0 %v3788_v15, %s3702_s10 }
  0x86   :  { %260 = vst [vmem:[#allocation2 + $0xc0] sm:$0xff] %v256_v59  ;;  %412 = vrot.lane.b32.xlu1 %v3807_v24, %s3702_s10 }
  0x87   :  { %v231_v62 = vpop.permute.xlu0 %230  ;;  %414 = vrot.lane.b32.xlu2 %v3814_v25, %s3702_s10 }
  0x88   :  { %v236_v0 = vsel %vm234_vm1, %v3876_v26, %v231_v62  ;;  %v239_v1 = vsel %vm234_vm1, %v231_v62, %v3876_v26  ;;  %v365_v2 = vpop.permute.xlu1 %364 }
  0x89   :  { %v250_v4 = vmul.f32 %v244_v30, %v239_v1  ;;  %v251_v5 = vmul.f32 %v245_v31, %v236_v0  ;;  %v377_v6 = vsel %vm374_vm2, %v365_v2, %v373_v34  ;;  %v380_v7 = vsel %vm374_vm2, %v373_v34, %v365_v2  ;;  %v3956_v8 = vpop.permute.xlu2 %176  ;;  %v3979_v30 = vld [vmem:[%s5993_s2 + $0x40] sm:$0xff] }
  0x8a   :  { %v392_v9 = vmul.f32 %v3937_v60, %v377_v6  ;;  %v393_v10 = vmul.f32 %v3939_v61, %v380_v7  ;;  %v472_v42 = vrot.slane %v3979_v30, 4  ;;  %v4020_v1 = vperm.slane %v2910_v53, 0 }
  0x8b   :  { %v257_v13 = vpack.c.bf16 %v251_v5, %v250_v4  ;;  %v4022_v2 = vperm.slane %v2910_v53, 1  ;;  %v4024_v4 = vperm.slane %v2924_v55, 0  ;;  %v4026_v5 = vperm.slane %v2924_v55, 1 }
  0x8c   :  { %v398_v18 = vpack.c.bf16 %v393_v10, %v392_v9  ;;  %v3113_v20 = vld [vmem:[#allocation2 + $0xe0] sm:$0xf]  ;;  %v3419_v21 = vld [vmem:[#allocation2 + $0xe4] sm:$0xf] }
  0x8d   :  { %261 = vst [vmem:[#allocation2 + $0xd0] sm:$0xff] %v257_v13  ;;  %93 = vrot.lane.b32.xlu0 %v3695_v3, %s3703_s16  ;;  %v3114_v26 = vor.u32 %v3421_v14, %v3113_v20  ;;  %v3118_v27 = vor.u32 %v3419_v21, %v3115_v22  ;;  %v2918_v3 = vld [vmem:[%s5993_s2 + $0x50] sm:$0xf]  ;;  %v3097_v51 = vld [vmem:[#allocation2 + $0xc0] sm:$0xf] }
  0x8e   :  { %402 = vst [vmem:[#allocation2 + $0x1e0] sm:$0xff] %v398_v18  ;;  %87 = vrot.lane.b32.xlu1 %v3804_v23, %s3703_s16  ;;  %v476_v43 = vrot.slane %v2918_v3, 4  ;;  %v3415_v52 = vld [vmem:[#allocation2 + $0xc4] sm:$0xf] }
  0x8f   :  { %1407 = vmatpush.bf16.msra.mxu0 %v3114_v26  ;;  %1524 = vmatpush.bf16.msra.mxu3 %v3118_v27  ;;  %v367_v31 = vpop.permute.xlu0 %366  ;;  %v2921_v21 = vld [vmem:[%s5995_s4 + $0x2] ss:$8 sm:$0x3] }
  0x90   :  { %v394_v34 = vmul.f32 %v3937_v60, %v367_v31  ;;  %v395_v35 = vmul.f32 %v3939_v61, %v367_v31  ;;  %v765_v36 = vmul.f32 %v3960_v12, %v367_v31  ;;  %v766_v37 = vmul.f32 %v3962_v16, %v367_v31  ;;  %v181_v38 = vpop.permute.xlu1 %180  ;;  %89 = vrot.lane.b32.xlu2 %v3788_v15, %s3703_s16 }
  0x91   :  { %v193_v39 = vsel %vm190_vm3, %v181_v38, %v3910_v45  ;;  %v196_v40 = vsel %vm190_vm3, %v3910_v45, %v181_v38  ;;  %v4002_v46 = vpop.permute.xlu2 %186  ;;  %v2919_v45 = vld [vmem:[%s5993_s2 + $0x58] sm:$0xf]  ;;  %v4031_v7 = vsel %vm68_vm0, %v472_v42, %v476_v43 }
  0x92   :  { %v399_v47 = vpack.c.bf16 %v395_v35, %v394_v34  ;;  %v770_v48 = vpack.c.bf16 %v766_v37, %v765_v36  ;;  %v208_v49 = vmul.f32 %v3972_v28, %v196_v40  ;;  %v209_v50 = vmul.f32 %v3974_v29, %v193_v39  ;;  %v2914_v35 = vld [vmem:[%s5993_s2 + $0x30] sm:$0xff] }
  0x93   :  { %v478_v0 = vrot.slane %v2919_v45, 4  ;;  %v4062_v39 = vperm.slane %v2921_v21, 0  ;;  %v4064_v40 = vperm.slane %v2921_v21, 1  ;;  %v470_v43 = vrot.slane %v2914_v35, 4 }
  0x94   :  { %403 = vst [vmem:[#allocation2 + $0x1f0] sm:$0xff] %v399_v47  ;;  %v214_v56 = vpack.c.bf16 %v209_v50, %v208_v49  ;;  %v3417_v57 = vld [vmem:[#allocation2 + $0xcc] sm:$0xf0]  ;;  %v3099_v58 = vld [vmem:[#allocation2 + $0xd0] sm:$0xf0] }
  0x95   :  { %774 = vst [vmem:[#allocation2 + $0x1f8] sm:$0xff] %v770_v48  ;;  %95 = vrot.lane.b32.xlu0 %v3807_v24, %s3703_s16  ;;  %v3098_v59 = vor.u32 %v3417_v57, %v3097_v51  ;;  %v3102_v62 = vor.u32 %v3415_v52, %v3099_v58  ;;  %v4046_v18 = vsel %vm68_vm0, %v474_v63, %v478_v0  ;;  %v3241_v31 = vld [vmem:[#allocation2 + $0x1e0] sm:$0xf]  ;;  %v460_v48 = vld.sshfl [vmem:[#allocation1] sm:$0xff pattern:$0x75316420] }
  0x96   :  { %218 = vst [vmem:[#allocation2 + $0xa0] sm:$0xff] %v214_v56  ;;  %97 = vrot.lane.b32.xlu1 %v3814_v25, %s3703_s16 }
  0x97   :  { %v361_v6 = vpop.permute.xlu0 %360  ;;  %1408 = vmatpush.bf16.msra.mxu0 %v3098_v59  ;;  %1525 = vmatpush.bf16.msra.mxu3 %v3102_v62  ;;  %v4081_v59 = vsel %vm68_vm0, %v460_v48, %v470_v43  ;;  %v2915_v62 = vld [vmem:[%s5993_s2 + $0x38] sm:$0xff] }
  0x98   :  { %v375_v9 = vsel %vm374_vm2, %v361_v6, %v3927_v54  ;;  %v378_v10 = vsel %vm374_vm2, %v3927_v54, %v361_v6  ;;  %v363_v13 = vpop.permute.xlu1 %362  ;;  %739 = vrot.lane.b32.xlu2 %v4031_v7, %s3697_s1 }
  0x99   :  { %v388_v14 = vmul.f32 %v3937_v60, %v375_v9  ;;  %v389_v17 = vmul.f32 %v3939_v61, %v378_v10  ;;  %v323_v20 = vpop.permute.xlu2 %322  ;;  %v461_v9 = vld.sshfl [vmem:[#allocation1 + $0x8] sm:$0xff pattern:$0x75316420]  ;;  %v471_v10 = vrot.slane %v2915_v62, 4 }
  0x9a   :  { %v350_v54 = vmul.f32 %v4020_v1, %v323_v20  ;;  %v351_v22 = vmul.f32 %v4022_v2, %v323_v20  ;;  %v725_v26 = vmul.f32 %v4024_v4, %v323_v20  ;;  %v726_v27 = vmul.f32 %v4026_v5, %v323_v20 }
  0x9b   :  { %v396_v3 = vpack.c.bf16 %v389_v17, %v388_v14  ;;  %v3453_v34 = vld [vmem:[#allocation2 + $0x1ec] sm:$0xf0]  ;;  %v4096_v14 = vsel %vm68_vm0, %v461_v9, %v471_v10 }
  0x9c   :  { %v3242_v36 = vor.u32 %v3453_v34, %v3241_v31  ;;  %v355_v37 = vpack.c.bf16 %v351_v22, %v350_v54  ;;  %v730_v38 = vpack.c.bf16 %v726_v27, %v725_v26 }
  0x9d   :  { %400 = vst [vmem:[#allocation2 + $0x1c0] sm:$0xff] %v396_v3  ;;  %745 = vrot.lane.b32.xlu0 %v4046_v18, %s3697_s1  ;;  %v4121_v3 = vsel %vm68_vm0, %v471_v10, %v474_v63  ;;  %v3081_v34 = vld [vmem:[#allocation2 + $0xa0] sm:$0xf] }
  0x9e   :  { %612 = vrot.lane.b32.xlu1 %v4031_v7, %s3696_s15  ;;  %1446 = vmatpush.bf16.msra.mxu1 %v3242_v36  ;;  %359 = vst [vmem:[#allocation2 + $0x1b0] sm:$0xff] %v355_v37  ;;  %v3411_v36 = vld [vmem:[#allocation2 + $0xa4] sm:$0xf] }
  0x9f   :  { %v371_v47 = vpop.permute.xlu0 %370  ;;  %734 = vst [vmem:[#allocation2 + $0x1b8] sm:$0xff] %v730_v38 }
  0xa0   :  { %v376_v49 = vsel %vm374_vm2, %v363_v13, %v371_v47  ;;  %v379_v50 = vsel %vm374_vm2, %v371_v47, %v363_v13  ;;  %v183_v51 = vpop.permute.xlu1 %182  ;;  %618 = vrot.lane.b32.xlu2 %v4046_v18, %s3696_s15 }
  0xa1   :  { %v390_v52 = vmul.f32 %v3937_v60, %v376_v49  ;;  %v391_v45 = vmul.f32 %v3939_v61, %v379_v50  ;;  %v210_v53 = vmul.f32 %v3972_v28, %v183_v51  ;;  %v211_v55 = vmul.f32 %v3974_v29, %v183_v51  ;;  %v4076_v56 = vpop.permute.xlu2 %316 }
  0xa2   :  { %v598_v57 = vmul.f32 %v4062_v39, %v183_v51  ;;  %v599_v58 = vmul.f32 %v4064_v40, %v183_v51  ;;  %v4089_v61 = vsel %vm68_vm0, %v470_v43, %v472_v42 }
  0xa3   :  { %v397_v60 = vpack.c.bf16 %v391_v45, %v390_v52  ;;  %v215_v0 = vpack.c.bf16 %v211_v55, %v210_v53  ;;  %v2906_v45 = vld [vmem:[%s5995_s4 + $0x1] ss:$8 sm:$0x3] }
  0xa4   :  { %v603_v6 = vpack.c.bf16 %v599_v58, %v598_v57  ;;  %v3225_v37 = vld [vmem:[#allocation2 + $0x1c0] sm:$0xf]  ;;  %v4148_v9 = vperm.slane %v2906_v45, 1 }
  0xa5   :  { %401 = vst [vmem:[#allocation2 + $0x1d0] sm:$0xff] %v397_v60  ;;  %735 = vrot.lane.b32.xlu0 %v4081_v59, %s3697_s1 }
  0xa6   :  { %219 = vst [vmem:[#allocation2 + $0xb0] sm:$0xff] %v215_v0  ;;  %737 = vrot.lane.b32.xlu1 %v4089_v61, %s3697_s1 }
  0xa7   :  { %607 = vst [vmem:[#allocation2 + $0xb8] sm:$0xff] %v603_v6  ;;  %v179_v13 = vpop.permute.xlu0 %178  ;;  %v4146_v6 = vperm.slane %v2906_v45, 0 }
  0xa8   :  { %v192_v30 = vsel %vm190_vm3, %v179_v13, %v4002_v46  ;;  %v195_v42 = vsel %vm190_vm3, %v4002_v46, %v179_v13  ;;  %v185_v17 = vpop.permute.xlu1 %184  ;;  %741 = vrot.lane.b32.xlu2 %v4096_v14, %s3697_s1 }
  0xa9   :  { %v206_v20 = vmul.f32 %v3972_v28, %v195_v42  ;;  %v207_v21 = vmul.f32 %v3974_v29, %v192_v30  ;;  %v191_v54 = vsel %vm190_vm3, %v3956_v8, %v185_v17  ;;  %v194_v22 = vsel %vm190_vm3, %v185_v17, %v3956_v8  ;;  %v4114_v26 = vpop.permute.xlu2 %326 }
  0xaa   :  { %v204_v46 = vmul.f32 %v3972_v28, %v194_v22  ;;  %v205_v27 = vmul.f32 %v3974_v29, %v191_v54  ;;  %v3445_v54 = vld [vmem:[#allocation2 + $0x1ac] sm:$0xf0] }
  0xab   :  { %v213_v31 = vpack.c.bf16 %v207_v21, %v206_v20 }
  0xac   :  { %v212_v35 = vpack.c.bf16 %v205_v27, %v204_v46  ;;  %v3449_v38 = vld [vmem:[#allocation2 + $0x1cc] sm:$0xf0] }
  0xad   :  { %217 = vst [vmem:[#allocation2 + $0x90] sm:$0xff] %v213_v31  ;;  %743 = vrot.lane.b32.xlu0 %v4121_v3, %s3697_s1  ;;  %v3413_v8 = vld [vmem:[#allocation2 + $0xac] sm:$0xf0]  ;;  %v3083_v43 = vld [vmem:[#allocation2 + $0xb0] sm:$0xf0]  ;;  %v3226_v28 = vor.u32 %v3449_v38, %v3225_v37 }
  0xae   :  { %216 = vst [vmem:[#allocation2 + $0x80] sm:$0xff] %v212_v35  ;;  %608 = vrot.lane.b32.xlu1 %v4081_v59, %s3696_s15  ;;  %v3082_v29 = vor.u32 %v3413_v8, %v3081_v34  ;;  %v3086_v41 = vor.u32 %v3411_v36, %v3083_v43  ;;  %v41_v34 = vld [vmem:[#allocation2 + $0x240] sm:$0x11] }
  0xaf   :  { %v321_v63 = vpop.permute.xlu0 %320  ;;  %1447 = vmatpush.bf16.msra.mxu1 %v3226_v28  ;;  %v42_v37 = vsel %vm40_vm12, 1065369472, %v41_v34 }
  0xb0   :  { %1409 = vmatpush.bf16.msra.mxu0 %v3082_v29  ;;  %1526 = vmatpush.bf16.msra.mxu3 %v3086_v41  ;;  %v329_v47 = vpop.permute.xlu1 %328  ;;  %43 = vst [vmem:[#allocation2 + $0x240] sm:$0x11] %v42_v37 }
  0xb1   :  { %v333_v48 = vsel %vm330_vm4, %v321_v63, %v329_v47  ;;  %v336_v49 = vsel %vm330_vm4, %v329_v47, %v321_v63  ;;  %610 = vrot.lane.b32.xlu2 %v4089_v61, %s3696_s15  ;;  %v4134_v50 = vpop.permute.xlu2 %134  ;;  %v2920_v47 = vld [vmem:[%s5995_s4 + $0x1] ss:$8 sm:$0x3] }
  0xb2   :  { %v348_v51 = vmul.f32 %v4020_v1, %v333_v48  ;;  %v349_v52 = vmul.f32 %v4022_v2, %v336_v49  ;;  %v4205_v45 = vperm.slane %v2920_v47, 0 }
  0xb4   :  { %v354_v53 = vpack.c.bf16 %v349_v52, %v348_v51  ;;  %v3409_v55 = vld [vmem:[#allocation2 + $0x8c] sm:$0xf0]  ;;  %v3067_v57 = vld [vmem:[#allocation2 + $0x90] sm:$0xf0] }
  0xb5   :  { %614 = vrot.lane.b32.xlu0 %v4096_v14, %s3696_s15  ;;  %v3065_v58 = vld [vmem:[#allocation2 + $0x80] sm:$0xf]  ;;  %v3407_v62 = vld [vmem:[#allocation2 + $0x84] sm:$0xf] }
  0xb6   :  { %358 = vst [vmem:[#allocation2 + $0x1a0] sm:$0xff] %v354_v53  ;;  %616 = vrot.lane.b32.xlu1 %v4121_v3, %s3696_s15  ;;  %v3066_v60 = vor.u32 %v3409_v55, %v3065_v58  ;;  %v3070_v0 = vor.u32 %v3407_v62, %v3067_v57  ;;  %v4207_v53 = vperm.slane %v2920_v47, 1 }
  0xb7   :  { %v137_v10 = vpop.permute.xlu0 %136  ;;  %v4213_v55 = vld [vmem:[#allocation2 + $0x240] sm:$0x11] }
  0xb8   :  { %1410 = vmatpush.bf16.msra.mxu0 %v3066_v60  ;;  %1527 = vmatpush.bf16.msra.mxu3 %v3070_v0  ;;  %v145_v13 = vpop.permute.xlu1 %144  ;;  %v1221_v0 = vunpack.c.l.b16 %v4213_v55 }
  0xb9   :  { %v149_v30 = vsel %vm146_vm5, %v137_v10, %v145_v13  ;;  %v152_v42 = vsel %vm146_vm5, %v145_v13, %v137_v10  ;;  %699 = vrot.lane.b32.xlu2 %v4031_v7, %s3699_s28  ;;  %v4156_v17 = vpop.permute.xlu2 %276 }
  0xba   :  { %v164_v20 = vmul.f32 %v4146_v6, %v152_v42  ;;  %v165_v21 = vmul.f32 %v4148_v9, %v149_v30  ;;  %v3704_v30 = vmov 0  }
  0xbb   :  { %v4225_v42 = vsel %vm34_vm6, 65535, %v3704_v30  ;;  %vm1373_vm6 = vcmask 269312  }
  0xbc   :  { %v170_v22 = vpack.c.bf16 %v165_v21, %v164_v20  ;;  %v1297_v20 = vpack.c.b16 %v1221_v0, %v1221_v0 }
  0xbd   :  { %705 = vrot.lane.b32.xlu0 %v4046_v18, %s3699_s28  ;;  %v3209_v27 = vld [vmem:[#allocation2 + $0x1a0] sm:$0xf] }
  0xbe   :  { %174 = vst [vmem:[#allocation2 + $0x60] sm:$0xff] %v170_v22  ;;  %572 = vrot.lane.b32.xlu1 %v4031_v7, %s3698_s27  ;;  %v3210_v35 = vor.u32 %v3445_v54, %v3209_v27  ;;  %v44_v22 = vld [vmem:[#allocation2 + $0x248] sm:$0x11]  ;;  %v1396_v27 = vand.u32 %v4225_v42, %v1297_v20  ;;  %v2923_v20 = vld [vmem:[%s5995_s4 + $0x5] ss:$8 sm:$0x3] }
  0xbf   :  { %v319_v36 = vpop.permute.xlu0 %318 }
  0xc0   :  { %v332_v38 = vsel %vm330_vm4, %v319_v36, %v4114_v26  ;;  %v335_v8 = vsel %vm330_vm4, %v4114_v26, %v319_v36  ;;  %1448 = vmatpush.bf16.msra.mxu1 %v3210_v35  ;;  %v325_v43 = vpop.permute.xlu1 %324  ;;  %v45_v35 = vsel %vm40_vm12, 1065369472, %v44_v22  ;;  %1490 = vmatpush.bf16.msra.mxu2 %v1396_v27 }
  0xc1   :  { %v346_v28 = vmul.f32 %v4020_v1, %v332_v38  ;;  %v347_v29 = vmul.f32 %v4022_v2, %v335_v8  ;;  %v331_v41 = vsel %vm330_vm4, %v4076_v56, %v325_v43  ;;  %v334_v63 = vsel %vm330_vm4, %v325_v43, %v4076_v56  ;;  %578 = vrot.lane.b32.xlu2 %v4046_v18, %s3698_s27  ;;  %v4201_v26 = vpop.permute.xlu2 %416 }
  0xc2   :  { %v344_v48 = vmul.f32 %v4020_v1, %v331_v41  ;;  %v345_v49 = vmul.f32 %v4022_v2, %v334_v63  ;;  %46 = vst [vmem:[#allocation2 + $0x248] sm:$0x11] %v45_v35 }
  0xc3   :  { %v353_v51 = vpack.c.bf16 %v347_v29, %v346_v28  ;;  %v2909_v29 = vld [vmem:[%s5995_s4 + $0x5] ss:$8 sm:$0x3] }
  0xc4   :  { %v352_v52 = vpack.c.bf16 %v345_v49, %v344_v48  ;;  %v2912_v49 = vld [vmem:[%s5995_s4 + $0x10] ss:$8 sm:$0x3] }
  0xc5   :  { %357 = vst [vmem:[#allocation2 + $0x190] sm:$0xff] %v353_v51  ;;  %695 = vrot.lane.b32.xlu0 %v4081_v59, %s3699_s28  ;;  %v3049_v48 = vld [vmem:[#allocation2 + $0x60] sm:$0xf] }
  0xc6   :  { %356 = vst [vmem:[#allocation2 + $0x180] sm:$0xff] %v352_v52  ;;  %697 = vrot.lane.b32.xlu1 %v4089_v61, %s3699_s28  ;;  %v3403_v52 = vld [vmem:[#allocation2 + $0x64] sm:$0xf] }
  0xc7   :  { %v139_v56 = vpop.permute.xlu0 %138 }
  0xc8   :  { %v166_v1 = vmul.f32 %v4146_v6, %v139_v56  ;;  %v167_v2 = vmul.f32 %v4148_v9, %v139_v56  ;;  %v558_v57 = vmul.f32 %v4205_v45, %v139_v56  ;;  %v559_v58 = vmul.f32 %v4207_v53, %v139_v56  ;;  %v133_v62 = vpop.permute.xlu1 %132 }
  0xc9   :  { %701 = vrot.lane.b32.xlu2 %v4096_v14, %s3699_s28  ;;  %v4221_v60 = vpop.permute.xlu2 %91 }
  0xca   :  { %v171_v10 = vpack.c.bf16 %v167_v2, %v166_v1  ;;  %v563_v13 = vpack.c.bf16 %v559_v58, %v558_v57  ;;  %v4271_v58 = vperm.slane %v2912_v49, 0 }
  0xcc   :  { %175 = vst [vmem:[#allocation2 + $0x70] sm:$0xff] %v171_v10  ;;  %v3441_v21 = vld [vmem:[#allocation2 + $0x18c] sm:$0xf0] }
  0xcd   :  { %567 = vst [vmem:[#allocation2 + $0x78] sm:$0xff] %v563_v13  ;;  %703 = vrot.lane.b32.xlu0 %v4121_v3, %s3699_s28  ;;  %v3193_v54 = vld [vmem:[#allocation2 + $0x180] sm:$0xf] }
  0xce   :  { %568 = vrot.lane.b32.xlu1 %v4081_v59, %s3698_s27  ;;  %v3194_v34 = vor.u32 %v3441_v21, %v3193_v54 }
  0xcf   :  { %v141_v36 = vpop.permute.xlu0 %140 }
  0xd0   :  { %v147_v37 = vsel %vm146_vm5, %v133_v62, %v141_v36  ;;  %v150_v38 = vsel %vm146_vm5, %v141_v36, %v133_v62  ;;  %1449 = vmatpush.bf16.msra.mxu1 %v3194_v34  ;;  %v143_v8 = vpop.permute.xlu1 %142  ;;  %v4273_v62 = vperm.slane %v2912_v49, 1 }
  0xd1   :  { %v160_v43 = vmul.f32 %v4146_v6, %v150_v38  ;;  %v161_v28 = vmul.f32 %v4148_v9, %v147_v37  ;;  %v148_v46 = vsel %vm146_vm5, %v4134_v50, %v143_v8  ;;  %v151_v31 = vsel %vm146_vm5, %v143_v8, %v4134_v50  ;;  %570 = vrot.lane.b32.xlu2 %v4089_v61, %s3698_s27  ;;  %v4254_v41 = vpop.permute.xlu2 %274 }
  0xd2   :  { %v162_v63 = vmul.f32 %v4146_v6, %v151_v31  ;;  %v163_v47 = vmul.f32 %v4148_v9, %v148_v46  ;;  %v4264_v6 = vperm.slane %v2909_v29, 0  ;;  %v4266_v9 = vperm.slane %v2909_v29, 1 }
  0xd3   :  { %v168_v51 = vpack.c.bf16 %v161_v28, %v160_v43  ;;  %v3405_v50 = vld [vmem:[#allocation2 + $0x6c] sm:$0xf0]  ;;  %v3051_v56 = vld [vmem:[#allocation2 + $0x70] sm:$0xf0]  ;;  %v4301_v38 = vperm.slane %v2923_v20, 0  ;;  %v4303_v43 = vperm.slane %v2923_v20, 1 }
  0xd4   :  { %v169_v1 = vpack.c.bf16 %v163_v47, %v162_v63  ;;  %v3050_v2 = vor.u32 %v3405_v50, %v3049_v48  ;;  %v3054_v57 = vor.u32 %v3403_v52, %v3051_v56 }
  0xd5   :  { %172 = vst [vmem:[#allocation2 + $0x40] sm:$0xff] %v168_v51  ;;  %574 = vrot.lane.b32.xlu0 %v4096_v14, %s3698_s27 }
  0xd6   :  { %173 = vst [vmem:[#allocation2 + $0x50] sm:$0xff] %v169_v1  ;;  %576 = vrot.lane.b32.xlu1 %v4121_v3, %s3698_s27  ;;  %1411 = vmatpush.bf16.msra.mxu0 %v3050_v2 }
  0xd7   :  { %1528 = vmatpush.bf16.msra.mxu3 %v3054_v57  ;;  %v285_v0 = vpop.permute.xlu0 %284 }
  0xd8   :  { %v289_v10 = vsel %vm286_vm13, %v4156_v17, %v285_v0  ;;  %v292_v13 = vsel %vm286_vm13, %v285_v0, %v4156_v17  ;;  %v409_v30 = vpop.permute.xlu1 %408  ;;  %v2926_v17 = vld [vmem:[%s5995_s4 + $0x10] ss:$8 sm:$0x3] }
  0xd9   :  { %v304_v21 = vmul.f32 %v4264_v6, %v289_v10  ;;  %v305_v54 = vmul.f32 %v4266_v9, %v292_v13  ;;  %v421_v22 = vsel %vm418_vm14, %v409_v30, %v4201_v26  ;;  %v424_v27 = vsel %vm418_vm14, %v4201_v26, %v409_v30  ;;  %659 = vrot.lane.b32.xlu2 %v4031_v7, %s3701_s30  ;;  %v4297_v34 = vpop.permute.xlu2 %404 }
  0xda   :  { %v436_v35 = vmul.f32 %v4271_v58, %v421_v22  ;;  %v437_v36 = vmul.f32 %v4273_v62, %v424_v27  ;;  %v4305_v46 = vperm.slane %v2926_v17, 0  ;;  %v4309_v63 = vperm.slane %v2926_v17, 1 }
  0xdb   :  { %v310_v37 = vpack.c.bf16 %v305_v54, %v304_v21  ;;  %v110_v21 = vld [vmem:[%s5995_s4] ss:$8 sm:$0x3] }
  0xdc   :  { %v442_v8 = vpack.c.bf16 %v437_v36, %v436_v35  ;;  %v3033_v26 = vld [vmem:[#allocation2 + $0x40] sm:$0xf]  ;;  %v3399_v28 = vld [vmem:[#allocation2 + $0x44] sm:$0xf]  ;;  %v4331_v27 = vperm.slane %v110_v21, 0  ;;  %v4333_v17 = vperm.slane %v110_v21, 1 }
  0xdd   :  { %314 = vst [vmem:[#allocation2 + $0x160] sm:$0xff] %v310_v37  ;;  %665 = vrot.lane.b32.xlu0 %v4046_v18, %s3701_s30  ;;  %v3401_v31 = vld [vmem:[#allocation2 + $0x4c] sm:$0xf0]  ;;  %v3035_v29 = vld [vmem:[#allocation2 + $0x50] sm:$0xf0] }
  0xde   :  { %446 = vst [vmem:[#allocation2 + $0x220] sm:$0xff] %v442_v8  ;;  %532 = vrot.lane.b32.xlu1 %v4031_v7, %s3700_s29  ;;  %v3034_v47 = vor.u32 %v3401_v31, %v3033_v26  ;;  %v3038_v48 = vor.u32 %v3399_v28, %v3035_v29  ;;  %v266_v29 = vpack.c.bf16 %v3799_v19, %v3783_v11 }
  0xdf   :  { %v279_v49 = vpop.permute.xlu0 %278  ;;  %v264_v11 = vpack.c.bf16 %v3807_v24, %v3804_v23  ;;  %v265_v19 = vpack.c.bf16 %v3814_v25, %v3788_v15 }
  0xe0   :  { %v306_v51 = vmul.f32 %v4264_v6, %v279_v49  ;;  %v307_v50 = vmul.f32 %v4266_v9, %v279_v49  ;;  %v685_v52 = vmul.f32 %v4301_v38, %v279_v49  ;;  %v686_v56 = vmul.f32 %v4303_v43, %v279_v49  ;;  %1412 = vmatpush.bf16.msra.mxu0 %v3034_v47  ;;  %v411_v1 = vpop.permute.xlu1 %410 }
  0xe1   :  { %1529 = vmatpush.bf16.msra.mxu3 %v3038_v48  ;;  %v438_v2 = vmul.f32 %v4271_v58, %v411_v1  ;;  %v439_v57 = vmul.f32 %v4273_v62, %v411_v1  ;;  %v805_v0 = vmul.f32 %v4305_v46, %v411_v1  ;;  %v806_v10 = vmul.f32 %v4309_v63, %v411_v1  ;;  %v4321_v13 = vpop.permute.xlu2 %414 }
  0xe2   :  { %v311_v30 = vpack.c.bf16 %v307_v50, %v306_v51  ;;  %v690_v20 = vpack.c.bf16 %v686_v56, %v685_v52  ;;  %538 = vrot.lane.b32.xlu2 %v4046_v18, %s3700_s29  ;;  %270 = vst [vmem:[#allocation2 + $0x120] sm:$0xff] %v266_v29  ;;  %v3705_v56 = vmov 0.0|0.0  }
  0xe3   :  { %v443_v54 = vpack.c.bf16 %v439_v57, %v438_v2  ;;  %v810_v22 = vpack.c.bf16 %v806_v10, %v805_v0  ;;  %271 = vst [vmem:[#allocation2 + $0x130] sm:$0xff] %v3705_v56 }
  0xe4   :  { %315 = vst [vmem:[#allocation2 + $0x170] sm:$0xff] %v311_v30  ;;  %v3177_v48 = vld [vmem:[#allocation2 + $0x160] sm:$0xf] }
  0xe5   :  { %694 = vst [vmem:[#allocation2 + $0x178] sm:$0xff] %v690_v20  ;;  %655 = vrot.lane.b32.xlu0 %v4081_v59, %s3701_s30 }
  0xe6   :  { %447 = vst [vmem:[#allocation2 + $0x230] sm:$0xff] %v443_v54  ;;  %657 = vrot.lane.b32.xlu1 %v4089_v61, %s3701_s30 }
  0xe7   :  { %814 = vst [vmem:[#allocation2 + $0x238] sm:$0xff] %v810_v22  ;;  %v100_v35 = vpop.permute.xlu0 %99 }
  0xe8   :  { %v106_v36 = vsel %vm103_vm15, %v4221_v60, %v100_v35  ;;  %v109_v37 = vsel %vm103_vm15, %v100_v35, %v4221_v60  ;;  %v273_v8 = vpop.permute.xlu1 %272  ;;  %v3273_v60 = vld [vmem:[#allocation2 + $0x220] sm:$0xf]  ;;  %654 = vst [vmem:[#allocation2 + $0x138] sm:$0xff] %v3705_v56 }
  0xe9   :  { %v120_v26 = vmul.f32 %v4331_v27, %v109_v37  ;;  %v121_v28 = vmul.f32 %v4333_v17, %v106_v36  ;;  %268 = vst [vmem:[#allocation2 + $0x100] sm:$0xff] %v264_v11  ;;  %v506_v35 = vld [vmem:[%s5995_s4] ss:$8 sm:$0x3] }
  0xea   :  { %661 = vrot.lane.b32.xlu2 %v4096_v14, %s3701_s30  ;;  %v4347_v31 = vpop.permute.xlu2 %89  ;;  %269 = vst [vmem:[#allocation2 + $0x110] sm:$0xff] %v265_v19 }
  0xeb   :  { %v126_v47 = vpack.c.bf16 %v121_v28, %v120_v26  ;;  %v3437_v49 = vld [vmem:[#allocation2 + $0x16c] sm:$0xf0] }
  0xec   :  { %v3178_v51 = vor.u32 %v3437_v49, %v3177_v48  ;;  %v4404_v48 = vperm.slane %v506_v35, 1 }
  0xed   :  { %130 = vst [vmem:[#allocation2 + $0x20] sm:$0xff] %v126_v47  ;;  %663 = vrot.lane.b32.xlu0 %v4121_v3, %s3701_s30  ;;  %v3461_v50 = vld [vmem:[#allocation2 + $0x22c] sm:$0xf0]  ;;  %v4402_v47 = vperm.slane %v506_v35, 0 }
  0xee   :  { %528 = vrot.lane.b32.xlu1 %v4081_v59, %s3700_s29  ;;  %1450 = vmatpush.bf16.msra.mxu1 %v3178_v51  ;;  %v3274_v52 = vor.u32 %v3461_v50, %v3273_v60  ;;  %v3145_v50 = vld [vmem:[#allocation2 + $0x120] sm:$0xf] }
  0xef   :  { %v281_v1 = vpop.permute.xlu0 %280 }
  0xf0   :  { %1491 = vmatpush.bf16.msra.mxu2 %v3274_v52  ;;  %v287_v2 = vsel %vm286_vm13, %v273_v8, %v281_v1  ;;  %v290_v57 = vsel %vm286_vm13, %v281_v1, %v273_v8  ;;  %v283_v0 = vpop.permute.xlu1 %282  ;;  %v3429_v52 = vld [vmem:[#allocation2 + $0x12c] sm:$0xf0] }
  0xf1   :  { %v300_v10 = vmul.f32 %v4264_v6, %v287_v2  ;;  %v301_v30 = vmul.f32 %v4266_v9, %v290_v57  ;;  %v288_v23 = vsel %vm286_vm13, %v4254_v41, %v283_v0  ;;  %v291_v15 = vsel %vm286_vm13, %v283_v0, %v4254_v41  ;;  %v3129_v0 = vld [vmem:[#allocation2 + $0x100] sm:$0xf] }
  0xf2   :  { %v302_v24 = vmul.f32 %v4264_v6, %v288_v23  ;;  %v303_v25 = vmul.f32 %v4266_v9, %v291_v15  ;;  %v4373_v20 = vpop.permute.xlu2 %739  ;;  %530 = vrot.lane.b32.xlu2 %v4089_v61, %s3700_s29  ;;  %v3146_v56 = vor.u32 %v3429_v52, %v3145_v50  ;;  %v3243_v15 = vld [vmem:[#allocation2 + $0x1f0] sm:$0xf0] }
  0xf3   :  { %v308_v21 = vpack.c.bf16 %v301_v30, %v300_v10  ;;  %v3425_v10 = vld [vmem:[#allocation2 + $0x10c] sm:$0xf0] }
  0xf4   :  { %v309_v54 = vpack.c.bf16 %v303_v25, %v302_v24  ;;  %v2937_v24 = vld [vmem:[%s5996_s5 + $0x8] sm:$0xf]  ;;  %v3375_v25 = vld [vmem:[%s5996_s5 + $0x10] sm:$0xf0] }
  0xf5   :  { %312 = vst [vmem:[#allocation2 + $0x140] sm:$0xff] %v308_v21  ;;  %534 = vrot.lane.b32.xlu0 %v4096_v14, %s3700_s29  ;;  %v3373_v21 = vld [vmem:[%s5996_s5 + $0x4] sm:$0xf] }
  0xf6   :  { %313 = vst [vmem:[#allocation2 + $0x150] sm:$0xff] %v309_v54  ;;  %536 = vrot.lane.b32.xlu1 %v4121_v3, %s3700_s29 }
  0xf7   :  { %v407_v41 = vpop.permute.xlu0 %406 }
  0xf8   :  { %v420_v6 = vsel %vm418_vm14, %v407_v41, %v4321_v13  ;;  %v423_v9 = vsel %vm418_vm14, %v4321_v13, %v407_v41  ;;  %v413_v22 = vpop.permute.xlu1 %412  ;;  %v3130_v41 = vor.u32 %v3425_v10, %v3129_v0  ;;  %v3395_v0 = vld [vmem:[#allocation2 + $0x24] sm:$0xf] }
  0xf9   :  { %v434_v36 = vmul.f32 %v4271_v58, %v420_v6  ;;  %v435_v37 = vmul.f32 %v4273_v62, %v423_v9  ;;  %v419_v8 = vsel %vm418_vm14, %v4297_v34, %v413_v22  ;;  %v422_v26 = vsel %vm418_vm14, %v413_v22, %v4297_v34  ;;  %v2931_v6 = vld [vmem:[%s5996_s5 + $0xc] sm:$0xf0] }
  0xfa   :  { %v432_v28 = vmul.f32 %v4271_v58, %v419_v8  ;;  %v433_v13 = vmul.f32 %v4273_v62, %v422_v26  ;;  %492 = vrot.lane.b32.xlu2 %v4031_v7, %s3703_s16  ;;  %v4406_v49 = vpop.permute.xlu2 %618  ;;  %v4436_v26 = vor.u32 %v3375_v25, %v2937_v24 }
  0xfb   :  { %v441_v29 = vpack.c.bf16 %v435_v37, %v434_v36  ;;  %v3451_v36 = vld [vmem:[#allocation2 + $0x1e4] sm:$0xf] }
  0xfc   :  { %v440_v51 = vpack.c.bf16 %v433_v13, %v432_v28  ;;  %v3161_v60 = vld [vmem:[#allocation2 + $0x140] sm:$0xf]  ;;  %v3246_v8 = vor.u32 %v3451_v36, %v3243_v15  ;;  %v4438_v28 = vor.u32 %v3373_v21, %v2931_v6  ;;  %v1222_v15 = vunpack.c.h.b16 %v4213_v55  ;;  %v3439_v6 = vld [vmem:[#allocation2 + $0x184] sm:$0xf] }
  0xfd   :  { %445 = vst [vmem:[#allocation2 + $0x210] sm:$0xff] %v441_v29  ;;  %498 = vrot.lane.b32.xlu0 %v4046_v18, %s3703_s16  ;;  %v3433_v58 = vld [vmem:[#allocation2 + $0x14c] sm:$0xf0] }
  0xfe   :  { %444 = vst [vmem:[#allocation2 + $0x200] sm:$0xff] %v440_v51  ;;  %488 = vrot.lane.b32.xlu1 %v4081_v59, %s3703_s16  ;;  %v3162_v62 = vor.u32 %v3433_v58, %v3161_v60  ;;  %v3227_v60 = vld [vmem:[#allocation2 + $0x1d0] sm:$0xf0] }
  0xff   :  { %v94_v34 = vpop.permute.xlu0 %93 }
 0x100   :  { %v122_v11 = vmul.f32 %v4331_v27, %v94_v34  ;;  %v123_v19 = vmul.f32 %v4333_v17, %v94_v34  ;;  %v518_v1 = vmul.f32 %v4402_v47, %v94_v34  ;;  %v519_v2 = vmul.f32 %v4404_v48, %v94_v34  ;;  %1451 = vmatpush.bf16.msra.mxu1 %v3162_v62  ;;  %v88_v57 = vpop.permute.xlu1 %87 }
 0x102   :  { %v127_v30 = vpack.c.bf16 %v123_v19, %v122_v11  ;;  %v523_v23 = vpack.c.bf16 %v519_v2, %v518_v1  ;;  %490 = vrot.lane.b32.xlu2 %v4089_v61, %s3703_s16  ;;  %v4432_v22 = vpop.permute.xlu2 %741  ;;  %v3447_v11 = vld [vmem:[#allocation2 + $0x1c4] sm:$0xf]  ;;  %v3017_v19 = vld [vmem:[#allocation2 + $0x20] sm:$0xf] }
 0x103   :  { %v3230_v2 = vor.u32 %v3447_v11, %v3227_v60  ;;  %v2929_v60 = vld [vmem:[%s5996_s5] sm:$0xf] }
 0x104   :  { %131 = vst [vmem:[#allocation2 + $0x30] sm:$0xff] %v127_v30  ;;  %v3457_v54 = vld [vmem:[#allocation2 + $0x20c] sm:$0xf0]  ;;  %1452 = vmatpush.bf16.msra.mxu1 %v3146_v56 }
 0x105   :  { %527 = vst [vmem:[#allocation2 + $0x38] sm:$0xff] %v523_v23  ;;  %494 = vrot.lane.b32.xlu0 %v4096_v14, %s3703_s16  ;;  %v3257_v9 = vld [vmem:[#allocation2 + $0x200] sm:$0xf]  ;;  %v3443_v23 = vld [vmem:[#allocation2 + $0x1a4] sm:$0xf] }
 0x106   :  { %496 = vrot.lane.b32.xlu1 %v4121_v3, %s3703_s16  ;;  %v3258_v35 = vor.u32 %v3457_v54, %v3257_v9  ;;  %v3195_v9 = vld [vmem:[#allocation2 + $0x190] sm:$0xf0] }
 0x107   :  { %v96_v37 = vpop.permute.xlu0 %95 }
 0x108   :  { %v104_v13 = vsel %vm103_vm15, %v88_v57, %v96_v37  ;;  %v107_v29 = vsel %vm103_vm15, %v96_v37, %v88_v57  ;;  %v98_v51 = vpop.permute.xlu1 %97  ;;  %1492 = vmatpush.bf16.msra.mxu2 %v3258_v35  ;;  %1453 = vmatpush.bf16.msra.mxu1 %v3130_v41  ;;  %v1298_v35 = vpack.c.b16 %v1222_v15, %v1222_v15 }
 0x109   :  { %v116_v50 = vmul.f32 %v4331_v27, %v107_v29  ;;  %v117_v52 = vmul.f32 %v4333_v17, %v104_v13  ;;  %v105_v58 = vsel %vm103_vm15, %v4347_v31, %v98_v51  ;;  %v108_v62 = vsel %vm103_vm15, %v98_v51, %v4347_v31  ;;  %v3179_v51 = vld [vmem:[#allocation2 + $0x170] sm:$0xf0] }
 0x10a   :  { %v118_v34 = vmul.f32 %v4331_v27, %v108_v62  ;;  %v119_v56 = vmul.f32 %v4333_v17, %v105_v58  ;;  %779 = vrot.lane.b32.xlu2 %v4031_v7, %s3702_s10  ;;  %v3211_v17 = vld [vmem:[#allocation2 + $0x1b0] sm:$0xf0]  ;;  %v3198_v58 = vor.u32 %v3439_v6, %v3195_v9  ;;  %v3378_v62 = vld [vmem:[%s5996_s5 + $0x28] sm:$0xf0] }
 0x10b   :  { %v124_v1 = vpack.c.bf16 %v117_v52, %v116_v50  ;;  %3287 = vmatmul.msk.bf16.vlgmr.msra.gmra.mxu2 %vm1373_vm6, %v4436_v26  ;;  %v3397_v57 = vld [vmem:[#allocation2 + $0x2c] sm:$0xf0]  ;;  %v3019_v10 = vld [vmem:[#allocation2 + $0x30] sm:$0xf0]  ;;  %1454 = vmatmul.bf16.vlgmr.msra.gmra.mxu1 %v4438_v28  ;;  %v3214_v25 = vor.u32 %v3443_v23, %v3211_v17  ;;  %v4462_v21 = vpop.permute.xlu2 %610  ;;  %v3374_v50 = vld [vmem:[%s5996_s5 + $0x8] sm:$0xf0] }
 0x10c   :  { %1563 = vmatpush.bf16.msrb.mxu2 %v3246_v8  ;;  %v125_v31 = vpack.c.bf16 %v119_v56, %v118_v34  ;;  %v3018_v30 = vor.u32 %v3397_v57, %v3017_v19  ;;  %v3022_v27 = vor.u32 %v3395_v0, %v3019_v10  ;;  %v3376_v34 = vld [vmem:[%s5996_s5 + $0x1c] sm:$0xf]  ;;  %v1399_v0 = vand.u32 %v4225_v42, %v1298_v35 }
 0x10d   :  { %128 = vst [vmem:[#allocation2] sm:$0xff] %v124_v1  ;;  %785 = vrot.lane.b32.xlu0 %v4046_v18, %s3702_s10  ;;  %v2943_v1 = vld [vmem:[%s5996_s5 + $0x24] sm:$0xf0]  ;;  %v4505_v17 = vor.u32 %v3374_v50, %v2929_v60  ;;  %v3275_v6 = vld [vmem:[#allocation2 + $0x230] sm:$0xf0] }
 0x10e   :  { %129 = vst [vmem:[#allocation2 + $0x10] sm:$0xff] %v125_v31  ;;  %1413 = vmatpush.bf16.msra.mxu0 %v3018_v30  ;;  %1530 = vmatpush.bf16.msra.mxu3 %v3022_v27  ;;  %v3435_v30 = vld [vmem:[#allocation2 + $0x164] sm:$0xf]  ;;  %v4517_v9 = vor.u32 %v3376_v34, %v2943_v1 }
 0x10f   :  { %v746_v24 = vpop.permute.xlu0 %745  ;;  %775 = vrot.lane.b32.xlu1 %v4081_v59, %s3702_s10  ;;  %v3182_v23 = vor.u32 %v3435_v30, %v3179_v51  ;;  %v3422_v51 = vld [vmem:[#allocation2 + $0xf4] sm:$0xf0]  ;;  %v3455_v50 = vld [vmem:[#allocation2 + $0x204] sm:$0xf] }
 0x110   :  { %1564 = vmatpush.bf16.msrb.mxu2 %v3230_v2  ;;  %v749_v54 = vsel %vm374_vm2, %v4373_v20, %v746_v24  ;;  %v752_v55 = vsel %vm374_vm2, %v746_v24, %v4373_v20  ;;  %v613_v41 = vpop.permute.xlu1 %612 }
 0x111   :  { %v763_v36 = vmul.f32 %v3960_v12, %v749_v54  ;;  %v764_v37 = vmul.f32 %v3962_v16, %v752_v55  ;;  %v622_v8 = vsel %vm234_vm1, %v613_v41, %v4406_v49  ;;  %v625_v13 = vsel %vm234_vm1, %v4406_v49, %v613_v41  ;;  %v2949_v49 = vld [vmem:[%s5996_s5 + $0x20] sm:$0xf]  ;;  %v3431_v55 = vld [vmem:[#allocation2 + $0x144] sm:$0xf]  ;;  %v3163_v41 = vld [vmem:[#allocation2 + $0x150] sm:$0xf0] }
 0x112   :  { %v636_v29 = vmul.f32 %v3896_v32, %v625_v13  ;;  %v637_v20 = vmul.f32 %v3898_v33, %v622_v8  ;;  %777 = vrot.lane.b32.xlu2 %v4089_v61, %s3702_s10  ;;  %v4507_v15 = vor.u32 %v3378_v62, %v2949_v49  ;;  %v3459_v8 = vld [vmem:[#allocation2 + $0x224] sm:$0xf] }
 0x113   :  { %v769_v52 = vpack.c.bf16 %v764_v37, %v763_v36  ;;  %v4521_v37 = vpop.permute.xlu2 %699 }
 0x114   :  { %1565 = vmatpush.bf16.msrb.mxu2 %v3214_v25  ;;  %v642_v56 = vpack.c.bf16 %v637_v20, %v636_v29  ;;  %v3001_v11 = vld [vmem:[#allocation2] sm:$0xf]  ;;  %v3391_v19 = vld [vmem:[#allocation2 + $0x4] sm:$0xf]  ;;  %v3278_v29 = vor.u32 %v3459_v8, %v3275_v6  ;;  %v3454_v20 = vld [vmem:[#allocation2 + $0x1f4] sm:$0xf0] }
 0x115   :  { %773 = vst [vmem:[#allocation2 + $0x1e8] sm:$0xff] %v769_v52  ;;  %v3393_v2 = vld [vmem:[#allocation2 + $0xc] sm:$0xf0]  ;;  %v3003_v57 = vld [vmem:[#allocation2 + $0x10] sm:$0xf0]  ;;  %781 = vrot.lane.b32.xlu0 %v4096_v14, %s3702_s10 }
 0x116   :  { %646 = vst [vmem:[#allocation2 + $0xe8] sm:$0xff] %v642_v56  ;;  %v3002_v10 = vor.u32 %v3393_v2, %v3001_v11  ;;  %v3006_v31 = vor.u32 %v3391_v19, %v3003_v57  ;;  %v3259_v52 = vld [vmem:[#allocation2 + $0x210] sm:$0xf0]  ;;  %v3123_v19 = vld [vmem:[#allocation2 + $0xf8] sm:$0xf0] }
 0x117   :  { %v736_v27 = vpop.permute.xlu0 %735  ;;  %783 = vrot.lane.b32.xlu1 %v4121_v3, %s3702_s10  ;;  %v3262_v11 = vor.u32 %v3455_v50, %v3259_v52 }
 0x118   :  { %1566 = vmatpush.bf16.msrb.mxu2 %v3198_v58  ;;  %v747_v24 = vsel %vm374_vm2, %v736_v27, %v4432_v22  ;;  %v750_v25 = vsel %vm374_vm2, %v4432_v22, %v736_v27  ;;  %1414 = vmatpush.bf16.msra.mxu0 %v3002_v10  ;;  %v738_v54 = vpop.permute.xlu1 %737  ;;  %v3166_v22 = vor.u32 %v3431_v55, %v3163_v41  ;;  %v2941_v27 = vld [vmem:[%s5996_s5 + $0x18] sm:$0xf] }
 0x119   :  { %1531 = vmatpush.bf16.msra.mxu3 %v3006_v31  ;;  %v759_v35 = vmul.f32 %v3960_v12, %v747_v24  ;;  %v760_v36 = vmul.f32 %v3962_v16, %v750_v25  ;;  %v3377_v24 = vld [vmem:[%s5996_s5 + $0x20] sm:$0xf0]  ;;  %v2961_v25 = vld [vmem:[%s5996_s5 + $0x38] sm:$0xf] }
 0x11a   :  { %v4552_v41 = vor.u32 %v3377_v24, %v2941_v27  ;;  %v2973_v27 = vld [vmem:[%s5996_s5 + $0x50] sm:$0xf]  ;;  %v3382_v24 = vld [vmem:[%s5996_s5 + $0x4c] sm:$0xf] }
 0x11b   :  { %v767_v13 = vpack.c.bf16 %v760_v36, %v759_v35  ;;  %1415 = vmatmul.bf16.vlgmr.msra.gmra.mxu0 %v4505_v17  ;;  %3288 = vmatmul.msk.bf16.gmra.mxu2 %vm1373_vm6, %v4507_v15 }
 0x11c   :  { %1567 = vmatpush.bf16.msrb.mxu2 %v3182_v23  ;;  %1607 = vmatpush.bf16.msrb.mxu0 %v1399_v0  ;;  %v3249_v60 = vld [vmem:[#allocation2 + $0x1e8] sm:$0xf]  ;;  %v579_v23 = vpop.permute.xlu2 %578 }
 0x11d   :  { %1532 = vmatmul.bf16.vlgmr.msra.gmra.mxu3 %v4505_v17  ;;  %1459 = vmatmul.bf16.gmra.mxu1 %v4517_v9  ;;  %771 = vst [vmem:[#allocation2 + $0x1c8] sm:$0xff] %v767_v13  ;;  %v3250_v58 = vor.u32 %v3454_v20, %v3249_v60  ;;  %v3121_v49 = vld [vmem:[#allocation2 + $0xe8] sm:$0xf]  ;;  %v3420_v62 = vld [vmem:[#allocation2 + $0xec] sm:$0xf] }
 0x11e   :  { %v3122_v34 = vor.u32 %v3422_v51, %v3121_v49  ;;  %v3126_v0 = vor.u32 %v3420_v62, %v3123_v19 }
 0x11f   :  { %v744_v56 = vpop.permute.xlu0 %743  ;;  %1680 = vmatpush.bf16.msrb.mxu3 %v3250_v58 }
 0x120   :  { %1568 = vmatpush.bf16.msrb.mxu2 %v3166_v22  ;;  %1608 = vmatpush.bf16.msrb.mxu0 %v3278_v29  ;;  %v748_v1 = vsel %vm374_vm2, %v738_v54, %v744_v56  ;;  %v751_v2 = vsel %vm374_vm2, %v744_v56, %v738_v54  ;;  %v609_v57 = vpop.permute.xlu1 %608  ;;  %v2955_v54 = vld [vmem:[%s5996_s5 + $0x3c] sm:$0xf0] }
 0x121   :  { %1641 = vmatpush.bf16.msrb.mxu1 %v3122_v34  ;;  %v761_v10 = vmul.f32 %v3960_v12, %v748_v1  ;;  %v762_v31 = vmul.f32 %v3962_v16, %v751_v2  ;;  %v3381_v12 = vld [vmem:[%s5996_s5 + $0x40] sm:$0xf0]  ;;  %v3379_v16 = vld [vmem:[%s5996_s5 + $0x34] sm:$0xf] }
 0x122   :  { %v4554_v6 = vor.u32 %v3381_v12, %v2961_v25  ;;  %v4560_v13 = vor.u32 %v3379_v16, %v2955_v54  ;;  %v2967_v54 = vld [vmem:[%s5996_s5 + $0x54] sm:$0xf0] }
 0x123   :  { %v768_v30 = vpack.c.bf16 %v762_v31, %v761_v10  ;;  %v2953_v31 = vld [vmem:[%s5996_s5 + $0x30] sm:$0xf] }
 0x124   :  { %1609 = vmatpush.bf16.msrb.mxu0 %v3262_v11  ;;  %v3233_v49 = vld [vmem:[#allocation2 + $0x1c8] sm:$0xf] }
 0x125   :  { %772 = vst [vmem:[#allocation2 + $0x1d8] sm:$0xff] %v768_v30 }
 0x127   :  { %v615_v55 = vpop.permute.xlu0 %614 }
 0x128   :  { %1758 = vmatpush.bf16.msra.mxu0 %v3126_v0  ;;  %v620_v35 = vsel %vm234_vm1, %v609_v57, %v615_v55  ;;  %v623_v36 = vsel %vm234_vm1, %v615_v55, %v609_v57  ;;  %v617_v8 = vpop.permute.xlu1 %616 }
 0x129   :  { %v632_v22 = vmul.f32 %v3896_v32, %v623_v36  ;;  %v633_v29 = vmul.f32 %v3898_v33, %v620_v35  ;;  %v621_v20 = vsel %vm234_vm1, %v4462_v21, %v617_v8  ;;  %v624_v51 = vsel %vm234_vm1, %v617_v8, %v4462_v21  ;;  %v702_v21 = vpop.permute.xlu2 %701 }
 0x12a   :  { %v634_v60 = vmul.f32 %v3896_v32, %v624_v51  ;;  %v635_v50 = vmul.f32 %v3898_v33, %v621_v20 }
 0x12b   :  { %v640_v52 = vpack.c.bf16 %v633_v29, %v632_v22  ;;  %1420 = vmatmul.bf16.gmra.mxu0 %v4552_v41  ;;  %3289 = vmatmul.msk.bf16.gmra.mxu2 %vm1373_vm6, %v4554_v6 }
 0x12c   :  { %v641_v58 = vpack.c.bf16 %v635_v50, %v634_v60  ;;  %v3450_v62 = vld [vmem:[#allocation2 + $0x1d4] sm:$0xf0] }
 0x12d   :  { %1537 = vmatmul.bf16.gmra.mxu3 %v4552_v41  ;;  %1464 = vmatmul.bf16.gmra.mxu1 %v4560_v13  ;;  %644 = vst [vmem:[#allocation2 + $0xc8] sm:$0xff] %v640_v52  ;;  %v3234_v34 = vor.u32 %v3450_v62, %v3233_v49 }
 0x12e   :  { %645 = vst [vmem:[#allocation2 + $0xd8] sm:$0xff] %v641_v58  ;;  %v4617_v58 = vor.u32 %v3382_v24, %v2967_v54  ;;  %v3383_v54 = vld [vmem:[%s5996_s5 + $0x50] sm:$0xf0] }
 0x12f   :  { %v706_v32 = vpop.permute.xlu0 %705  ;;  %1681 = vmatpush.bf16.msrb.mxu3 %v3234_v34 }
 0x130   :  { %v709_v33 = vsel %vm330_vm4, %v4521_v37, %v706_v32  ;;  %v712_v56 = vsel %vm330_vm4, %v706_v32, %v4521_v37  ;;  %v573_v11 = vpop.permute.xlu1 %572  ;;  %v3380_v37 = vld [vmem:[%s5996_s5 + $0x38] sm:$0xf0]  ;;  %v3446_v32 = vld [vmem:[#allocation2 + $0x1b4] sm:$0xf0] }
 0x131   :  { %v723_v19 = vmul.f32 %v4024_v4, %v709_v33  ;;  %v724_v1 = vmul.f32 %v4026_v5, %v712_v56  ;;  %v582_v2 = vsel %vm190_vm3, %v573_v11, %v579_v23  ;;  %v585_v57 = vsel %vm190_vm3, %v579_v23, %v573_v11  ;;  %v3384_v23 = vld [vmem:[%s5996_s5 + $0x58] sm:$0xf0]  ;;  %v571_v51 = vpop.permute.xlu2 %570  ;;  %v3091_v56 = vld [vmem:[#allocation2 + $0xb8] sm:$0xf0] }
 0x132   :  { %v596_v0 = vmul.f32 %v4062_v39, %v585_v57  ;;  %v597_v10 = vmul.f32 %v4064_v40, %v582_v2  ;;  %v4609_v29 = vor.u32 %v3380_v37, %v2953_v31  ;;  %v4611_v20 = vor.u32 %v3384_v23, %v2973_v27 }
 0x133   :  { %v729_v30 = vpack.c.bf16 %v724_v1, %v723_v19 }
 0x134   :  { %v602_v25 = vpack.c.bf16 %v597_v10, %v596_v0  ;;  %v3105_v12 = vld [vmem:[#allocation2 + $0xc8] sm:$0xf]  ;;  %v3416_v16 = vld [vmem:[#allocation2 + $0xcc] sm:$0xf] }
 0x135   :  { %733 = vst [vmem:[#allocation2 + $0x1a8] sm:$0xff] %v729_v30  ;;  %v3418_v55 = vld [vmem:[#allocation2 + $0xd4] sm:$0xf0]  ;;  %v3107_v35 = vld [vmem:[#allocation2 + $0xd8] sm:$0xf0] }
 0x136   :  { %606 = vst [vmem:[#allocation2 + $0xa8] sm:$0xff] %v602_v25  ;;  %v3106_v36 = vor.u32 %v3418_v55, %v3105_v12  ;;  %v3110_v8 = vor.u32 %v3416_v16, %v3107_v35  ;;  %v2965_v25 = vld [vmem:[%s5996_s5 + $0x48] sm:$0xf]  ;;  %v3427_v12 = vld [vmem:[#allocation2 + $0x124] sm:$0xf] }
 0x137   :  { %v696_v22 = vpop.permute.xlu0 %695  ;;  %v3147_v16 = vld [vmem:[#allocation2 + $0x130] sm:$0xf0]  ;;  %v2985_v55 = vld [vmem:[%s5996_s5 + $0x68] sm:$0xf]  ;;  %v3385_v35 = vld [vmem:[%s5996_s5 + $0x64] sm:$0xf] }
 0x138   :  { %v707_v60 = vsel %vm330_vm4, %v696_v22, %v702_v21  ;;  %v710_v50 = vsel %vm330_vm4, %v702_v21, %v696_v22  ;;  %v698_v52 = vpop.permute.xlu1 %697  ;;  %1642 = vmatpush.bf16.msrb.mxu1 %v3106_v36  ;;  %1759 = vmatpush.bf16.msra.mxu0 %v3110_v8  ;;  %v3414_v21 = vld [vmem:[#allocation2 + $0xb4] sm:$0xf0]  ;;  %v2979_v36 = vld [vmem:[%s5996_s5 + $0x6c] sm:$0xf0]  ;;  %v4650_v22 = vor.u32 %v3383_v54, %v2965_v25 }
 0x139   :  { %v719_v49 = vmul.f32 %v4024_v4, %v707_v60  ;;  %v720_v62 = vmul.f32 %v4026_v5, %v710_v50  ;;  %v660_v23 = vpop.permute.xlu2 %659  ;;  %v3423_v50 = vld [vmem:[#allocation2 + $0x104] sm:$0xf] }
 0x13b   :  { %v727_v34 = vpack.c.bf16 %v720_v62, %v719_v49  ;;  %1425 = vmatmul.bf16.gmra.mxu0 %v4609_v29  ;;  %3290 = vmatmul.msk.bf16.gmra.mxu2 %vm1373_vm6, %v4611_v20 }
 0x13c   :  { %v3217_v33 = vld [vmem:[#allocation2 + $0x1a8] sm:$0xf] }
 0x13d   :  { %1542 = vmatmul.bf16.gmra.mxu3 %v4609_v29  ;;  %1469 = vmatmul.bf16.gmra.mxu1 %v4617_v58  ;;  %731 = vst [vmem:[#allocation2 + $0x188] sm:$0xff] %v727_v34  ;;  %v3218_v11 = vor.u32 %v3446_v32, %v3217_v33  ;;  %v3089_v19 = vld [vmem:[#allocation2 + $0xa8] sm:$0xf]  ;;  %v3412_v1 = vld [vmem:[#allocation2 + $0xac] sm:$0xf]  ;;  %v4658_v32 = vor.u32 %v3385_v35, %v2979_v36 }
 0x13e   :  { %v3090_v2 = vor.u32 %v3414_v21, %v3089_v19  ;;  %v3094_v57 = vor.u32 %v3412_v1, %v3091_v56  ;;  %v3390_v36 = vld [vmem:[%s5996_s5 + $0x88] sm:$0xf0] }
 0x13f   :  { %v704_v0 = vpop.permute.xlu0 %703  ;;  %1682 = vmatpush.bf16.msrb.mxu3 %v3218_v11 }
 0x140   :  { %v708_v10 = vsel %vm330_vm4, %v698_v52, %v704_v0  ;;  %v711_v31 = vsel %vm330_vm4, %v704_v0, %v698_v52  ;;  %v569_v37 = vpop.permute.xlu1 %568  ;;  %1643 = vmatpush.bf16.msrb.mxu1 %v3090_v2  ;;  %1760 = vmatpush.bf16.msra.mxu0 %v3094_v57  ;;  %v3131_v52 = vld [vmem:[#allocation2 + $0x110] sm:$0xf0] }
 0x141   :  { %v721_v30 = vmul.f32 %v4024_v4, %v708_v10  ;;  %v722_v27 = vmul.f32 %v4026_v5, %v711_v31  ;;  %v3387_v4 = vld [vmem:[%s5996_s5 + $0x70] sm:$0xf0]  ;;  %v3150_v5 = vor.u32 %v3427_v12, %v3147_v16  ;;  %v3134_v33 = vor.u32 %v3423_v50, %v3131_v52  ;;  %v539_v0 = vpop.permute.xlu2 %538  ;;  %v2991_v50 = vld [vmem:[%s5996_s5 + $0x84] sm:$0xf0] }
 0x142   :  { %v4652_v60 = vor.u32 %v3387_v4, %v2985_v55  ;;  %v3386_v55 = vld [vmem:[%s5996_s5 + $0x68] sm:$0xf0]  ;;  %v2997_v4 = vld [vmem:[%s5996_s5 + $0x80] sm:$0xf]  ;;  %v649_v52 = vpack.c.bf16 %v4121_v3, %v4089_v61 }
 0x143   :  { %v728_v24 = vpack.c.bf16 %v722_v27, %v721_v30  ;;  %1569 = vmatpush.bf16.msrb.mxu2 %v3150_v5  ;;  %v648_v5 = vpack.c.bf16 %v4096_v14, %v4081_v59 }
 0x144   :  { %v3201_v31 = vld [vmem:[#allocation2 + $0x188] sm:$0xf]  ;;  %652 = vst [vmem:[#allocation2 + $0x118] sm:$0xff] %v649_v52 }
 0x145   :  { %732 = vst [vmem:[#allocation2 + $0x198] sm:$0xff] %v728_v24  ;;  %v912_v52 = vld [vmem:[#allocation2 + $0x248] sm:$0x11] }
 0x146   :  { %651 = vst [vmem:[#allocation2 + $0x108] sm:$0xff] %v648_v5 }
 0x147   :  { %v575_v8 = vpop.permute.xlu0 %574  ;;  %1570 = vmatpush.bf16.msrb.mxu2 %v3134_v33 }
 0x148   :  { %v580_v49 = vsel %vm190_vm3, %v569_v37, %v575_v8  ;;  %v583_v62 = vsel %vm190_vm3, %v575_v8, %v569_v37  ;;  %v577_v34 = vpop.permute.xlu1 %576  ;;  %v3388_v8 = vld [vmem:[%s5996_s5 + $0x7c] sm:$0xf] }
 0x149   :  { %v592_v21 = vmul.f32 %v4062_v39, %v583_v62  ;;  %v593_v56 = vmul.f32 %v4064_v40, %v580_v49  ;;  %v581_v11 = vsel %vm190_vm3, %v571_v51, %v577_v34  ;;  %v584_v19 = vsel %vm190_vm3, %v577_v34, %v571_v51  ;;  %v662_v59 = vpop.permute.xlu2 %661 }
 0x14a   :  { %v594_v1 = vmul.f32 %v4062_v39, %v584_v19  ;;  %v595_v2 = vmul.f32 %v4064_v40, %v581_v11  ;;  %v650_v39 = vpack.c.bf16 %v4046_v18, %v4031_v7 }
 0x14b   :  { %v600_v57 = vpack.c.bf16 %v593_v56, %v592_v21  ;;  %1430 = vmatmul.bf16.gmra.mxu0 %v4650_v22  ;;  %3291 = vmatmul.msk.bf16.gmra.mxu2 %vm1373_vm6, %v4652_v60 }
 0x14c   :  { %v601_v10 = vpack.c.bf16 %v595_v2, %v594_v1  ;;  %v3442_v37 = vld [vmem:[#allocation2 + $0x194] sm:$0xf0]  ;;  %653 = vst [vmem:[#allocation2 + $0x128] sm:$0xff] %v650_v39  ;;  %v4711_v1 = vor.u32 %v3390_v36, %v2997_v4  ;;  %v3389_v36 = vld [vmem:[%s5996_s5 + $0x80] sm:$0xf0] }
 0x14d   :  { %1547 = vmatmul.bf16.gmra.mxu3 %v4650_v22  ;;  %1474 = vmatmul.bf16.gmra.mxu1 %v4658_v32  ;;  %604 = vst [vmem:[#allocation2 + $0x88] sm:$0xff] %v600_v57  ;;  %v3202_v51 = vor.u32 %v3442_v37, %v3201_v31  ;;  %v4717_v57 = vor.u32 %v3388_v8, %v2991_v50  ;;  %v3406_v37 = vld [vmem:[#allocation2 + $0x74] sm:$0xf0] }
 0x14e   :  { %605 = vst [vmem:[#allocation2 + $0x98] sm:$0xff] %v601_v10  ;;  %v3438_v39 = vld [vmem:[#allocation2 + $0x174] sm:$0xf0] }
 0x14f   :  { %v666_v40 = vpop.permute.xlu0 %665  ;;  %1683 = vmatpush.bf16.msrb.mxu3 %v3202_v51 }
 0x150   :  { %v669_v30 = vsel %vm286_vm13, %v660_v23, %v666_v40  ;;  %v672_v27 = vsel %vm286_vm13, %v666_v40, %v660_v23  ;;  %v533_v24 = vpop.permute.xlu1 %532  ;;  %v2977_v23 = vld [vmem:[%s5996_s5 + $0x60] sm:$0xf]  ;;  %v3059_v40 = vld [vmem:[#allocation2 + $0x78] sm:$0xf0] }
 0x151   :  { %v683_v25 = vmul.f32 %v4301_v38, %v669_v30  ;;  %v684_v12 = vmul.f32 %v4303_v43, %v672_v27  ;;  %v542_v16 = vsel %vm146_vm5, %v533_v24, %v539_v0  ;;  %v545_v7 = vsel %vm146_vm5, %v539_v0, %v533_v24 }
 0x152   :  { %v556_v18 = vmul.f32 %v4205_v45, %v545_v7  ;;  %v557_v54 = vmul.f32 %v4207_v53, %v542_v16  ;;  %v4709_v19 = vor.u32 %v3386_v55, %v2977_v23  ;;  %v531_v7 = vpop.permute.xlu2 %530 }
 0x153   :  { %v689_v35 = vpack.c.bf16 %v684_v12, %v683_v25 }
 0x154   :  { %v562_v49 = vpack.c.bf16 %v557_v54, %v556_v18  ;;  %v3073_v62 = vld [vmem:[#allocation2 + $0x88] sm:$0xf]  ;;  %v3408_v34 = vld [vmem:[#allocation2 + $0x8c] sm:$0xf] }
 0x155   :  { %693 = vst [vmem:[#allocation2 + $0x168] sm:$0xff] %v689_v35  ;;  %v3410_v14 = vld [vmem:[#allocation2 + $0x94] sm:$0xf0]  ;;  %v3075_v33 = vld [vmem:[#allocation2 + $0x98] sm:$0xf0] }
 0x156   :  { %566 = vst [vmem:[#allocation2 + $0x68] sm:$0xff] %v562_v49  ;;  %v3074_v21 = vor.u32 %v3410_v14, %v3073_v62  ;;  %v3078_v56 = vor.u32 %v3408_v34, %v3075_v33  ;;  %v2989_v35 = vld [vmem:[%s5996_s5 + $0x78] sm:$0xf]  ;;  %v1223_v62 = vunpack.c.l.b16 %v912_v52  ;;  %s3708_s5 = smov 8  }
 0x157   :  { %v656_v11 = vpop.permute.xlu0 %655  ;;  %v4738_v50 = vor.u32 %v3389_v36, %v2989_v35 }
 0x158   :  { %v667_v61 = vsel %vm286_vm13, %v656_v11, %v662_v59  ;;  %v670_v3 = vsel %vm286_vm13, %v662_v59, %v656_v11  ;;  %v658_v2 = vpop.permute.xlu1 %657  ;;  %1644 = vmatpush.bf16.msrb.mxu1 %v3074_v21  ;;  %1761 = vmatpush.bf16.msra.mxu0 %v3078_v56 }
 0x159   :  { %v679_v0 = vmul.f32 %v4301_v38, %v667_v61  ;;  %v680_v10 = vmul.f32 %v4303_v43, %v670_v3  ;;  %v1299_v61 = vpack.c.b16 %v1223_v62, %v1223_v62 }
 0x15a   :  { %v493_v21 = vpop.permute.xlu2 %492 }
 0x15b   :  { %v687_v31 = vpack.c.bf16 %v680_v10, %v679_v0  ;;  %1435 = vmatmul.bf16.gmra.mxu0 %v4709_v19  ;;  %3292 = vmatmul.msk.bf16.gmra.mxu2 %vm1373_vm6, %v4711_v1 }
 0x15c   :  { %v3185_v51 = vld [vmem:[#allocation2 + $0x168] sm:$0xf] }
 0x15d   :  { %1552 = vmatmul.bf16.gmra.mxu3 %v4709_v19  ;;  %1479 = vmatmul.bf16.gmra.mxu1 %v4717_v57  ;;  %691 = vst [vmem:[#allocation2 + $0x148] sm:$0xff] %v687_v31  ;;  %v3186_v30 = vor.u32 %v3438_v39, %v3185_v51  ;;  %v3057_v27 = vld [vmem:[#allocation2 + $0x68] sm:$0xf]  ;;  %v3404_v24 = vld [vmem:[#allocation2 + $0x6c] sm:$0xf]  ;;  %v1402_v51 = vand.u32 %v4225_v42, %v1299_v61 }
 0x15e   :  { %v3058_v25 = vor.u32 %v3406_v37, %v3057_v27  ;;  %v3062_v12 = vor.u32 %v3404_v24, %v3059_v40  ;;  %v3430_v37 = vld [vmem:[#allocation2 + $0x134] sm:$0xf0] }
 0x15f   :  { %v664_v16 = vpop.permute.xlu0 %663  ;;  %1684 = vmatpush.bf16.msrb.mxu3 %v3186_v30  ;;  %1724 = vmatpush.bf16.msra.mxu2 %v1402_v51  ;;  %v3398_v61 = vld [vmem:[#allocation2 + $0x34] sm:$0xf0] }
 0x160   :  { %v668_v18 = vsel %vm286_vm13, %v658_v2, %v664_v16  ;;  %v671_v54 = vsel %vm286_vm13, %v664_v16, %v658_v2  ;;  %v529_v23 = vpop.permute.xlu1 %528  ;;  %1645 = vmatpush.bf16.msrb.mxu1 %v3058_v25  ;;  %1762 = vmatpush.bf16.msra.mxu0 %v3062_v12  ;;  %v3153_v2 = vld [vmem:[#allocation2 + $0x128] sm:$0xf]  ;;  %v3426_v12 = vld [vmem:[#allocation2 + $0x114] sm:$0xf0] }
 0x161   :  { %v681_v55 = vmul.f32 %v4301_v38, %v668_v18  ;;  %v682_v4 = vmul.f32 %v4303_v43, %v671_v54  ;;  %v3154_v40 = vor.u32 %v3430_v37, %v3153_v2  ;;  %v3137_v25 = vld [vmem:[#allocation2 + $0x108] sm:$0xf] }
 0x163   :  { %v688_v5 = vpack.c.bf16 %v682_v4, %v681_v55  ;;  %v3138_v55 = vor.u32 %v3426_v12, %v3137_v25 }
 0x164   :  { %v3169_v10 = vld [vmem:[#allocation2 + $0x148] sm:$0xf] }
 0x165   :  { %692 = vst [vmem:[#allocation2 + $0x158] sm:$0xff] %v688_v5 }
 0x167   :  { %v535_v8 = vpop.permute.xlu0 %534 }
 0x168   :  { %v540_v49 = vsel %vm146_vm5, %v529_v23, %v535_v8  ;;  %v543_v38 = vsel %vm146_vm5, %v535_v8, %v529_v23  ;;  %v537_v43 = vpop.permute.xlu1 %536  ;;  %v491_v23 = vpop.permute.xlu2 %490 }
 0x169   :  { %v552_v34 = vmul.f32 %v4205_v45, %v543_v38  ;;  %v553_v59 = vmul.f32 %v4207_v53, %v540_v49  ;;  %v541_v14 = vsel %vm146_vm5, %v531_v7, %v537_v43  ;;  %v544_v33 = vsel %vm146_vm5, %v537_v43, %v531_v7 }
 0x16a   :  { %v554_v56 = vmul.f32 %v4205_v45, %v544_v33  ;;  %v555_v11 = vmul.f32 %v4207_v53, %v541_v14  ;;  %v1224_v45 = vunpack.c.h.b16 %v912_v52 }
 0x16b   :  { %v560_v3 = vpack.c.bf16 %v553_v59, %v552_v34  ;;  %1440 = vmatmul.bf16.gmra.mxu0 %v4738_v50  ;;  %1571 = vmatmul.bf16.vlgmr.msrb.gmra.mxu2 %v4438_v28 }
 0x16c   :  { %v561_v0 = vpack.c.bf16 %v555_v11, %v554_v56  ;;  %v3434_v31 = vld [vmem:[#allocation2 + $0x154] sm:$0xf0]  ;;  %v1300_v18 = vpack.c.b16 %v1224_v45, %v1224_v45 }
 0x16d   :  { %1557 = vmatmul.bf16.gmra.mxu3 %v4738_v50  ;;  %564 = vst [vmem:[#allocation2 + $0x48] sm:$0xff] %v560_v3  ;;  %v3170_v39 = vor.u32 %v3434_v31, %v3169_v10  ;;  %v3027_v10 = vld [vmem:[#allocation2 + $0x38] sm:$0xf0] }
 0x16e   :  { %565 = vst [vmem:[#allocation2 + $0x58] sm:$0xff] %v561_v0  ;;  %v1405_v8 = vand.u32 %v4225_v42, %v1300_v18  ;;  %v3251_v18 = vld [vmem:[#allocation2 + $0x1f8] sm:$0xf0] }
 0x16f   :  { %v499_v53 = vpop.permute.xlu0 %498  ;;  %1685 = vmatpush.bf16.msrb.mxu3 %v3170_v39 }
 0x170   :  { %v502_v30 = vsel %vm103_vm15, %v493_v21, %v499_v53  ;;  %v505_v27 = vsel %vm103_vm15, %v499_v53, %v493_v21  ;;  %v489_v24 = vpop.permute.xlu1 %488  ;;  %v780_v31 = vpop.permute.xlu2 %779 }
 0x171   :  { %v516_v16 = vmul.f32 %v4402_v47, %v505_v27  ;;  %v517_v7 = vmul.f32 %v4404_v48, %v502_v30 }
 0x173   :  { %v522_v54 = vpack.c.bf16 %v517_v7, %v516_v16  ;;  %1686 = vmatpush.bf16.msrb.mxu3 %v3154_v40 }
 0x174   :  { %v3041_v4 = vld [vmem:[#allocation2 + $0x48] sm:$0xf]  ;;  %v3400_v5 = vld [vmem:[#allocation2 + $0x4c] sm:$0xf] }
 0x175   :  { %526 = vst [vmem:[#allocation2 + $0x28] sm:$0xff] %v522_v54  ;;  %v3402_v35 = vld [vmem:[#allocation2 + $0x54] sm:$0xf0]  ;;  %v3043_v36 = vld [vmem:[#allocation2 + $0x58] sm:$0xf0] }
 0x176   :  { %v3042_v52 = vor.u32 %v3402_v35, %v3041_v4  ;;  %v3046_v49 = vor.u32 %v3400_v5, %v3043_v36  ;;  %v3448_v4 = vld [vmem:[#allocation2 + $0x1cc] sm:$0xf]  ;;  %v3462_v35 = vld [vmem:[#allocation2 + $0x234] sm:$0xf0]  ;;  %v3283_v36 = vld [vmem:[#allocation2 + $0x238] sm:$0xf0] }
 0x177   :  { %v495_v38 = vpop.permute.xlu0 %494  ;;  %1687 = vmatpush.bf16.msrb.mxu3 %v3138_v55 }
 0x178   :  { %v500_v43 = vsel %vm103_vm15, %v489_v24, %v495_v38  ;;  %v503_v62 = vsel %vm103_vm15, %v495_v38, %v489_v24  ;;  %v497_v34 = vpop.permute.xlu1 %496  ;;  %1646 = vmatpush.bf16.msrb.mxu1 %v3042_v52  ;;  %1763 = vmatpush.bf16.msra.mxu0 %v3046_v49  ;;  %v3452_v24 = vld [vmem:[#allocation2 + $0x1ec] sm:$0xf] }
 0x179   :  { %v512_v59 = vmul.f32 %v4402_v47, %v503_v62  ;;  %v513_v14 = vmul.f32 %v4404_v48, %v500_v43  ;;  %v501_v42 = vsel %vm103_vm15, %v491_v23, %v497_v34  ;;  %v504_v33 = vsel %vm103_vm15, %v497_v34, %v491_v23  ;;  %v3235_v23 = vld [vmem:[#allocation2 + $0x1d8] sm:$0xf0]  ;;  %v3444_v49 = vld [vmem:[#allocation2 + $0x1ac] sm:$0xf] }
 0x17a   :  { %v514_v21 = vmul.f32 %v4402_v47, %v504_v33  ;;  %v515_v56 = vmul.f32 %v4404_v48, %v501_v42  ;;  %v3254_v54 = vor.u32 %v3452_v24, %v3251_v18  ;;  %v3238_v5 = vor.u32 %v3448_v4, %v3235_v23  ;;  %v3219_v34 = vld [vmem:[#allocation2 + $0x1b8] sm:$0xf0]  ;;  %v3440_v33 = vld [vmem:[#allocation2 + $0x18c] sm:$0xf] }
 0x17b   :  { %1841 = vmatpush.bf16.msra.mxu3 %v1405_v8  ;;  %v520_v11 = vpack.c.bf16 %v513_v14, %v512_v59  ;;  %1576 = vmatmul.bf16.gmra.mxu2 %v4517_v9  ;;  %v3222_v59 = vor.u32 %v3444_v49, %v3219_v34  ;;  %v3203_v14 = vld [vmem:[#allocation2 + $0x198] sm:$0xf0] }
 0x17c   :  { %3293 = vmatmul.msk.bf16.vlgmr.msrb.gmra.mxu0 %vm1373_vm6, %v4436_v26  ;;  %v521_v3 = vpack.c.bf16 %v515_v56, %v514_v21  ;;  %v3025_v2 = vld [vmem:[#allocation2 + $0x28] sm:$0xf]  ;;  %v3396_v0 = vld [vmem:[#allocation2 + $0x2c] sm:$0xf]  ;;  %v3206_v56 = vor.u32 %v3440_v33, %v3203_v14 }
 0x17d   :  { %1688 = vmatmul.bf16.vlgmr.msrb.gmra.mxu3 %v4438_v28  ;;  %524 = vst [vmem:[#allocation2 + $0x8] sm:$0xff] %v520_v11  ;;  %v3026_v37 = vor.u32 %v3398_v61, %v3025_v2  ;;  %v3030_v51 = vor.u32 %v3396_v0, %v3027_v10  ;;  %v3436_v11 = vld [vmem:[#allocation2 + $0x16c] sm:$0xf]  ;;  %v3171_v0 = vld [vmem:[#allocation2 + $0x158] sm:$0xf0] }
 0x17e   :  { %525 = vst [vmem:[#allocation2 + $0x18] sm:$0xff] %v521_v3  ;;  %v3187_v3 = vld [vmem:[#allocation2 + $0x178] sm:$0xf0] }
 0x17f   :  { %v786_v47 = vpop.permute.xlu0 %785  ;;  %1647 = vmatpush.bf16.msrb.mxu1 %v3026_v37  ;;  %1764 = vmatpush.bf16.msra.mxu0 %v3030_v51  ;;  %v3190_v2 = vor.u32 %v3436_v11, %v3187_v3  ;;  %v3432_v37 = vld [vmem:[#allocation2 + $0x14c] sm:$0xf] }
 0x180   :  { %v789_v48 = vsel %vm418_vm14, %v780_v31, %v786_v47  ;;  %v792_v39 = vsel %vm418_vm14, %v786_v47, %v780_v31  ;;  %v3174_v47 = vor.u32 %v3432_v37, %v3171_v0 }
 0x181   :  { %v803_v45 = vmul.f32 %v4305_v46, %v789_v48  ;;  %v804_v53 = vmul.f32 %v4309_v63, %v792_v39  ;;  %v776_v21 = vpop.permute.xlu1 %775  ;;  %v778_v48 = vpop.permute.xlu2 %777 }
 0x183   :  { %v809_v40 = vpack.c.bf16 %v804_v53, %v803_v45 }
 0x184   :  { %v3009_v30 = vld [vmem:[#allocation2 + $0x8] sm:$0xf]  ;;  %v3392_v27 = vld [vmem:[#allocation2 + $0xc] sm:$0xf] }
 0x185   :  { %813 = vst [vmem:[#allocation2 + $0x228] sm:$0xff] %v809_v40  ;;  %v3394_v25 = vld [vmem:[#allocation2 + $0x14] sm:$0xf0]  ;;  %v3011_v12 = vld [vmem:[#allocation2 + $0x18] sm:$0xf0] }
 0x186   :  { %v3010_v16 = vor.u32 %v3394_v25, %v3009_v30  ;;  %v3014_v7 = vor.u32 %v3392_v27, %v3011_v12 }
 0x187   :  { %v782_v39 = vpop.permute.xlu0 %781 }
 0x188   :  { %1648 = vmatpush.bf16.msrb.mxu1 %v3010_v16  ;;  %1765 = vmatpush.bf16.msra.mxu0 %v3014_v7  ;;  %v1455_v55 = vpop.f32.mrf.mxu1  ;;  %v787_v53 = vsel %vm418_vm14, %v776_v21, %v782_v39  ;;  %v790_v40 = vsel %vm418_vm14, %v782_v39, %v776_v21 }
 0x189   :  { %v784_v30 = vpop.permute.xlu1 %783  ;;  %v799_v27 = vmul.f32 %v4305_v46, %v787_v53  ;;  %v800_v24 = vmul.f32 %v4309_v63, %v790_v40 }
 0x18a   :  { %v788_v25 = vsel %vm418_vm14, %v778_v48, %v784_v30  ;;  %v791_v12 = vsel %vm418_vm14, %v784_v30, %v778_v48 }
 0x18b   :  { %1581 = vmatmul.bf16.gmra.mxu2 %v4560_v13  ;;  %1649 = vmatmul.bf16.vlgmr.msrb.gmra.mxu1 %v4505_v17  ;;  %v801_v16 = vmul.f32 %v4305_v46, %v788_v25  ;;  %v807_v18 = vpack.c.bf16 %v800_v24, %v799_v27  ;;  %v3428_v24 = vld [vmem:[#allocation2 + $0x12c] sm:$0xf]  ;;  %v3155_v25 = vld [vmem:[#allocation2 + $0x138] sm:$0xf0] }
 0x18c   :  { %1797 = vmatpush.bf16.msra.mxu1 %v3254_v54  ;;  %3294 = vmatmul.msk.bf16.gmra.mxu0 %vm1373_vm6, %v4507_v15  ;;  %v3281_v8 = vld [vmem:[#allocation2 + $0x228] sm:$0xf]  ;;  %v3460_v52 = vld [vmem:[#allocation2 + $0x22c] sm:$0xf]  ;;  %v802_v54 = vmul.f32 %v4309_v63, %v791_v12 }
 0x18d   :  { %1693 = vmatmul.bf16.gmra.mxu3 %v4517_v9  ;;  %v3282_v38 = vor.u32 %v3462_v35, %v3281_v8  ;;  %v3286_v43 = vor.u32 %v3460_v52, %v3283_v36  ;;  %811 = vst [vmem:[#allocation2 + $0x208] sm:$0xff] %v807_v18 }
 0x18e   :  { %v1494_v62 = vpop.f32.mrf.mxu2  ;;  %v808_v4 = vpack.c.bf16 %v802_v54, %v801_v16  ;;  %v3158_v16 = vor.u32 %v3428_v24, %v3155_v25 }
 0x18f   :  { %1725 = vmatpush.bf16.msra.mxu2 %v3282_v38  ;;  %1842 = vmatpush.bf16.msra.mxu3 %v3286_v43 }
 0x190   :  { %1798 = vmatpush.bf16.msra.mxu1 %v3238_v5  ;;  %v1457_v42 = vpop.f32.mrf.mxu1  ;;  %812 = vst [vmem:[#allocation2 + $0x218] sm:$0xff] %v808_v4  ;;  %v3424_v4 = vld [vmem:[#allocation2 + $0x10c] sm:$0xf] }
 0x194   :  { %1799 = vmatpush.bf16.msra.mxu1 %v3222_v59  ;;  %v3265_v44 = vld [vmem:[#allocation2 + $0x208] sm:$0xf] }
 0x196   :  { %v1496_v61 = vpop.f32.mrf.mxu2 }
 0x197   :  { %v3458_v43 = vld [vmem:[#allocation2 + $0x214] sm:$0xf0]  ;;  %v3267_v3 = vld [vmem:[#allocation2 + $0x218] sm:$0xf0] }
 0x198   :  { %1800 = vmatpush.bf16.msra.mxu1 %v3206_v56  ;;  %v1416_v10 = vpop.f32.mrf.mxu0 }
 0x199   :  { %v1456_v31 = vadd.f32 %v1455_v55, %v1416_v10 }
 0x19a   :  { %v1460_v51 = vpop.f32.mrf.mxu1 }
 0x19b   :  { %v1495_v45 = vadd.f32 %v1494_v62, %v1456_v31  ;;  %1586 = vmatmul.bf16.gmra.mxu2 %v4617_v58  ;;  %1654 = vmatmul.bf16.gmra.mxu1 %v4552_v41  ;;  %v3266_v62 = vor.u32 %v3458_v43, %v3265_v44 }
 0x19c   :  { %1801 = vmatpush.bf16.msra.mxu1 %v3190_v2  ;;  %3295 = vmatmul.msk.bf16.gmra.mxu0 %vm1373_vm6, %v4554_v6 }
 0x19d   :  { %1698 = vmatmul.bf16.gmra.mxu3 %v4560_v13  ;;  %1726 = vmatpush.bf16.msra.mxu2 %v3266_v62  ;;  %v3311_v37 = vmul.f32 -1.442695, %v1495_v45 }
 0x19e   :  { %v1499_v7 = vpop.f32.mrf.mxu2 }
 0x19f   :  { %3477 = vpow2.f32 %v3311_v37 }
 0x1a0   :  { %1802 = vmatpush.bf16.msra.mxu1 %v3174_v47  ;;  %v4807_v23 = vpop.f32.mrf.mxu3  ;;  %v1418_v55 = vpop.f32.mrf.mxu0 }
 0x1a1   :  { %v1458_v5 = vadd.f32 %v1457_v42, %v1418_v55 }
 0x1a2   :  { %v1462_v35 = vpop.f32.mrf.mxu1 }
 0x1a3   :  { %v1497_v36 = vadd.f32 %v1496_v61, %v1458_v5  ;;  %v3456_v61 = vld [vmem:[#allocation2 + $0x20c] sm:$0xf]  ;;  %v3139_v5 = vld [vmem:[#allocation2 + $0x118] sm:$0xf0] }
 0x1a4   :  { %v3270_v0 = vor.u32 %v3456_v61, %v3267_v3  ;;  %1803 = vmatpush.bf16.msra.mxu1 %v3158_v16 }
 0x1a5   :  { %v3313_v30 = vmul.f32 -1.442695, %v1497_v36  ;;  %v3478_v45 = vpop.eup %3477 }
 0x1a6   :  { %v1501_v8 = vpop.f32.mrf.mxu2  ;;  %1843 = vmatpush.bf16.msra.mxu3 %v3270_v0  ;;  %v4829_v36 = vadd.f32 1.0, %v3478_v45 }
 0x1a8   :  { %v4809_v52 = vpop.f32.mrf.mxu3  ;;  %v1421_v49 = vpop.f32.mrf.mxu0  ;;  %vm1958_vm1 = vweird.f32 %v4829_v36 }
 0x1a9   :  { %v1461_v38 = vadd.f32 %v1460_v51, %v1421_v49 }
 0x1aa   :  { %v1465_v46 = vpop.f32.mrf.mxu1 }
 0x1ab   :  { %v1500_v34 = vadd.f32 %v1499_v7, %v1461_v38  ;;  %1591 = vmatmul.bf16.gmra.mxu2 %v4658_v32  ;;  %1659 = vmatmul.bf16.gmra.mxu1 %v4609_v29 }
 0x1ac   :  { %3296 = vmatmul.msk.bf16.gmra.mxu0 %vm1373_vm6, %v4611_v20 }
 0x1ad   :  { %1703 = vmatmul.bf16.gmra.mxu3 %v4617_v58  ;;  %1883 = vst [vmem:[#allocation3 + $0x108] sm:$0xff] %v1500_v34 }
 0x1ae   :  { %v1504_v63 = vpop.f32.mrf.mxu2 }
 0x1b0   :  { %v4816_v59 = vpop.f32.mrf.mxu3  ;;  %v1423_v14 = vpop.f32.mrf.mxu0 }
 0x1b1   :  { %v1463_v42 = vadd.f32 %v1462_v35, %v1423_v14 }
 0x1b2   :  { %v1467_v33 = vpop.f32.mrf.mxu1 }
 0x1b3   :  { %v1502_v21 = vadd.f32 %v1501_v8, %v1463_v42  ;;  %v3142_v8 = vor.u32 %v3424_v4, %v3139_v5 }
 0x1b5   :  { %v3317_v47 = vmul.f32 -1.442695, %v1502_v21  ;;  %1804 = vmatpush.bf16.msra.mxu1 %v3142_v8 }
 0x1b6   :  { %v1506_v56 = vpop.f32.mrf.mxu2 }
 0x1b7   :  { %3479 = vpow2.f32 %v3317_v47 }
 0x1b8   :  { %v4818_v11 = vpop.f32.mrf.mxu3  ;;  %v1426_v2 = vpop.f32.mrf.mxu0  ;;  %3481 = vpow2.f32 %v3313_v30 }
 0x1b9   :  { %v1466_v10 = vadd.f32 %v1465_v46, %v1426_v2  ;;  %v1927_v2 = vld [vmem:[#allocation3 + $0x108] sm:$0xf] }
 0x1ba   :  { %v1470_v51 = vpop.f32.mrf.mxu1  ;;  %v3315_v37 = vmul.f32 -1.442695, %v1927_v2 }
 0x1bb   :  { %v1505_v31 = vadd.f32 %v1504_v63, %v1466_v10  ;;  %1596 = vmatmul.bf16.gmra.mxu2 %v4717_v57  ;;  %1664 = vmatmul.bf16.gmra.mxu1 %v4650_v22 }
 0x1bc   :  { %3297 = vmatmul.msk.bf16.gmra.mxu0 %vm1373_vm6, %v4652_v60 }
 0x1bd   :  { %1708 = vmatmul.bf16.gmra.mxu3 %v4658_v32  ;;  %v3319_v12 = vmul.f32 -1.442695, %v1505_v31  ;;  %v3480_v7 = vpop.eup %3479 }
 0x1be   :  { %v1509_v48 = vpop.f32.mrf.mxu2  ;;  %v4831_v49 = vadd.f32 1.0, %v3480_v7  ;;  %v3482_v46 = vpop.eup %3481 }
 0x1bf   :  { %3483 = vpow2.f32 %v3319_v12  ;;  %v4843_v42 = vadd.f32 1.0, %v3482_v46 }
 0x1c0   :  { %v4825_v39 = vpop.f32.mrf.mxu3  ;;  %v1428_v53 = vpop.f32.mrf.mxu0  ;;  %3485 = vrcp.f32 %v4829_v36  ;;  %vm2078_vm7 = vweird.f32 %v4831_v49 }
 0x1c1   :  { %v1468_v40 = vadd.f32 %v1467_v33, %v1428_v53  ;;  %3487 = vrcp.f32 %v4831_v49  ;;  %vm1988_vm12 = vweird.f32 %v4843_v42 }
 0x1c2   :  { %v1472_v54 = vpop.f32.mrf.mxu1 }
 0x1c3   :  { %v1507_v27 = vadd.f32 %v1506_v56, %v1468_v40 }
 0x1c5   :  { %1895 = vst [vmem:[#allocation3 + $0xe0] sm:$0xff] %v1507_v27  ;;  %v3484_v43 = vpop.eup %3483 }
 0x1c6   :  { %v1511_v18 = vpop.f32.mrf.mxu2  ;;  %v4845_v56 = vadd.f32 1.0, %v3484_v43  ;;  %v4847_v3 = vpop.eup %3485 }
 0x1c7   :  { %v4849_v10 = vpop.eup %3487  ;;  %v1954_v47 = vmul.f32 %v4847_v3, %v4829_v36  ;;  %vm1959_vm2 = vweird.f32 %v4847_v3 }
 0x1c8   :  { %v4827_v55 = vpop.f32.mrf.mxu3  ;;  %v1431_v35 = vpop.f32.mrf.mxu0  ;;  %v2074_v40 = vmul.f32 %v4849_v10, %v4831_v49  ;;  %vm2079_vm3 = vweird.f32 %v4849_v10  ;;  %vm4896_vm4 = vmor %vm1958_vm1, %vm1959_vm2  ;;  %vm2108_vm9 = vweird.f32 %v4845_v56 }
 0x1c9   :  { %v1471_v44 = vadd.f32 %v1470_v51, %v1431_v35  ;;  %v1955_v16 = vsub.f32 1.0, %v1954_v47  ;;  %vm4911_vm8 = vmor %vm2078_vm7, %vm2079_vm3 }
 0x1ca   :  { %v1475_v21 = vpop.f32.mrf.mxu1 }
 0x1cb   :  { %v1510_v38 = vadd.f32 %v1509_v48, %v1471_v44  ;;  %3299 = vmatmul.msk.bf16.vlgmr.msra.gmra.mxu2 %vm1373_vm6, %v4436_v26  ;;  %1669 = vmatmul.bf16.gmra.mxu1 %v4709_v19  ;;  %v1956_v44 = vmul.f32 %v4847_v3, %v1955_v16  ;;  %v2082_v16 = vand.u32 2147483647, %v4831_v49 }
 0x1cc   :  { %3298 = vmatmul.msk.bf16.gmra.mxu0 %vm1373_vm6, %v4711_v1  ;;  %v2047_v63 = vld [vmem:[#allocation3 + $0xe0] sm:$0xf] }
 0x1cd   :  { %1713 = vmatmul.bf16.gmra.mxu3 %v4717_v57  ;;  %v3323_v62 = vmul.f32 -1.442695, %v1510_v38  ;;  %v3321_v0 = vmul.f32 -1.442695, %v2047_v63  ;;  %vm2083_vm11 = vcmp.eq.f32.partialorder %v2082_v16, 8.507059e+37 }
 0x1ce   :  { %v1514_v34 = vpop.f32.mrf.mxu2 }
 0x1cf   :  { %3489 = vpow2.f32 %v3323_v62 }
 0x1d0   :  { %v4841_v14 = vpop.f32.mrf.mxu3  ;;  %v1433_v33 = vpop.f32.mrf.mxu0  ;;  %3491 = vrcp.f32 %v4843_v42 }
 0x1d1   :  { %v1473_v61 = vadd.f32 %v1472_v54, %v1433_v33  ;;  %3493 = vrcp.f32 %v4845_v56  ;;  %v1964_v33 = vand.u32 2147483648, %v4829_v36 }
 0x1d2   :  { %3495 = vpow2.f32 %v3321_v0  ;;  %v1477_v7 = vpop.f32.mrf.mxu1 }
 0x1d3   :  { %v1512_v31 = vadd.f32 %v1511_v18, %v1473_v61  ;;  %v2075_v18 = vsub.f32 1.0, %v2074_v40  ;;  %v2084_v40 = vand.u32 2147483648, %v4831_v49 }
 0x1d5   :  { %v3325_v51 = vmul.f32 -1.442695, %v1512_v31  ;;  %v3490_v48 = vpop.eup %3489  ;;  %v2076_v46 = vmul.f32 %v4849_v10, %v2075_v18  ;;  %v1957_v31 = vadd.f32 %v4847_v3, %v1956_v44 }
 0x1d6   :  { %v1516_v53 = vpop.f32.mrf.mxu2  ;;  %v4859_v27 = vadd.f32 1.0, %v3490_v48  ;;  %v4861_v25 = vpop.eup %3491 }
 0x1d7   :  { %3497 = vpow2.f32 %v3325_v51  ;;  %v4863_v45 = vpop.eup %3493  ;;  %v1984_v35 = vmul.f32 %v4861_v25, %v4843_v42  ;;  %v2077_v51 = vadd.f32 %v4849_v10, %v2076_v46  ;;  %v1961_v49 = vsel %vm4896_vm4, %v4847_v3, %v1957_v31 }
 0x1d8   :  { %v4857_v30 = vpop.f32.mrf.mxu3  ;;  %v1436_v24 = vpop.f32.mrf.mxu0  ;;  %3499 = vpow2.f32 %v3315_v37  ;;  %v2104_v8 = vmul.f32 %v4863_v45, %v4845_v56  ;;  %vm2109_vm10 = vweird.f32 %v4863_v45  ;;  %v2085_v46 = vor.u32 1.1754944e-38, %v2084_v40 }
 0x1d9   :  { %v1476_v12 = vadd.f32 %v1475_v21, %v1436_v24  ;;  %3501 = vrcp.f32 %v4859_v27  ;;  %v3496_v4 = vpop.eup %3495  ;;  %v1985_v2 = vsub.f32 1.0, %v1984_v35  ;;  %vm4946_vm13 = vmor %vm2108_vm9, %vm2109_vm10  ;;  %vm1989_vm14 = vweird.f32 %v4861_v25 }
 0x1da   :  { %v2105_v0 = vsub.f32 1.0, %v2104_v8  ;;  %v1480_v24 = vpop.f32.mrf.mxu1  ;;  %v2081_v8 = vsel %vm4911_vm8, %v4849_v10, %v2077_v51  ;;  %v2114_v10 = vand.u32 2147483648, %v4845_v56  ;;  %v1992_v51 = vand.u32 2147483647, %v4843_v42  ;;  %vm4981_vm2 = vmor %vm1988_vm12, %vm1989_vm14 }
 0x1db   :  { %v1515_v54 = vadd.f32 %v1514_v34, %v1476_v12  ;;  %3300 = vmatmul.msk.bf16.gmra.mxu2 %vm1373_vm6, %v4507_v15  ;;  %1674 = vmatmul.bf16.gmra.mxu1 %v4738_v50  ;;  %v4883_v34 = vadd.f32 1.0, %v3496_v4  ;;  %v1986_v35 = vmul.f32 %v4861_v25, %v1985_v2  ;;  %v2086_v2 = vsel %vm2083_vm11, %v2085_v46, %v2081_v8 }
 0x1dc   :  { %1766 = vmatmul.bf16.vlgmr.msra.gmra.mxu0 %v4505_v17  ;;  %v2106_v18 = vmul.f32 %v4863_v45, %v2105_v0  ;;  %v2295_v0 = vld [vmem:[%s5994_s3] sm:$0xff]  ;;  %v2115_v4 = vor.u32 1.1754944e-38, %v2114_v10  ;;  %vm2198_vm1 = vweird.f32 %v4859_v27  ;;  %vm1993_vm4 = vcmp.eq.f32.partialorder %v1992_v51, 8.507059e+37 }
 0x1dd   :  { %3305 = vmatmul.msk.bf16.vlgmr.msra.gmra.mxu3 %vm1373_vm6, %v4436_v26  ;;  %v3498_v5 = vpop.eup %3497  ;;  %1907 = vst [vmem:[#allocation3 + $0x60] sm:$0xff] %v1515_v54  ;;  %v1962_v26 = vand.u32 2147483647, %v4829_v36  ;;  %v1965_v54 = vor.u32 1.1754944e-38, %v1964_v33  ;;  %v1987_v16 = vadd.f32 %v4861_v25, %v1986_v35  ;;  %v2301_v36 = vmul.f32 %v2295_v0, %v2086_v2 }
 0x1de   :  { %v1519_v38 = vpop.f32.mrf.mxu2  ;;  %v4877_v17 = vadd.f32 1.0, %v3498_v5  ;;  %v3500_v43 = vpop.eup %3499  ;;  %v2202_v2 = vand.u32 2147483647, %v4859_v27 }
 0x1df   :  { %v4888_v21 = vpop.eup %3501  ;;  %v4891_v37 = vadd.f32 1.0, %v3500_v43  ;;  %vm4900_vm5 = vcmp.eq.f32.partialorder %v1962_v26, 8.507059e+37 }
 0x1e0   :  { %v4880_v62 = vpop.f32.mrf.mxu3  ;;  %v1438_v63 = vpop.f32.mrf.mxu0  ;;  %3503 = vrcp.f32 %v4877_v17  ;;  %v1966_v40 = vsel %vm4900_vm5, %v1965_v54, %v1961_v49  ;;  %vm2199_vm3 = vweird.f32 %v4888_v21  ;;  %vm2203_vm7 = vcmp.eq.f32.partialorder %v2202_v2, 8.507059e+37 }
 0x1e1   :  { %v1478_v61 = vadd.f32 %v1477_v7, %v1438_v63  ;;  %3505 = vrcp.f32 %v4883_v34  ;;  %v2112_v63 = vand.u32 2147483647, %v4845_v56  ;;  %vm5008_vm5 = vmor %vm2198_vm1, %vm2199_vm3  ;;  %vm2018_vm8 = vweird.f32 %v4891_v37 }
 0x1e2   :  { %v1482_v35 = vpop.f32.mrf.mxu1  ;;  %vm2228_vm11 = vweird.f32 %v4877_v17 }
 0x1e3   :  { %v1517_v47 = vadd.f32 %v1516_v53, %v1478_v61  ;;  %v2194_v53 = vmul.f32 %v4888_v21, %v4859_v27  ;;  %v2107_v61 = vadd.f32 %v4863_v45, %v2106_v18  ;;  %vm4964_vm15 = vcmp.eq.f32.partialorder %v2112_v63, 8.507059e+37 }
 0x1e4   :  { %v2167_v12 = vld [vmem:[#allocation3 + $0x60] sm:$0xf]  ;;  %v1991_v63 = vsel %vm4981_vm2, %v4861_v25, %v1987_v16  ;;  %v2297_v25 = vld [vmem:[%s5994_s3 + $0x10] sm:$0xff] }
 0x1e5   :  { %v3327_v7 = vmul.f32 -1.442695, %v2167_v12  ;;  %3507 = vtanh.f32 %v1517_v47  ;;  %v2195_v33 = vsub.f32 1.0, %v2194_v53  ;;  %v1994_v47 = vand.u32 2147483648, %v4843_v42 }
 0x1e6   :  { %3509 = vrcp.f32 %v4891_v37  ;;  %v4916_v5 = vpop.f32.mrf.mxu2  ;;  %v4929_v43 = vpop.eup %3503  ;;  %v2111_v54 = vsel %vm4946_vm13, %v4863_v45, %v2107_v61 }
 0x1e7   :  { %3511 = vpow2.f32 %v3327_v7  ;;  %v4937_v31 = vpop.eup %3505  ;;  %v2224_v56 = vmul.f32 %v4929_v43, %v4877_v17  ;;  %v1995_v61 = vor.u32 1.1754944e-38, %v1994_v47  ;;  %v2116_v48 = vsel %vm4964_vm15, %v2115_v4, %v2111_v54 }
 0x1e8   :  { %v4925_v44 = vpop.f32.mrf.mxu3  ;;  %v1441_v26 = vpop.f32.mrf.mxu0  ;;  %vm2229_vm9 = vweird.f32 %v4929_v43  ;;  %vm2139_vm12 = vweird.f32 %v4937_v31  ;;  %vm2138_vm15 = vweird.f32 %v4883_v34 }
 0x1e9   :  { %v1481_v3 = vadd.f32 %v1480_v24, %v1441_v26  ;;  %v1996_v51 = vsel %vm1993_vm4, %v1995_v61, %v1991_v63  ;;  %v2234_v63 = vand.u32 2147483648, %v4877_v17  ;;  %vm5044_vm13 = vmor %vm2228_vm11, %vm2229_vm9 }
 0x1ea   :  { %vm5078_vm1 = vmor %vm2138_vm15, %vm2139_vm12 }
 0x1eb   :  { %v3508_v24 = vpop.eup %3507  ;;  %v1520_v12 = vadd.f32 %v1519_v38, %v1481_v3  ;;  %3301 = vmatmul.msk.bf16.gmra.mxu2 %vm1373_vm6, %v4554_v6  ;;  %1805 = vmatmul.bf16.vlgmr.msra.gmra.mxu1 %v4438_v28  ;;  %v2204_v3 = vand.u32 2147483648, %v4859_v27  ;;  %v2235_v47 = vor.u32 1.1754944e-38, %v2234_v63 }
 0x1ec   :  { %1771 = vmatmul.bf16.gmra.mxu0 %v4552_v41  ;;  %v4959_v53 = vpop.eup %3509  ;;  %v2196_v41 = vmul.f32 %v4888_v21, %v2195_v33  ;;  %v2307_v7 = vmul.f32 %v3508_v24, %v1966_v40  ;;  %v2225_v33 = vsub.f32 1.0, %v2224_v56 }
 0x1ed   :  { %3306 = vmatmul.msk.bf16.gmra.mxu3 %vm1373_vm6, %v4507_v15  ;;  %v3512_v18 = vpop.eup %3511  ;;  %3513 = vtanh.f32 %v1520_v12  ;;  %v2134_v15 = vmul.f32 %v4937_v31, %v4883_v34  ;;  %v2014_v26 = vmul.f32 %v4959_v53, %v4891_v37  ;;  %v2205_v38 = vor.u32 1.1754944e-38, %v2204_v3 }
 0x1ee   :  { %v1572_v28 = vpop.f32.mrf.mxu2  ;;  %v4975_v49 = vadd.f32 1.0, %v3512_v18  ;;  %v2313_v45 = vadd.f32 %v2307_v7, %v2301_v36  ;;  %v2197_v10 = vadd.f32 %v4888_v21, %v2196_v41  ;;  %v2226_v56 = vmul.f32 %v4929_v43, %v2225_v33 }
 0x1ef   :  { %v2135_v40 = vsub.f32 1.0, %v2134_v15  ;;  %v2015_v16 = vsub.f32 1.0, %v2014_v26  ;;  %v2303_v41 = vmul.f32 %v2297_v25, %v2116_v48  ;;  %vm2019_vm10 = vweird.f32 %v4959_v53 }
 0x1f0   :  { %v4986_v46 = vpop.f32.mrf.mxu3  ;;  %v1443_v42 = vpop.f32.mrf.mxu0  ;;  %2394 = vst [vmem:[%s6000_s9] sm:$0xff] %v2313_v45  ;;  %3515 = vtanh.f32 %v2313_v45  ;;  %v2201_v27 = vsel %vm5008_vm5, %v4888_v21, %v2197_v10  ;;  %v2227_v15 = vadd.f32 %v4929_v43, %v2226_v56  ;;  %v2232_v33 = vand.u32 2147483647, %v4877_v17  ;;  %vm5070_vm14 = vmor %vm2018_vm8, %vm2019_vm10 }
 0x1f1   :  { %v1483_v0 = vadd.f32 %v1482_v35, %v1443_v42  ;;  %3517 = vrcp.f32 %v4975_v49  ;;  %v2136_v18 = vmul.f32 %v4937_v31, %v2135_v40  ;;  %v2206_v8 = vsel %vm2203_vm7, %v2205_v38, %v2201_v27 }
 0x1f2   :  { %v2016_v26 = vmul.f32 %v4959_v53, %v2015_v16  ;;  %v2024_v3 = vand.u32 2147483648, %v4891_v37  ;;  %v2022_v17 = vand.u32 2147483647, %v4891_v37  ;;  %v2144_v10 = vand.u32 2147483648, %v4883_v34 }
 0x1f3   :  { %v3514_v24 = vpop.eup %3513  ;;  %v1522_v12 = vadd.f32 %v4916_v5, %v1483_v0  ;;  %v1573_v5 = vadd.f32 %v1572_v28, %v4807_v23  ;;  %v2137_v42 = vadd.f32 %v4937_v31, %v2136_v18  ;;  %v2231_v0 = vsel %vm5044_vm13, %v4929_v43, %v2227_v15 }
 0x1f4   :  { %v2309_v36 = vmul.f32 %v3514_v24, %v1996_v51  ;;  %v2017_v48 = vadd.f32 %v4959_v53, %v2016_v26  ;;  %v2142_v25 = vand.u32 2147483647, %v4883_v34  ;;  %vm2233_vm2 = vcmp.eq.f32.partialorder %v2232_v33, 8.507059e+37 }
 0x1f5   :  { %1919 = vst [vmem:[#allocation3 + $0x70] sm:$0xff] %v1522_v12  ;;  %v2025_v40 = vor.u32 1.1754944e-38, %v2024_v3  ;;  %v2141_v51 = vsel %vm5078_vm1, %v4937_v31, %v2137_v42  ;;  %v2236_v24 = vsel %vm2233_vm2, %v2235_v47, %v2231_v0  ;;  %v2145_v16 = vor.u32 1.1754944e-38, %v2144_v10  ;;  %v2299_v31 = vld [vmem:[%s5994_s3 + $0x20] sm:$0xf] }
 0x1f6   :  { %v1574_v7 = vpop.f32.mrf.mxu2  ;;  %v2315_v54 = vadd.f32 %v2309_v36, %v2303_v41  ;;  %v3516_v4 = vpop.eup %3515  ;;  %v2021_v36 = vsel %vm5070_vm14, %v4959_v53, %v2017_v48  ;;  %vm2023_vm3 = vcmp.eq.f32.partialorder %v2022_v17, 8.507059e+37  ;;  %vm2143_vm4 = vcmp.eq.f32.partialorder %v2142_v25, 8.507059e+37 }
 0x1f7   :  { %v5025_v45 = vpop.eup %3517  ;;  %v5032_v23 = vmul.f32 %v3516_v4, %v2206_v8  ;;  %v1575_v34 = vadd.f32 %v1574_v7, %v4809_v52  ;;  %v2146_v18 = vsel %vm2143_vm4, %v2145_v16, %v2141_v51  ;;  %v2026_v7 = vsel %vm2023_vm3, %v2025_v40, %v2021_v36 }
 0x1f8   :  { %v5021_v35 = vpop.f32.mrf.mxu3  ;;  %3519 = vtanh.f32 %v2315_v54  ;;  %2396 = vst [vmem:[%s6000_s9 + $0x10] sm:$0xff] %v2315_v54  ;;  %v2254_v2 = vmul.f32 %v5025_v45, %v4975_v49  ;;  %v2305_v4 = vmul.f32 %v2299_v31, %v2146_v18  ;;  %vm2258_vm5 = vweird.f32 %v4975_v49 }
 0x1f9   :  { %v1611_v21 = vpop.f32.mrf.mxu0  ;;  %2388 = vst [vmem:[%s5999_s8] sm:$0xff] %v5032_v23  ;;  %vm2259_vm7 = vweird.f32 %v5025_v45  ;;  %v2264_v15 = vand.u32 2147483648, %v4975_v49  ;;  %v2262_v33 = vand.u32 2147483647, %v4975_v49 }
 0x1fa   :  { %v5034_v28 = vadd.f32 %v1611_v21, %v1573_v5  ;;  %v2255_v56 = vsub.f32 1.0, %v2254_v2  ;;  %vm5104_vm8 = vmor %vm2258_vm5, %vm2259_vm7 }
 0x1fb   :  { %3302 = vmatmul.msk.bf16.gmra.mxu2 %vm1373_vm6, %v4611_v20  ;;  %1810 = vmatmul.bf16.gmra.mxu1 %v4517_v9  ;;  %vm2263_vm9 = vcmp.eq.f32.partialorder %v2262_v33, 8.507059e+37 }
 0x1fc   :  { %1776 = vmatmul.bf16.gmra.mxu0 %v4609_v29  ;;  %v2287_v43 = vld [vmem:[#allocation3 + $0x70] sm:$0xf]  ;;  %v2256_v54 = vmul.f32 %v5025_v45, %v2255_v56 }
 0x1fd   :  { %3307 = vmatmul.msk.bf16.gmra.mxu3 %vm1373_vm6, %v4554_v6  ;;  %3521 = vtanh.f32 %v2287_v43 }
 0x1fe   :  { %v3520_v6 = vpop.eup %3519  ;;  %v1577_v37 = vpop.f32.mrf.mxu2  ;;  %v2257_v63 = vadd.f32 %v5025_v45, %v2256_v54 }
 0x1ff   :  { %v2327_v38 = vmul.f32 %v3520_v6, %v2236_v24  ;;  %v1578_v21 = vadd.f32 %v1577_v37, %v4816_v59  ;;  %v2265_v59 = vor.u32 1.1754944e-38, %v2264_v15 }
 0x200   :  { %v1689_v12 = vpop.f32.mrf.mxu3  ;;  %v2261_v49 = vsel %vm5104_vm8, %v5025_v45, %v2257_v63 }
 0x201   :  { %v1613_v41 = vpop.f32.mrf.mxu0  ;;  %2390 = vst [vmem:[%s5999_s8 + $0x10] sm:$0xff] %v2327_v38  ;;  %v2266_v48 = vsel %vm2263_vm9, %v2265_v59, %v2261_v49 }
 0x202   :  { %v5089_v27 = vadd.f32 %v1613_v41, %v1575_v34  ;;  %v3312_v34 = vmul.f32 -1.442695, %v5034_v28 }
 0x203   :  { %v3522_v52 = vpop.eup %3521 }
 0x204   :  { %v2311_v5 = vmul.f32 %v3522_v52, %v2026_v7  ;;  %v3314_v16 = vmul.f32 -1.442695, %v5089_v27 }
 0x206   :  { %v1579_v53 = vpop.f32.mrf.mxu2  ;;  %v2317_v8 = vadd.f32 %v2311_v5, %v2305_v4 }
 0x207   :  { %v1580_v29 = vadd.f32 %v1579_v53, %v4818_v11 }
 0x208   :  { %v1691_v26 = vpop.f32.mrf.mxu3  ;;  %3523 = vtanh.f32 %v2317_v8  ;;  %2398 = vst [vmem:[%s6000_s9 + $0x20] sm:$0xf] %v2317_v8  ;;  %v1650_v17 = vpop.f32.mrf.mxu1 }
 0x209   :  { %v1616_v3 = vpop.f32.mrf.mxu0  ;;  %v5111_v10 = vadd.f32 %v1689_v12, %v1650_v17 }
 0x20a   :  { %v1617_v61 = vadd.f32 %v1616_v3, %v1578_v21 }
 0x20b   :  { %3303 = vmatmul.msk.bf16.gmra.mxu2 %vm1373_vm6, %v4652_v60  ;;  %1815 = vmatmul.bf16.gmra.mxu1 %v4560_v13 }
 0x20c   :  { %1884 = vst [vmem:[#allocation3 + $0x110] sm:$0xff] %v1617_v61  ;;  %1781 = vmatmul.bf16.gmra.mxu0 %v4650_v22 }
 0x20d   :  { %3308 = vmatmul.msk.bf16.gmra.mxu3 %vm1373_vm6, %v4611_v20 }
 0x20e   :  { %v3524_v2 = vpop.eup %3523  ;;  %v1582_v0 = vpop.f32.mrf.mxu2 }
 0x20f   :  { %v2329_v25 = vmul.f32 %v3524_v2, %v2266_v48  ;;  %v1583_v22 = vadd.f32 %v1582_v0, %v4825_v39 }
 0x210   :  { %v1694_v43 = vpop.f32.mrf.mxu3  ;;  %v1652_v6 = vpop.f32.mrf.mxu1 }
 0x211   :  { %v1618_v47 = vpop.f32.mrf.mxu0  ;;  %3329 = vmatpush.msk.msrb.mxu2 %vm68_vm0, %v2329_v25  ;;  %2392 = vst [vmem:[%s5999_s8 + $0x20] sm:$0xf] %v2329_v25  ;;  %v5127_v13 = vadd.f32 %v1691_v26, %v1652_v6 }
 0x212   :  { %v1619_v9 = vadd.f32 %v1618_v47, %v1580_v29 }
 0x213   :  { %2356 = vmatpush.msrb.mxu2 %v2327_v38  ;;  %v1928_v33 = vld [vmem:[#allocation3 + $0x110] sm:$0xf] }
 0x214   :  { %v3318_v51 = vmul.f32 -1.442695, %v1619_v9  ;;  %v3316_v49 = vmul.f32 -1.442695, %v1928_v33 }
 0x215   :  { %2357 = vmatpush.msrb.mxu2 %v5032_v23 }
 0x216   :  { %v1584_v20 = vpop.f32.mrf.mxu2  ;;  %3525 = vpow2.f32 %v3318_v51 }
 0x217   :  { %v1585_v23 = vadd.f32 %v1584_v20, %v4827_v55  ;;  %3527 = vpow2.f32 %v3312_v34 }
 0x218   :  { %v1696_v11 = vpop.f32.mrf.mxu3  ;;  %v1655_v40 = vpop.f32.mrf.mxu1  ;;  %3529 = vpow2.f32 %v3314_v16 }
 0x219   :  { %v1621_v45 = vpop.f32.mrf.mxu0  ;;  %v5131_v24 = vadd.f32 %v1694_v43, %v1655_v40 }
 0x21a   :  { %v1622_v37 = vadd.f32 %v1621_v45, %v1583_v22 }
 0x21b   :  { %3304 = vmatmul.msk.bf16.gmra.mxu2 %vm1373_vm6, %v4711_v1  ;;  %1820 = vmatmul.bf16.gmra.mxu1 %v4617_v58 }
 0x21c   :  { %1786 = vmatmul.bf16.gmra.mxu0 %v4709_v19  ;;  %v3320_v38 = vmul.f32 -1.442695, %v1622_v37  ;;  %v3526_v28 = vpop.eup %3525 }
 0x21d   :  { %3309 = vmatmul.msk.bf16.gmra.mxu3 %vm1373_vm6, %v4652_v60  ;;  %v3528_v58 = vpop.eup %3527  ;;  %v5145_v55 = vadd.f32 1.0, %v3526_v28 }
 0x21e   :  { %v1587_v39 = vpop.f32.mrf.mxu2  ;;  %3531 = vpow2.f32 %v3320_v38  ;;  %v5147_v7 = vadd.f32 1.0, %v3528_v58  ;;  %v3530_v4 = vpop.eup %3529 }
 0x21f   :  { %v1588_v18 = vadd.f32 %v1587_v39, %v4841_v14  ;;  %3533 = vrcp.f32 %v5145_v55  ;;  %v5157_v8 = vadd.f32 1.0, %v3530_v4  ;;  %vm2093_vm11 = vweird.f32 %v5145_v55 }
 0x220   :  { %v1699_v12 = vpop.f32.mrf.mxu3  ;;  %v1657_v36 = vpop.f32.mrf.mxu1  ;;  %3535 = vrcp.f32 %v5147_v7  ;;  %v1979_v28 = vand.u32 2147483648, %v5147_v7  ;;  %vm1973_vm12 = vweird.f32 %v5147_v7 }
 0x221   :  { %v1623_v56 = vpop.f32.mrf.mxu0  ;;  %v5142_v19 = vadd.f32 %v1696_v11, %v1657_v36  ;;  %v1977_v36 = vand.u32 2147483647, %v5147_v7  ;;  %vm2003_vm7 = vweird.f32 %v5157_v8 }
 0x222   :  { %v1624_v41 = vadd.f32 %v1623_v56, %v1585_v23 }
 0x223   :  { %vm5229_vm15 = vcmp.eq.f32.partialorder %v1977_v36, 8.507059e+37 }
 0x224   :  { %1896 = vst [vmem:[#allocation3 + $0xa8] sm:$0xff] %v1624_v41  ;;  %v3532_v53 = vpop.eup %3531 }
 0x225   :  { %v5159_v26 = vadd.f32 1.0, %v3532_v53  ;;  %v5162_v61 = vpop.eup %3533 }
 0x226   :  { %v1589_v60 = vpop.f32.mrf.mxu2  ;;  %vm2094_vm10 = vweird.f32 %v5162_v61 }
 0x227   :  { %v1590_v63 = vadd.f32 %v1589_v60, %v4857_v30  ;;  %v2089_v30 = vmul.f32 %v5162_v61, %v5145_v55  ;;  %vm5217_vm13 = vmor %vm2093_vm11, %vm2094_vm10  ;;  %vm2123_vm4 = vweird.f32 %v5159_v26 }
 0x228   :  { %v1701_v31 = vpop.f32.mrf.mxu3  ;;  %v1660_v54 = vpop.f32.mrf.mxu1 }
 0x229   :  { %v1626_v52 = vpop.f32.mrf.mxu0  ;;  %v5149_v5 = vadd.f32 %v1699_v12, %v1660_v54  ;;  %v2090_v22 = vsub.f32 1.0, %v2089_v30 }
 0x22a   :  { %v1627_v27 = vadd.f32 %v1626_v52, %v1588_v18 }
 0x22b   :  { %1825 = vmatmul.bf16.gmra.mxu1 %v4658_v32  ;;  %v2048_v14 = vld [vmem:[#allocation3 + $0xa8] sm:$0xf]  ;;  %v2091_v12 = vmul.f32 %v5162_v61, %v2090_v22 }
 0x22c   :  { %1791 = vmatmul.bf16.gmra.mxu0 %v4738_v50  ;;  %v3324_v15 = vmul.f32 -1.442695, %v1627_v27  ;;  %v3322_v3 = vmul.f32 -1.442695, %v2048_v14 }
 0x22d   :  { %3310 = vmatmul.msk.bf16.gmra.mxu3 %vm1373_vm6, %v4711_v1  ;;  %v5165_v1 = vpop.eup %3535  ;;  %v2092_v54 = vadd.f32 %v5162_v61, %v2091_v12 }
 0x22e   :  { %v1592_v21 = vpop.f32.mrf.mxu2  ;;  %3537 = vpow2.f32 %v3324_v15  ;;  %v1969_v48 = vmul.f32 %v5165_v1, %v5147_v7  ;;  %vm1974_vm6 = vweird.f32 %v5165_v1 }
 0x22f   :  { %3539 = vrcp.f32 %v5157_v8  ;;  %v1593_v47 = vadd.f32 %v1592_v21, %v4880_v62  ;;  %vm5225_vm14 = vmor %vm1973_vm12, %vm1974_vm6  ;;  %v2096_v7 = vsel %vm5217_vm13, %v5162_v61, %v2092_v54 }
 0x230   :  { %v1704_v50 = vpop.f32.mrf.mxu3  ;;  %v1662_v17 = vpop.f32.mrf.mxu1  ;;  %3541 = vrcp.f32 %v5159_v26  ;;  %v1970_v37 = vsub.f32 1.0, %v1969_v48 }
 0x231   :  { %v1628_v42 = vpop.f32.mrf.mxu0  ;;  %v5167_v59 = vadd.f32 %v1701_v31, %v1662_v17  ;;  %3543 = vpow2.f32 %v3322_v3  ;;  %v2298_v17 = vld [vmem:[%s5994_s3 + $0x18] sm:$0xff] }
 0x232   :  { %v1629_v32 = vadd.f32 %v1628_v42, %v1590_v63  ;;  %v1971_v56 = vmul.f32 %v5165_v1, %v1970_v37  ;;  %v2097_v63 = vand.u32 2147483647, %v5145_v55 }
 0x234   :  { %v3326_v2 = vmul.f32 -1.442695, %v1629_v32  ;;  %v3538_v0 = vpop.eup %3537  ;;  %v1972_v15 = vadd.f32 %v5165_v1, %v1971_v56  ;;  %vm2098_vm1 = vcmp.eq.f32.partialorder %v2097_v63, 8.507059e+37 }
 0x235   :  { %v5174_v29 = vadd.f32 1.0, %v3538_v0  ;;  %v5176_v43 = vpop.eup %3539 }
 0x236   :  { %3545 = vpow2.f32 %v3326_v2  ;;  %v1594_v25 = vpop.f32.mrf.mxu2  ;;  %v5179_v6 = vpop.eup %3541  ;;  %v1999_v39 = vmul.f32 %v5176_v43, %v5157_v8  ;;  %v1980_v2 = vor.u32 1.1754944e-38, %v1979_v28  ;;  %vm2004_vm3 = vweird.f32 %v5176_v43 }
 0x237   :  { %3547 = vpow2.f32 %v3316_v49  ;;  %v3544_v40 = vpop.eup %3543  ;;  %v2119_v62 = vmul.f32 %v5179_v6, %v5159_v26  ;;  %v1595_v60 = vadd.f32 %v1594_v25, %v4925_v44  ;;  %v2099_v44 = vand.u32 2147483648, %v5145_v55  ;;  %vm5287_vm9 = vmor %vm2003_vm7, %vm2004_vm3 }
 0x238   :  { %v1706_v9 = vpop.f32.mrf.mxu3  ;;  %v1665_v45 = vpop.f32.mrf.mxu1  ;;  %3549 = vrcp.f32 %v5174_v29  ;;  %v5193_v38 = vadd.f32 1.0, %v3544_v40  ;;  %v1976_v49 = vsel %vm5225_vm14, %v5165_v1, %v1972_v15  ;;  %v2007_v25 = vand.u32 2147483647, %v5157_v8  ;;  %v2296_v1 = vld [vmem:[%s5994_s3 + $0x8] sm:$0xff] }
 0x239   :  { %v1631_v20 = vpop.f32.mrf.mxu0  ;;  %v5182_v51 = vadd.f32 %v1704_v50, %v1665_v45  ;;  %v2120_v31 = vsub.f32 1.0, %v2119_v62  ;;  %v2100_v0 = vor.u32 1.1754944e-38, %v2099_v44  ;;  %vm2124_vm2 = vweird.f32 %v5179_v6 }
 0x23a   :  { %v1632_v11 = vadd.f32 %v1631_v20, %v1593_v47  ;;  %v2009_v47 = vand.u32 2147483648, %v5157_v8  ;;  %vm5266_vm5 = vmor %vm2123_vm4, %vm2124_vm2  ;;  %vm5272_vm8 = vcmp.eq.f32.partialorder %v2007_v25, 8.507059e+37  ;;  %vm2213_vm11 = vweird.f32 %v5174_v29 }
 0x23b   :  { %1830 = vmatmul.bf16.gmra.mxu1 %v4717_v57  ;;  %v2000_v57 = vsub.f32 1.0, %v1999_v39  ;;  %v2121_v3 = vmul.f32 %v5179_v6, %v2120_v31  ;;  %vm2153_vm4 = vweird.f32 %v5193_v38 }
 0x23c   :  { %v3546_v34 = vpop.eup %3545  ;;  %1908 = vst [vmem:[#allocation3 + $0xc8] sm:$0xff] %v1632_v11  ;;  %v2101_v11 = vsel %vm2098_vm1, %v2100_v0, %v2096_v7 }
 0x23d   :  { %v5189_v23 = vadd.f32 1.0, %v3546_v34  ;;  %v3548_v16 = vpop.eup %3547  ;;  %v2001_v32 = vmul.f32 %v5176_v43, %v2000_v57  ;;  %v2122_v61 = vadd.f32 %v5179_v6, %v2121_v3  ;;  %v2129_v34 = vand.u32 2147483648, %v5159_v26 }
 0x23e   :  { %v1597_v41 = vpop.f32.mrf.mxu2  ;;  %v5197_v58 = vpop.eup %3549  ;;  %v5201_v52 = vadd.f32 1.0, %v3548_v16  ;;  %v2127_v16 = vand.u32 2147483647, %v5159_v26  ;;  %v2302_v57 = vmul.f32 %v2296_v1, %v2101_v11 }
 0x23f   :  { %3551 = vrcp.f32 %v5189_v23  ;;  %v2209_v50 = vmul.f32 %v5197_v58, %v5174_v29  ;;  %v1598_v20 = vadd.f32 %v1597_v41, %v4986_v46  ;;  %v2002_v40 = vadd.f32 %v5176_v43, %v2001_v32 }
 0x240   :  { %v1709_v18 = vpop.f32.mrf.mxu3  ;;  %v1667_v53 = vpop.f32.mrf.mxu1  ;;  %3553 = vrcp.f32 %v5193_v38  ;;  %v1981_v46 = vsel %vm5229_vm15, %v1980_v2, %v1976_v49  ;;  %vm2128_vm6 = vcmp.eq.f32.partialorder %v2127_v16, 8.507059e+37  ;;  %vm2214_vm10 = vweird.f32 %v5197_v58 }
 0x241   :  { %v1633_v27 = vpop.f32.mrf.mxu0  ;;  %v5210_v14 = vadd.f32 %v1706_v9, %v1667_v53  ;;  %v2210_v9 = vsub.f32 1.0, %v2209_v50  ;;  %v2130_v53 = vor.u32 1.1754944e-38, %v2129_v34  ;;  %v2006_v50 = vsel %vm5287_vm9, %v5176_v43, %v2002_v40  ;;  %vm2215_vm12 = vmor %vm2213_vm11, %vm2214_vm10 }
 0x242   :  { %v1634_v4 = vadd.f32 %v1633_v27, %v1595_v60  ;;  %v2219_v43 = vand.u32 2147483648, %v5174_v29  ;;  %v2217_v2 = vand.u32 2147483647, %v5174_v29  ;;  %vm2243_vm15 = vweird.f32 %v5189_v23 }
 0x243   :  { %v2168_v21 = vld [vmem:[#allocation3 + $0xc8] sm:$0xf]  ;;  %v2211_v60 = vmul.f32 %v5197_v58, %v2210_v9  ;;  %v2247_v28 = vand.u32 2147483647, %v5189_v23  ;;  %v2039_v8 = vand.u32 2147483648, %v5201_v52 }
 0x244   :  { %v3328_v33 = vmul.f32 -1.442695, %v2168_v21  ;;  %3555 = vtanh.f32 %v1634_v4  ;;  %v2010_v21 = vor.u32 1.1754944e-38, %v2009_v47  ;;  %v2220_v29 = vor.u32 1.1754944e-38, %v2219_v43 }
 0x245   :  { %3557 = vrcp.f32 %v5201_v52  ;;  %v5239_v30 = vpop.eup %3551  ;;  %v2212_v3 = vadd.f32 %v5197_v58, %v2211_v60  ;;  %vm2218_vm13 = vcmp.eq.f32.partialorder %v2217_v2, 8.507059e+37  ;;  %vm2248_vm7 = vcmp.eq.f32.partialorder %v2247_v28, 8.507059e+37 }
 0x246   :  { %3559 = vpow2.f32 %v3328_v33  ;;  %v1599_v48 = vpop.f32.mrf.mxu2  ;;  %v5249_v45 = vpop.eup %3553  ;;  %v2239_v56 = vmul.f32 %v5239_v30, %v5189_v23  ;;  %v2011_v25 = vsel %vm5272_vm8, %v2010_v21, %v2006_v50  ;;  %vm2244_vm14 = vweird.f32 %v5239_v30 }
 0x247   :  { %v2149_v54 = vmul.f32 %v5249_v45, %v5193_v38  ;;  %v1600_v42 = vadd.f32 %v1599_v48, %v5021_v35  ;;  %v2216_v11 = vsel %vm2215_vm12, %v5197_v58, %v2212_v3  ;;  %vm2154_vm2 = vweird.f32 %v5249_v45  ;;  %vm5342_vm3 = vmor %vm2243_vm15, %vm2244_vm14 }
 0x248   :  { %v1711_v22 = vpop.f32.mrf.mxu3  ;;  %v1670_v12 = vpop.f32.mrf.mxu1  ;;  %vm2033_vm8 = vweird.f32 %v5201_v52 }
 0x249   :  { %v1636_v37 = vpop.f32.mrf.mxu0  ;;  %v5262_v36 = vadd.f32 %v1709_v18, %v1670_v12  ;;  %v2126_v18 = vsel %vm5266_vm5, %v5179_v6, %v2122_v61  ;;  %v2240_v6 = vsub.f32 1.0, %v2239_v56  ;;  %v2150_v49 = vsub.f32 1.0, %v2149_v54  ;;  %vm5362_vm5 = vmor %vm2153_vm4, %vm2154_vm2 }
 0x24a   :  { %v3556_v39 = vpop.eup %3555  ;;  %v1637_v62 = vadd.f32 %v1636_v37, %v1598_v20  ;;  %v2131_v33 = vsel %vm2128_vm6, %v2130_v53, %v2126_v18  ;;  %v2249_v12 = vand.u32 2147483648, %v5189_v23  ;;  %v2157_v53 = vand.u32 2147483647, %v5193_v38 }
 0x24b   :  { %v5260_v41 = vpop.eup %3557  ;;  %v2308_v31 = vmul.f32 %v3556_v39, %v1981_v46  ;;  %v2241_v47 = vmul.f32 %v5239_v30, %v2240_v6  ;;  %v2304_v20 = vmul.f32 %v2298_v17, %v2131_v33  ;;  %v2151_v1 = vmul.f32 %v5249_v45, %v2150_v49  ;;  %v2300_v49 = vld [vmem:[%s5994_s3 + $0x28] sm:$0xf] }
 0x24c   :  { %v3560_v27 = vpop.eup %3559  ;;  %3561 = vtanh.f32 %v1637_v62  ;;  %v2029_v44 = vmul.f32 %v5260_v41, %v5201_v52  ;;  %v2221_v39 = vsel %vm2218_vm13, %v2220_v29, %v2216_v11  ;;  %vm2034_vm1 = vweird.f32 %v5260_v41 }
 0x24d   :  { %v5281_v4 = vadd.f32 1.0, %v3560_v27  ;;  %v2314_v15 = vadd.f32 %v2308_v31, %v2302_v57  ;;  %v2242_v46 = vadd.f32 %v5239_v30, %v2241_v47  ;;  %v2152_v57 = vadd.f32 %v5249_v45, %v2151_v1  ;;  %vm5373_vm9 = vmor %vm2033_vm8, %vm2034_vm1 }
 0x24e   :  { %v1728_v63 = vpop.f32.mrf.mxu2  ;;  %v2030_v48 = vsub.f32 1.0, %v2029_v44  ;;  %v2159_v27 = vand.u32 2147483648, %v5193_v38  ;;  %v2250_v44 = vor.u32 1.1754944e-38, %v2249_v12  ;;  %vm2158_vm6 = vcmp.eq.f32.partialorder %v2157_v53, 8.507059e+37 }
 0x24f   :  { %2395 = vst [vmem:[%s6000_s9 + $0x8] sm:$0xff] %v2314_v15  ;;  %v5301_v32 = vadd.f32 %v1728_v63, %v5111_v10  ;;  %3563 = vtanh.f32 %v2314_v15  ;;  %v2246_v18 = vsel %vm5342_vm3, %v5239_v30, %v2242_v46  ;;  %v2037_v30 = vand.u32 2147483647, %v5201_v52 }
 0x250   :  { %v1714_v55 = vpop.f32.mrf.mxu3  ;;  %3565 = vrcp.f32 %v5281_v4  ;;  %v1672_v10 = vpop.f32.mrf.mxu1  ;;  %v2031_v34 = vmul.f32 %v5260_v41, %v2030_v48  ;;  %v2156_v63 = vsel %vm5362_vm5, %v5249_v45, %v2152_v57  ;;  %v2251_v38 = vsel %vm2248_vm7, %v2250_v44, %v2246_v18 }
 0x251   :  { %v1638_v7 = vpop.f32.mrf.mxu0  ;;  %v5315_v9 = vadd.f32 %v1711_v22, %v1672_v10  ;;  %v2160_v33 = vor.u32 1.1754944e-38, %v2159_v27  ;;  %v2040_v45 = vor.u32 1.1754944e-38, %v2039_v8  ;;  %vm2038_vm10 = vcmp.eq.f32.partialorder %v2037_v30, 8.507059e+37 }
 0x252   :  { %v3562_v35 = vpop.eup %3561  ;;  %v1639_v0 = vadd.f32 %v1638_v7, %v1600_v42  ;;  %v2032_v23 = vadd.f32 %v5260_v41, %v2031_v34  ;;  %v2279_v29 = vand.u32 2147483648, %v5281_v4  ;;  %vm2273_vm12 = vweird.f32 %v5281_v4 }
 0x253   :  { %v2310_v61 = vmul.f32 %v3562_v35, %v2011_v25  ;;  %v2161_v7 = vsel %vm2158_vm6, %v2160_v33, %v2156_v63 }
 0x254   :  { %1920 = vst [vmem:[#allocation3 + $0x30] sm:$0xff] %v1639_v0  ;;  %v2036_v17 = vsel %vm5373_vm9, %v5260_v41, %v2032_v23  ;;  %v3333_v0 = vmul.f32 -1.442695, %v5301_v32  ;;  %v2306_v25 = vmul.f32 %v2300_v49, %v2161_v7 }
 0x255   :  { %v2316_v37 = vadd.f32 %v2310_v61, %v2304_v20  ;;  %v3564_v40 = vpop.eup %3563  ;;  %v2041_v10 = vsel %vm2038_vm10, %v2040_v45, %v2036_v17 }
 0x256   :  { %v5322_v22 = vpop.eup %3565  ;;  %v1730_v62 = vpop.f32.mrf.mxu2  ;;  %v5328_v58 = vmul.f32 %v3564_v40, %v2221_v39 }
 0x257   :  { %3567 = vtanh.f32 %v2316_v37  ;;  %2397 = vst [vmem:[%s6000_s9 + $0x18] sm:$0xff] %v2316_v37  ;;  %v5331_v16 = vadd.f32 %v1730_v62, %v5127_v13  ;;  %v2269_v26 = vmul.f32 %v5322_v22, %v5281_v4  ;;  %vm2274_vm11 = vweird.f32 %v5322_v22 }
 0x258   :  { %v1716_v56 = vpop.f32.mrf.mxu3  ;;  %2389 = vst [vmem:[%s5999_s8 + $0x8] sm:$0xff] %v5328_v58  ;;  %v1675_v13 = vpop.f32.mrf.mxu1  ;;  %v2277_v37 = vand.u32 2147483647, %v5281_v4  ;;  %vm2275_vm13 = vmor %vm2273_vm12, %vm2274_vm11 }
 0x259   :  { %v5335_v60 = vpop.f32.mrf.mxu0  ;;  %v5357_v54 = vadd.f32 %v1714_v55, %v1675_v13  ;;  %v2270_v3 = vsub.f32 1.0, %v2269_v26  ;;  %v3335_v40 = vmul.f32 -1.442695, %v5331_v16 }
 0x25a   :  { %vm2278_vm14 = vcmp.eq.f32.partialorder %v2277_v37, 8.507059e+37 }
 0x25b   :  { %v2288_v15 = vld [vmem:[#allocation3 + $0x30] sm:$0xf] }
 0x25c   :  { %3569 = vtanh.f32 %v2288_v15 }
 0x25d   :  { %v3568_v6 = vpop.eup %3567  ;;  %3571 = vpow2.f32 %v3333_v0 }
 0x25e   :  { %v2328_v42 = vmul.f32 %v3568_v6, %v2251_v38  ;;  %v1733_v55 = vpop.f32.mrf.mxu2 }
 0x25f   :  { %v1734_v52 = vadd.f32 %v1733_v55, %v5131_v24  ;;  %v2271_v24 = vmul.f32 %v5322_v22, %v2270_v3 }
 0x260   :  { %v1845_v43 = vpop.f32.mrf.mxu3  ;;  %2391 = vst [vmem:[%s5999_s8 + $0x18] sm:$0xff] %v2328_v42  ;;  %v1677_v41 = vpop.f32.mrf.mxu1 }
 0x261   :  { %v1769_v2 = vpop.f32.mrf.mxu0  ;;  %1885 = vst [vmem:[#allocation3 + $0x90] sm:$0xff] %v1734_v52  ;;  %v5389_v48 = vadd.f32 %v1716_v56, %v1677_v41  ;;  %v2272_v61 = vadd.f32 %v5322_v22, %v2271_v24  ;;  %v2280_v56 = vor.u32 1.1754944e-38, %v2279_v29 }
 0x262   :  { %v3570_v35 = vpop.eup %3569 }
 0x263   :  { %v2312_v47 = vmul.f32 %v3570_v35, %v2041_v10  ;;  %v2276_v39 = vsel %vm2275_vm13, %v5322_v22, %v2272_v61  ;;  %v3572_v28 = vpop.eup %3571 }
 0x264   :  { %v2281_v31 = vsel %vm2278_vm14, %v2280_v56, %v2276_v39 }
 0x265   :  { %v2318_v20 = vadd.f32 %v2312_v47, %v2306_v25 }
 0x266   :  { %v1735_v11 = vpop.f32.mrf.mxu2 }
 0x267   :  { %3573 = vtanh.f32 %v2318_v20  ;;  %2399 = vst [vmem:[%s6000_s9 + $0x28] sm:$0xf] %v2318_v20  ;;  %v1736_v32 = vadd.f32 %v1735_v11, %v5142_v19 }
 0x268   :  { %v1847_v1 = vpop.f32.mrf.mxu3  ;;  %v1806_v46 = vpop.f32.mrf.mxu1  ;;  %v2404_v62 = vld [vmem:[#allocation3 + $0x90] sm:$0xf]  ;;  %3575 = vpow2.f32 %v3335_v40 }
 0x269   :  { %v1772_v34 = vpop.f32.mrf.mxu0  ;;  %v1807_v12 = vadd.f32 %v1806_v46, %v5335_v60  ;;  %v3337_v13 = vmul.f32 -1.442695, %v2404_v62  ;;  %v3339_v4 = vmul.f32 -1.442695, %v1736_v32  ;;  %v5408_v60 = vadd.f32 1.0, %v3572_v28 }
 0x26b   :  { %v1846_v19 = vadd.f32 %v1845_v43, %v1807_v12  ;;  %3577 = vpow2.f32 %v3337_v13  ;;  %v2439_v46 = vand.u32 2147483647, %v5408_v60  ;;  %v2441_v39 = vand.u32 2147483648, %v5408_v60 }
 0x26c   :  { %3579 = vpow2.f32 %v3339_v4  ;;  %vm2435_vm1 = vweird.f32 %v5408_v60 }
 0x26d   :  { %v3574_v57 = vpop.eup %3573  ;;  %1878 = vst [vmem:[#allocation3 + $0x48] sm:$0xff] %v1846_v19  ;;  %3581 = vrcp.f32 %v5408_v60  ;;  %vm5462_vm3 = vcmp.eq.f32.partialorder %v2439_v46, 8.507059e+37 }
 0x26e   :  { %v2330_v23 = vmul.f32 %v3574_v57, %v2281_v31  ;;  %v1738_v16 = vpop.f32.mrf.mxu2  ;;  %v3576_v53 = vpop.eup %3575 }
 0x26f   :  { %v1739_v27 = vadd.f32 %v1738_v16, %v5149_v5  ;;  %v5412_v8 = vadd.f32 1.0, %v3576_v53  ;;  %v2442_v53 = vor.u32 1.1754944e-38, %v2441_v39 }
 0x270   :  { %3331 = vmatpush.msk.msra.mxu2 %vm68_vm0, %v2330_v23  ;;  %2393 = vst [vmem:[%s5999_s8 + $0x28] sm:$0xf] %v2330_v23  ;;  %v1850_v22 = vpop.f32.mrf.mxu3  ;;  %v1808_v26 = vpop.f32.mrf.mxu1 }
 0x271   :  { %v1774_v18 = vpop.f32.mrf.mxu0  ;;  %v3341_v15 = vmul.f32 -1.442695, %v1739_v27  ;;  %v1809_v44 = vadd.f32 %v1808_v26, %v1769_v2  ;;  %v3578_v6 = vpop.eup %3577  ;;  %v2469_v31 = vand.u32 2147483647, %v5412_v8  ;;  %v2471_v27 = vand.u32 2147483648, %v5412_v8 }
 0x272   :  { %2376 = vmatpush.msra.mxu2 %v2328_v42  ;;  %v3580_v38 = vpop.eup %3579  ;;  %v5418_v3 = vadd.f32 1.0, %v3578_v6  ;;  %vm2465_vm4 = vweird.f32 %v5412_v8 }
 0x273   :  { %v1848_v5 = vadd.f32 %v1847_v1, %v1809_v44  ;;  %3583 = vpow2.f32 %v3341_v15  ;;  %v5415_v50 = vpop.eup %3581  ;;  %v5420_v55 = vadd.f32 1.0, %v3580_v38  ;;  %vm5472_vm5 = vcmp.eq.f32.partialorder %v2469_v31, 8.507059e+37  ;;  %v3353_v31 = vld [vmem:[%s5994_s3 + $0x40] sm:$0xff] }
 0x274   :  { %2377 = vmatpush.msra.mxu2 %v5328_v58  ;;  %3585 = vrcp.f32 %v5412_v8  ;;  %v2431_v43 = vmul.f32 %v5415_v50, %v5408_v60  ;;  %v2401_v62 = vld [vmem:[#allocation3 + $0x48] sm:$0xff]  ;;  %vm2436_vm15 = vweird.f32 %v5415_v50  ;;  %vm2495_vm8 = vweird.f32 %v5418_v3 }
 0x275   :  { %3587 = vrcp.f32 %v5418_v3  ;;  %v3336_v45 = vmul.f32 -1.442695, %v1848_v5  ;;  %vm5458_vm2 = vmor %vm2435_vm1, %vm2436_vm15  ;;  %vm2555_vm13 = vweird.f32 %v5420_v55 }
 0x276   :  { %v1740_v21 = vpop.f32.mrf.mxu2  ;;  %3589 = vrcp.f32 %v5420_v55  ;;  %v2432_v41 = vsub.f32 1.0, %v2431_v43 }
 0x277   :  { %v1741_v30 = vadd.f32 %v1740_v21, %v5167_v59  ;;  %3591 = vpow2.f32 %v3336_v45 }
 0x278   :  { %v1852_v63 = vpop.f32.mrf.mxu3  ;;  %v1811_v33 = vpop.f32.mrf.mxu1  ;;  %v2433_v11 = vmul.f32 %v5415_v50, %v2432_v41  ;;  %v2501_v41 = vand.u32 2147483648, %v5418_v3 }
 0x279   :  { %1897 = vst [vmem:[#allocation3 + $0xb8] sm:$0xff] %v1741_v30  ;;  %v1812_v58 = vadd.f32 %v1811_v33, %v1772_v34  ;;  %v1777_v42 = vpop.f32.mrf.mxu0  ;;  %v3584_v17 = vpop.eup %3583 }
 0x27a   :  { %v5425_v7 = vpop.eup %3585  ;;  %v5428_v35 = vadd.f32 1.0, %v3584_v17  ;;  %v2434_v28 = vadd.f32 %v5415_v50, %v2433_v11 }
 0x27b   :  { %v1851_v52 = vadd.f32 %v1850_v22, %v1812_v58  ;;  %v2461_v47 = vmul.f32 %v5425_v7, %v5412_v8  ;;  %v5434_v61 = vpop.eup %3587  ;;  %v3334_v22 = vmul.f32 -1.442695, %v2401_v62  ;;  %vm2466_vm7 = vweird.f32 %v5425_v7 }
 0x27c   :  { %3593 = vrcp.f32 %v5428_v35  ;;  %v5439_v29 = vpop.eup %3589  ;;  %v2491_v56 = vmul.f32 %v5434_v61, %v5418_v3  ;;  %v2438_v5 = vsel %vm5458_vm2, %v5415_v50, %v2434_v28  ;;  %vm5501_vm9 = vmor %vm2465_vm4, %vm2466_vm7  ;;  %vm2496_vm6 = vweird.f32 %v5434_v61 }
 0x27d   :  { %1886 = vst [vmem:[#allocation3 + $0x118] sm:$0xff] %v1851_v52  ;;  %v2462_v37 = vsub.f32 1.0, %v2461_v47  ;;  %v3592_v12 = vpop.eup %3591  ;;  %v2551_v57 = vmul.f32 %v5439_v29, %v5420_v55  ;;  %v2499_v52 = vand.u32 2147483647, %v5418_v3  ;;  %v5486_v43 = vsel %vm5462_vm3, %v2442_v53, %v2438_v5  ;;  %vm5534_vm12 = vmor %vm2495_vm8, %vm2496_vm6 }
 0x27e   :  { %v1743_v59 = vpop.f32.mrf.mxu2  ;;  %v2492_v44 = vsub.f32 1.0, %v2491_v56  ;;  %v5478_v38 = vadd.f32 1.0, %v3592_v12  ;;  %vm2556_vm11 = vweird.f32 %v5439_v29  ;;  %v2502_v12 = vor.u32 1.1754944e-38, %v2501_v41 }
 0x27f   :  { %v1744_v49 = vadd.f32 %v1743_v59, %v5182_v51  ;;  %v2463_v16 = vmul.f32 %v5425_v7, %v2462_v37  ;;  %v2552_v21 = vsub.f32 1.0, %v2551_v57  ;;  %vm5513_vm10 = vcmp.eq.f32.partialorder %v2499_v52, 8.507059e+37  ;;  %vm5551_vm15 = vmor %vm2555_vm13, %vm2556_vm11 }
 0x280   :  { %v1855_v2 = vpop.f32.mrf.mxu3  ;;  %v2524_v0 = vld [vmem:[#allocation3 + $0xb8] sm:$0xf]  ;;  %v1813_v10 = vpop.f32.mrf.mxu1  ;;  %v2493_v45 = vmul.f32 %v5434_v61, %v2492_v44  ;;  %v2561_v37 = vand.u32 2147483648, %v5420_v55  ;;  %v2591_v3 = vand.u32 2147483648, %v5428_v35  ;;  %vm2585_vm2 = vweird.f32 %v5428_v35 }
 0x281   :  { %v3345_v24 = vmul.f32 -1.442695, %v1744_v49  ;;  %v1814_v25 = vadd.f32 %v1813_v10, %v1774_v18  ;;  %v3343_v20 = vmul.f32 -1.442695, %v2524_v0  ;;  %v1779_v32 = vpop.f32.mrf.mxu0  ;;  %v2464_v58 = vadd.f32 %v5425_v7, %v2463_v16 }
 0x282   :  { %v5452_v19 = vpop.eup %3593  ;;  %v2553_v49 = vmul.f32 %v5439_v29, %v2552_v21  ;;  %v2562_v16 = vor.u32 1.1754944e-38, %v2561_v37  ;;  %vm2332_vm6 = vcmask 162816  }
 0x283   :  { %v5436_v51 = vadd.f32 %v1852_v63, %v1814_v25  ;;  %3595 = vpow2.f32 %v3345_v24  ;;  %v2581_v63 = vmul.f32 %v5452_v19, %v5428_v35  ;;  %vm2586_vm1 = vweird.f32 %v5452_v19 }
 0x284   :  { %3597 = vpow2.f32 %v3343_v20  ;;  %v2468_v20 = vsel %vm5501_vm9, %v5425_v7, %v2464_v58  ;;  %v2494_v7 = vadd.f32 %v5434_v61, %v2493_v45  ;;  %v2554_v46 = vadd.f32 %v5439_v29, %v2553_v49  ;;  %v2405_v62 = vld [vmem:[#allocation3 + $0x118] sm:$0xf]  ;;  %vm5593_vm4 = vmor %vm2585_vm2, %vm2586_vm1 }
 0x285   :  { %v2582_v24 = vsub.f32 1.0, %v2581_v63  ;;  %v3340_v37 = vmul.f32 -1.442695, %v5436_v51  ;;  %vm2480_vm9 = vweird.f32 %v5478_v38 }
 0x286   :  { %v1745_v1 = vpop.f32.mrf.mxu2 }
 0x287   :  { %v1746_v40 = vadd.f32 %v1745_v1, %v5210_v14  ;;  %v2559_v1 = vand.u32 2147483647, %v5420_v55  ;;  %v2583_v28 = vmul.f32 %v5452_v19, %v2582_v24  ;;  %v3338_v55 = vmul.f32 -1.442695, %v2405_v62 }
 0x288   :  { %v5442_v34 = vpop.f32.mrf.mxu3  ;;  %v1816_v14 = vpop.f32.mrf.mxu1 }
 0x289   :  { %v3347_v13 = vmul.f32 -1.442695, %v1746_v40  ;;  %v3596_v23 = vpop.eup %3595  ;;  %v1817_v4 = vadd.f32 %v1816_v14, %v1777_v42  ;;  %v2472_v42 = vor.u32 1.1754944e-38, %v2471_v27  ;;  %v1782_v17 = vpop.f32.mrf.mxu0  ;;  %v2589_v14 = vand.u32 2147483647, %v5428_v35 }
 0x28a   :  { %v5466_v15 = vadd.f32 1.0, %v3596_v23  ;;  %v3598_v6 = vpop.eup %3597  ;;  %vm5541_vm14 = vcmp.eq.f32.partialorder %v2559_v1, 8.507059e+37  ;;  %v2584_v5 = vadd.f32 %v5452_v19, %v2583_v28  ;;  %v2484_v35 = vand.u32 2147483647, %v5478_v38 }
 0x28b   :  { %3599 = vpow2.f32 %v3347_v13  ;;  %v1856_v60 = vadd.f32 %v1855_v2, %v1817_v4  ;;  %v5489_v59 = vadd.f32 1.0, %v3598_v6  ;;  %v5527_v56 = vsel %vm5472_vm5, %v2472_v42, %v2468_v20  ;;  %v3351_v42 = vld [vmem:[%s5994_s3 + $0x30] sm:$0xff] }
 0x28c   :  { %3601 = vpow2.f32 %v3334_v22  ;;  %v2498_v22 = vsel %vm5534_vm12, %v5434_v61, %v2494_v7  ;;  %vm5570_vm3 = vcmp.eq.f32.partialorder %v2589_v14, 8.507059e+37  ;;  %v2679_v7 = vand.u32 2147483647, %v5466_v15 }
 0x28d   :  { %3603 = vrcp.f32 %v5466_v15  ;;  %v3342_v25 = vmul.f32 -1.442695, %v1856_v60  ;;  %v5589_v52 = vsel %vm5513_vm10, %v2502_v12, %v2498_v22  ;;  %v2621_v8 = vand.u32 2147483648, %v5489_v59 }
 0x28e   :  { %v1748_v33 = vpop.f32.mrf.mxu2  ;;  %3605 = vrcp.f32 %v5478_v38  ;;  %vm2675_vm5 = vweird.f32 %v5466_v15  ;;  %vm5642_vm10 = vcmp.eq.f32.partialorder %v2679_v7, 8.507059e+37  ;;  %vm2615_vm2 = vweird.f32 %v5489_v59 }
 0x28f   :  { %v1749_v50 = vadd.f32 %v1748_v33, %v5262_v36  ;;  %3607 = vrcp.f32 %v5489_v59  ;;  %v2592_v33 = vor.u32 1.1754944e-38, %v2591_v3 }
 0x290   :  { %v1818_v36 = vpop.f32.mrf.mxu1  ;;  %v5494_v0 = vpop.f32.mrf.mxu3  ;;  %3609 = vpow2.f32 %v3342_v25 }
 0x291   :  { %v3600_v2 = vpop.eup %3599  ;;  %1909 = vst [vmem:[#allocation3 + $0x28] sm:$0xff] %v1749_v50  ;;  %v1819_v47 = vadd.f32 %v1818_v36, %v1779_v32  ;;  %v1784_v53 = vpop.f32.mrf.mxu0  ;;  %v2588_v36 = vsel %vm5593_vm4, %v5452_v19, %v2584_v5  ;;  %v2331_v5 = vld [vmem:[%s5997_s6] sm:$0xf] }
 0x292   :  { %v5509_v11 = vadd.f32 1.0, %v3600_v2  ;;  %v3602_v40 = vpop.eup %3601  ;;  %3330 = vmatmul.msk.f32.vlgmr.msrb.gmra.mxu2 %vm2332_vm6, %v2331_v5 }
 0x293   :  { %v1858_v32 = vadd.f32 %v5442_v34, %v1819_v47  ;;  %v5523_v39 = vpop.eup %3603  ;;  %v5555_v27 = vadd.f32 1.0, %v3602_v40  ;;  %v2593_v40 = vsel %vm5570_vm3, %v2592_v33, %v2588_v36 }
 0x294   :  { %3611 = vrcp.f32 %v5509_v11  ;;  %v5545_v13 = vpop.eup %3605  ;;  %v2671_v18 = vmul.f32 %v5523_v39, %v5466_v15  ;;  %vm2676_vm8 = vweird.f32 %v5523_v39  ;;  %v2709_v36 = vand.u32 2147483647, %v5509_v11 }
 0x295   :  { %1898 = vst [vmem:[#allocation3 + $0x168] sm:$0xff] %v1858_v32  ;;  %v5567_v21 = vpop.eup %3607  ;;  %v2454_v47 = vand.u32 2147483647, %v5555_v27  ;;  %vm2481_vm7 = vweird.f32 %v5545_v13  ;;  %vm5654_vm11 = vmor %vm2675_vm5, %vm2676_vm8 }
 0x296   :  { %v1750_v57 = vpop.f32.mrf.mxu2  ;;  %v3610_v30 = vpop.eup %3609  ;;  %v2672_v49 = vsub.f32 1.0, %v2671_v18  ;;  %v2611_v2 = vmul.f32 %v5567_v21, %v5489_v59  ;;  %vm2616_vm12 = vweird.f32 %v5567_v21  ;;  %vm5696_vm1 = vmor %vm2480_vm9, %vm2481_vm7  ;;  %vm5730_vm5 = vcmp.eq.f32.partialorder %v2709_v36, 8.507059e+37 }
 0x297   :  { %v1751_v23 = vadd.f32 %v1750_v57, %v5315_v9  ;;  %v2558_v9 = vsel %vm5551_vm15, %v5439_v29, %v2554_v46  ;;  %v5576_v29 = vmul.f32 %v5545_v13, %v5478_v38  ;;  %v5605_v25 = vadd.f32 1.0, %v3610_v30  ;;  %vm5721_vm4 = vmor %vm2615_vm2, %vm2616_vm12 }
 0x298   :  { %v2644_v26 = vld [vmem:[#allocation3 + $0x28] sm:$0xf]  ;;  %v1821_v60 = vpop.f32.mrf.mxu1  ;;  %v1862_v63 = vpop.f32.mrf.mxu3  ;;  %v2563_v58 = vsel %vm5541_vm14, %v2562_v16, %v2558_v9  ;;  %v2673_v32 = vmul.f32 %v5523_v39, %v2672_v49  ;;  %v2681_v57 = vand.u32 2147483648, %v5466_v15  ;;  %vm5687_vm14 = vcmp.eq.f32.partialorder %v2484_v35, 8.507059e+37 }
 0x299   :  { %v3349_v44 = vmul.f32 -1.442695, %v2644_v26  ;;  %3613 = vtanh.f32 %v1751_v23  ;;  %v1822_v6 = vadd.f32 %v1821_v60, %v1782_v17  ;;  %v2779_v10 = vmul.f32 %v3351_v42, %v2563_v58  ;;  %v1787_v3 = vpop.f32.mrf.mxu0 }
 0x29a   :  { %v5584_v50 = vpop.eup %3611  ;;  %v2477_v24 = vsub.f32 1.0, %v5576_v29  ;;  %v2674_v26 = vadd.f32 %v5523_v39, %v2673_v32  ;;  %v2682_v61 = vor.u32 1.1754944e-38, %v2681_v57  ;;  %vm2705_vm15 = vweird.f32 %v5509_v11  ;;  %3332 = vmatmul.msk.f32.vlgmr.msra.gmra.mxu2 %vm2332_vm6, %v2331_v5 }
 0x29b   :  { %3615 = vpow2.f32 %v3349_v44  ;;  %v1861_v17 = vadd.f32 %v5494_v0, %v1822_v6  ;;  %v2486_v0 = vand.u32 2147483648, %v5478_v38  ;;  %v2701_v19 = vmul.f32 %v5584_v50, %v5509_v11 }
 0x29c   :  { %3617 = vpow2.f32 %v3338_v55  ;;  %v2525_v12 = vld [vmem:[#allocation3 + $0x168] sm:$0xf]  ;;  %v2478_v60 = vmul.f32 %v5545_v13, %v2477_v24  ;;  %v2678_v45 = vsel %vm5654_vm11, %v5523_v39, %v2674_v26  ;;  %v2711_v24 = vand.u32 2147483648, %v5509_v11 }
 0x29d   :  { %3619 = vrcp.f32 %v5555_v27  ;;  %v2702_v4 = vsub.f32 1.0, %v2701_v19  ;;  %v3346_v16 = vmul.f32 -1.442695, %v1861_v17  ;;  %v3344_v55 = vmul.f32 -1.442695, %v2525_v12 }
 0x29e   :  { %v1753_v41 = vpop.f32.mrf.mxu2  ;;  %vm2706_vm13 = vweird.f32 %v5584_v50  ;;  %v2683_v19 = vsel %vm5642_vm10, %v2682_v61, %v2678_v45  ;;  %v2456_v57 = vand.u32 2147483648, %v5555_v27  ;;  %v2619_v11 = vand.u32 2147483647, %v5489_v59 }
 0x29f   :  { %v3614_v20 = vpop.eup %3613  ;;  %v1754_v1 = vadd.f32 %v1753_v41, %v5357_v54  ;;  %v2612_v54 = vsub.f32 1.0, %v2611_v2  ;;  %v2703_v33 = vmul.f32 %v5584_v50, %v2702_v4  ;;  %v5670_v41 = vadd.f32 %v5545_v13, %v2478_v60  ;;  %vm5711_vm3 = vmor %vm2705_vm15, %vm2706_vm13 }
 0x2a0   :  { %v2785_v46 = vmul.f32 %v3614_v20, %v5486_v43  ;;  %v1823_v28 = vpop.f32.mrf.mxu1  ;;  %v1865_v18 = vpop.f32.mrf.mxu3  ;;  %vm2450_vm7 = vweird.f32 %v5555_v27  ;;  %vm2620_vm8 = vcmp.eq.f32.partialorder %v2619_v11, 8.507059e+37  ;;  %v5765_v45 = vor.u32 1.1754944e-38, %v2456_v57 }
 0x2a1   :  { %v3616_v62 = vpop.eup %3615  ;;  %3621 = vtanh.f32 %v1754_v1  ;;  %v1824_v51 = vadd.f32 %v1823_v28, %v1784_v53  ;;  %v2781_v53 = vmul.f32 %v3353_v31, %v2593_v40  ;;  %v2704_v1 = vadd.f32 %v5584_v50, %v2703_v33  ;;  %v1789_v12 = vpop.f32.mrf.mxu0 }
 0x2a2   :  { %v3618_v34 = vpop.eup %3617  ;;  %v5620_v14 = vadd.f32 1.0, %v3616_v62  ;;  %v2791_v23 = vadd.f32 %v2785_v46, %v2779_v10  ;;  %3623 = vrcp.f32 %v5605_v25  ;;  %v2487_v33 = vor.u32 1.1754944e-38, %v2486_v0 }
 0x2a3   :  { %v5627_v43 = vpop.eup %3619  ;;  %3625 = vpow2.f32 %v3340_v37  ;;  %v1863_v22 = vadd.f32 %v1862_v63, %v1824_v51  ;;  %v5636_v9 = vadd.f32 1.0, %v3618_v34  ;;  %v2613_v63 = vmul.f32 %v5567_v21, %v2612_v54 }
 0x2a4   :  { %3627 = vrcp.f32 %v5620_v14  ;;  %3367 = vst [vmem:[%s6000_s9 + $0x30] sm:$0xff] %v2791_v23  ;;  %v2446_v42 = vmul.f32 %v5627_v43, %v5555_v27  ;;  %vm2451_vm9 = vweird.f32 %v5627_v43  ;;  %vm2600_vm10 = vweird.f32 %v5605_v25 }
 0x2a5   :  { %3629 = vtanh.f32 %v2791_v23  ;;  %v3348_v49 = vmul.f32 -1.442695, %v1863_v22  ;;  %v2614_v7 = vadd.f32 %v5567_v21, %v2613_v63  ;;  %v2708_v22 = vsel %vm5711_vm3, %v5584_v50, %v2704_v1  ;;  %vm5816_vm15 = vmor %vm2450_vm7, %vm2451_vm9 }
 0x2a6   :  { %v1755_v44 = vpop.f32.mrf.mxu2  ;;  %3631 = vpow2.f32 %v3346_v16  ;;  %v2447_v37 = vsub.f32 1.0, %v2446_v42  ;;  %v2712_v50 = vor.u32 1.1754944e-38, %v2711_v24  ;;  %vm2735_vm11 = vweird.f32 %v5620_v14 }
 0x2a7   :  { %v3622_v29 = vpop.eup %3621  ;;  %v1756_v30 = vadd.f32 %v1755_v44, %v5389_v48  ;;  %3633 = vpow2.f32 %v3344_v55  ;;  %v2622_v55 = vor.u32 1.1754944e-38, %v2621_v8  ;;  %v2618_v59 = vsel %vm5721_vm4, %v5567_v21, %v2614_v7 }
 0x2a8   :  { %v5660_v17 = vpop.eup %3623  ;;  %v2787_v48 = vmul.f32 %v3622_v29, %v5527_v56  ;;  %3635 = vrcp.f32 %v5636_v9  ;;  %v1826_v15 = vpop.f32.mrf.mxu1  ;;  %v2448_v60 = vmul.f32 %v5627_v43, %v2447_v37  ;;  %v2713_v21 = vsel %vm5730_vm5, %v2712_v50, %v2708_v22 }
 0x2a9   :  { %v3626_v2 = vpop.eup %3625  ;;  %1921 = vst [vmem:[#allocation3 + $0x158] sm:$0xff] %v1756_v30  ;;  %v1827_v56 = vadd.f32 %v1826_v15, %v1787_v3  ;;  %3637 = vpow2.f32 %v3348_v49  ;;  %v2596_v54 = vmul.f32 %v5660_v17, %v5605_v25  ;;  %v1867_v4 = vpop.f32.mrf.mxu3  ;;  %v2623_v42 = vsel %vm2620_vm8, %v2622_v55, %v2618_v59 }
 0x2aa   :  { %v5672_v10 = vpop.eup %3627  ;;  %v2793_v20 = vadd.f32 %v2787_v48, %v2781_v53  ;;  %v5703_v35 = vadd.f32 1.0, %v3626_v2  ;;  %v2483_v53 = vsel %vm5696_vm1, %v5545_v13, %v5670_v41  ;;  %v3355_v48 = vld [vmem:[%s5994_s3 + $0x50] sm:$0xf]  ;;  %v2606_v37 = vand.u32 2147483648, %v5605_v25 }
 0x2ab   :  { %v3630_v39 = vpop.eup %3629  ;;  %v1866_v32 = vadd.f32 %v1865_v18, %v1827_v56  ;;  %v2731_v51 = vmul.f32 %v5672_v10, %v5620_v14  ;;  %v2597_v61 = vsub.f32 1.0, %v2596_v54  ;;  %v5780_v2 = vsel %vm5687_vm14, %v2487_v33, %v2483_v53 }
 0x2ac   :  { %v3632_v40 = vpop.eup %3631  ;;  %3639 = vtanh.f32 %v2793_v20  ;;  %3369 = vst [vmem:[%s6000_s9 + $0x40] sm:$0xff] %v2793_v20  ;;  %v5683_v46 = vmul.f32 %v3630_v39, %v2683_v19  ;;  %v5785_v56 = vadd.f32 %v5627_v43, %v2448_v60  ;;  %v1792_v39 = vpop.f32.mrf.mxu0  ;;  %v2783_v1 = vmul.f32 %v3355_v48, %v2623_v42 }
 0x2ad   :  { %v3634_v34 = vpop.eup %3633  ;;  %1910 = vst [vmem:[#allocation3 + $0x38] sm:$0xff] %v1866_v32  ;;  %v5715_v23 = vadd.f32 1.0, %v3632_v40  ;;  %3641 = vrcp.f32 %v5703_v35  ;;  %v2732_v63 = vsub.f32 1.0, %v2731_v51  ;;  %v2598_v15 = vmul.f32 %v5660_v17, %v2597_v61 }
 0x2ae   :  { %v5717_v3 = vpop.eup %3635  ;;  %3361 = vst [vmem:[%s5999_s8 + $0x30] sm:$0xff] %v5683_v46  ;;  %v5748_v44 = vadd.f32 1.0, %v3634_v34  ;;  %v2604_v19 = vand.u32 2147483647, %v5605_v25  ;;  %vm2736_vm12 = vweird.f32 %v5672_v10  ;;  %v2741_v54 = vand.u32 2147483648, %v5620_v14 }
 0x2af   :  { %v3638_v18 = vpop.eup %3637  ;;  %v5776_v38 = vmul.f32 %v5717_v3, %v5636_v9  ;;  %v2733_v36 = vmul.f32 %v5672_v10, %v2732_v63  ;;  %v2599_v57 = vadd.f32 %v5660_v17, %v2598_v15  ;;  %vm2601_vm13 = vweird.f32 %v5660_v17  ;;  %vm5842_vm3 = vmor %vm2735_vm11, %vm2736_vm12 }
 0x2b0   :  { %v2764_v8 = vld [vmem:[#allocation3 + $0x158] sm:$0xf]  ;;  %v1828_v6 = vpop.f32.mrf.mxu1  ;;  %v5750_v5 = vadd.f32 1.0, %v3638_v18  ;;  %vm5804_vm14 = vcmp.eq.f32.partialorder %v2454_v47, 8.507059e+37  ;;  %v2576_v31 = vand.u32 2147483648, %v5703_v35  ;;  %vm5831_vm2 = vmor %vm2600_vm10, %vm2601_vm13  ;;  %v2453_v25 = vsel %vm5816_vm15, %v5627_v43, %v5785_v56  ;;  %v3354_v56 = vld [vmem:[%s5994_s3 + $0x48] sm:$0xff] }
 0x2b1   :  { %3643 = vtanh.f32 %v2764_v8  ;;  %v1829_v30 = vadd.f32 %v1828_v6, %v1789_v12  ;;  %v1870_v12 = vpop.f32.mrf.mxu3  ;;  %v2734_v11 = vadd.f32 %v5672_v10, %v2733_v36  ;;  %v2574_v18 = vand.u32 2147483647, %v5703_v35 }
 0x2b2   :  { %v3640_v29 = vpop.eup %3639  ;;  %3645 = vrcp.f32 %v5715_v23  ;;  %v2739_v8 = vand.u32 2147483647, %v5620_v14  ;;  %vm2570_vm4 = vweird.f32 %v5703_v35  ;;  %v2603_v14 = vsel %vm5831_vm2, %v5660_v17, %v2599_v57 }
 0x2b3   :  { %v5756_v13 = vmul.f32 %v3640_v29, %v2713_v21  ;;  %3647 = vrcp.f32 %v5750_v5  ;;  %v1868_v58 = vadd.f32 %v1867_v4, %v1829_v30  ;;  %v5767_v49 = vpop.eup %3641  ;;  %v2738_v60 = vsel %vm5842_vm3, %v5672_v10, %v2734_v11 }
 0x2b4   :  { %3649 = vrcp.f32 %v5748_v44  ;;  %v2645_v0 = vld [vmem:[#allocation3 + $0x38] sm:$0xf]  ;;  %v2566_v24 = vmul.f32 %v5767_v49, %v5703_v35  ;;  %vm2571_vm1 = vweird.f32 %v5767_v49  ;;  %v2577_v61 = vor.u32 1.1754944e-38, %v2576_v31  ;;  %v1794_v33 = vpop.f32.mrf.mxu0 }
 0x2b5   :  { %3363 = vst [vmem:[%s5999_s8 + $0x40] sm:$0xff] %v5756_v13  ;;  %v3350_v41 = vmul.f32 -1.442695, %v2645_v0  ;;  %vm5863_vm5 = vmor %vm2570_vm4, %vm2571_vm1  ;;  %v2742_v30 = vor.u32 1.1754944e-38, %v2741_v54  ;;  %v2607_v63 = vor.u32 1.1754944e-38, %v2606_v37  ;;  %vm2575_vm7 = vcmp.eq.f32.partialorder %v2574_v18, 8.507059e+37 }
 0x2b6   :  { %v2567_v7 = vsub.f32 1.0, %v2566_v24  ;;  %vm2740_vm8 = vcmp.eq.f32.partialorder %v2739_v8, 8.507059e+37  ;;  %v2507_v42 = vsub.f32 1.0, %v5776_v38  ;;  %vm2605_vm9 = vcmp.eq.f32.partialorder %v2604_v19, 8.507059e+37  ;;  %v3352_v0 = vld [vmem:[%s5994_s3 + $0x38] sm:$0xff] }
 0x2b7   :  { %v3644_v20 = vpop.eup %3643  ;;  %3651 = vpow2.f32 %v3350_v41  ;;  %v2743_v36 = vsel %vm2740_vm8, %v2742_v30, %v2738_v60  ;;  %v2608_v41 = vsel %vm2605_vm9, %v2607_v63, %v2603_v14  ;;  %v2458_v24 = vsel %vm5804_vm14, %v5765_v45, %v2453_v25 }
 0x2b8   :  { %v5792_v40 = vpop.eup %3645  ;;  %v2789_v32 = vmul.f32 %v3644_v20, %v5589_v52  ;;  %v1831_v28 = vpop.f32.mrf.mxu1  ;;  %v2568_v47 = vmul.f32 %v5767_v49, %v2567_v7  ;;  %3653 = vtanh.f32 %v1868_v58  ;;  %v2782_v45 = vmul.f32 %v3354_v56, %v2608_v41 }
 0x2b9   :  { %v5796_v62 = vpop.eup %3647  ;;  %v1832_v52 = vadd.f32 %v1831_v28, %v1792_v39  ;;  %v2686_v55 = vmul.f32 %v5792_v40, %v5715_v23  ;;  %v1872_v20 = vpop.f32.mrf.mxu3  ;;  %v2508_v54 = vmul.f32 %v5717_v3, %v2507_v42  ;;  %vm2691_vm10 = vweird.f32 %v5792_v40 }
 0x2ba   :  { %v2795_v51 = vadd.f32 %v2789_v32, %v2783_v1  ;;  %v5810_v4 = vpop.eup %3649  ;;  %v2716_v26 = vmul.f32 %v5796_v62, %v5750_v5  ;;  %v2569_v50 = vadd.f32 %v5767_v49, %v2568_v47  ;;  %vm2721_vm11 = vweird.f32 %v5796_v62 }
 0x2bb   :  { %v1871_v22 = vadd.f32 %v1870_v12, %v1832_v52  ;;  %v2626_v6 = vmul.f32 %v5810_v4, %v5748_v44  ;;  %v2687_v29 = vsub.f32 1.0, %v2686_v55  ;;  %v2696_v31 = vand.u32 2147483648, %v5715_v23 }
 0x2bc   :  { %3655 = vtanh.f32 %v2795_v51  ;;  %3371 = vst [vmem:[%s6000_s9 + $0x50] sm:$0xf] %v2795_v51  ;;  %v2573_v10 = vsel %vm5863_vm5, %v5767_v49, %v2569_v50  ;;  %v2717_v21 = vsub.f32 1.0, %v2716_v26  ;;  %v5898_v51 = vld [vmem:[%s5997_s6] sm:$0xf]  ;;  %v2726_v16 = vand.u32 2147483648, %v5750_v5 }
 0x2bd   :  { %v3652_v53 = vpop.eup %3651  ;;  %3657 = vtanh.f32 %v1871_v22  ;;  %v2578_v48 = vsel %vm2575_vm7, %v2577_v61, %v2573_v10  ;;  %v2627_v39 = vsub.f32 1.0, %v2626_v6  ;;  %v2688_v1 = vmul.f32 %v5792_v40, %v2687_v29 }
 0x2be   :  { %v5867_v35 = vadd.f32 1.0, %v3652_v53  ;;  %v3654_v17 = vpop.eup %3653  ;;  %v2718_v32 = vmul.f32 %v5796_v62, %v2717_v21  ;;  %v2780_v7 = vmul.f32 %v3352_v0, %v2578_v48  ;;  %vm2690_vm12 = vweird.f32 %v5715_v23 }
 0x2bf   :  { %v2786_v12 = vmul.f32 %v3654_v17, %v2458_v24  ;;  %v2628_v34 = vmul.f32 %v5810_v4, %v2627_v39  ;;  %v2689_v11 = vadd.f32 %v5792_v40, %v2688_v1  ;;  %v2694_v47 = vand.u32 2147483647, %v5715_v23  ;;  %vm5921_vm1 = vmor %vm2690_vm12, %vm2691_vm10 }
 0x2c0   :  { %v1833_v58 = vpop.f32.mrf.mxu1  ;;  %3659 = vrcp.f32 %v5867_v35  ;;  %vm2510_vm13 = vweird.f32 %v5636_v9  ;;  %vm2511_vm14 = vweird.f32 %v5717_v3  ;;  %vm2720_vm15 = vweird.f32 %v5750_v5 }
 0x2c1   :  { %v1834_v49 = vadd.f32 %v1833_v58, %v1794_v33  ;;  %v2792_v57 = vadd.f32 %v2786_v12, %v2780_v7  ;;  %v2724_v55 = vand.u32 2147483647, %v5750_v5  ;;  %v2509_v22 = vadd.f32 %v5717_v3, %v2508_v54  ;;  %vm5932_vm3 = vmor %vm2720_vm15, %vm2721_vm11 }
 0x2c2   :  { %v3656_v15 = vpop.eup %3655  ;;  %v2629_v23 = vadd.f32 %v5810_v4, %v2628_v34  ;;  %vm2631_vm2 = vweird.f32 %v5810_v4  ;;  %v2693_v5 = vsel %vm5921_vm1, %v5792_v40, %v2689_v11  ;;  %v2636_v26 = vand.u32 2147483648, %v5748_v44  ;;  %vm2512_vm9 = vmor %vm2510_vm13, %vm2511_vm14 }
 0x2c3   :  { %v2807_v38 = vmul.f32 %v3656_v15, %v2743_v36  ;;  %v3658_v19 = vpop.eup %3657  ;;  %v1873_v37 = vadd.f32 %v1872_v20, %v1834_v49  ;;  %3661 = vtanh.f32 %v2792_v57  ;;  %3368 = vst [vmem:[%s6000_s9 + $0x38] sm:$0xff] %v2792_v57  ;;  %v2697_v8 = vor.u32 1.1754944e-38, %v2696_v31 }
 0x2c4   :  { %v2788_v28 = vmul.f32 %v3658_v19, %v5780_v2  ;;  %v2719_v2 = vadd.f32 %v5796_v62, %v2718_v32  ;;  %vm2630_vm4 = vweird.f32 %v5748_v44  ;;  %v2634_v25 = vand.u32 2147483647, %v5748_v44 }
 0x2c5   :  { %3357 = vmatpush.msk.msrb.mxu2 %vm68_vm0, %v2807_v38  ;;  %3365 = vst [vmem:[%s5999_s8 + $0x50] sm:$0xf] %v2807_v38  ;;  %v2727_v53 = vor.u32 1.1754944e-38, %v2726_v16  ;;  %vm2695_vm5 = vcmp.eq.f32.partialorder %v2694_v47, 8.507059e+37  ;;  %v2516_v40 = vand.u32 2147483648, %v5636_v9  ;;  %vm5948_vm7 = vmor %vm2630_vm4, %vm2631_vm2  ;;  %vm2725_vm8 = vcmp.eq.f32.partialorder %v2724_v55, 8.507059e+37 }
 0x2c6   :  { %1922 = vst [vmem:[#allocation3 + $0x150] sm:$0xff] %v1873_v37  ;;  %v2794_v52 = vadd.f32 %v2788_v28, %v2782_v45  ;;  %v2723_v59 = vsel %vm5932_vm3, %v5796_v62, %v2719_v2  ;;  %v2698_v14 = vsel %vm2695_vm5, %v2697_v8, %v2693_v5  ;;  %v2514_v62 = vand.u32 2147483647, %v5636_v9 }
 0x2c7   :  { %2833 = vmatpush.msrb.mxu2 %v5756_v13  ;;  %v5906_v13 = vpop.eup %3659  ;;  %v2633_v44 = vsel %vm5948_vm7, %v5810_v4, %v2629_v23  ;;  %v2728_v10 = vsel %vm2725_vm8, %v2727_v53, %v2723_v59  ;;  %v2637_v29 = vor.u32 1.1754944e-38, %v2636_v26  ;;  %v2513_v21 = vsel %vm2512_vm9, %v5717_v3, %v2509_v22  ;;  %v3356_v4 = vld [vmem:[%s5994_s3 + $0x58] sm:$0xf] }
 0x2c8   :  { %3663 = vtanh.f32 %v2794_v52  ;;  %3370 = vst [vmem:[%s6000_s9 + $0x48] sm:$0xff] %v2794_v52  ;;  %v2746_v18 = vmul.f32 %v5906_v13, %v5867_v35  ;;  %vm2635_vm10 = vcmp.eq.f32.partialorder %v2634_v25, 8.507059e+37  ;;  %v2517_v17 = vor.u32 1.1754944e-38, %v2516_v40 }
 0x2c9   :  { %2834 = vmatpush.msrb.mxu2 %v5683_v46  ;;  %v3662_v60 = vpop.eup %3661  ;;  %v2638_v33 = vsel %vm2635_vm10, %v2637_v29, %v2633_v44  ;;  %vm2515_vm11 = vcmp.eq.f32.partialorder %v2514_v62, 8.507059e+37  ;;  %vm2751_vm12 = vweird.f32 %v5906_v13  ;;  %v2756_v49 = vand.u32 2147483648, %v5867_v35 }
 0x2ca   :  { %3358 = vmatmul.msk.f32.vlgmr.msrb.gmra.mxu2 %vm2332_vm6, %v5898_v51  ;;  %v2804_v61 = vmul.f32 %v3662_v60, %v2698_v14  ;;  %v2747_v30 = vsub.f32 1.0, %v2746_v18  ;;  %v2518_v58 = vsel %vm2515_vm11, %v2517_v17, %v2513_v21  ;;  %v2784_v42 = vmul.f32 %v3356_v4, %v2638_v33 }
 0x2cb   :  { %vm2750_vm13 = vweird.f32 %v5867_v35  ;;  %v2754_v36 = vand.u32 2147483647, %v5867_v35  ;;  %v2757_v56 = vor.u32 1.1754944e-38, %v2756_v49 }
 0x2cc   :  { %3362 = vst [vmem:[%s5999_s8 + $0x38] sm:$0xff] %v2804_v61  ;;  %v2748_v3 = vmul.f32 %v5906_v13, %v2747_v30  ;;  %vm2752_vm14 = vmor %vm2750_vm13, %vm2751_vm12 }
 0x2cd   :  { %v2765_v50 = vld [vmem:[#allocation3 + $0x150] sm:$0xf]  ;;  %vm2755_vm15 = vcmp.eq.f32.partialorder %v2754_v36, 8.507059e+37 }
 0x2ce   :  { %3665 = vtanh.f32 %v2765_v50  ;;  %v3664_v43 = vpop.eup %3663  ;;  %v2749_v15 = vadd.f32 %v5906_v13, %v2748_v3 }
 0x2cf   :  { %v2806_v63 = vmul.f32 %v3664_v43, %v2728_v10 }
 0x2d0   :  { %v2753_v41 = vsel %vm2752_vm14, %v5906_v13, %v2749_v15 }
 0x2d1   :  { %3364 = vst [vmem:[%s5999_s8 + $0x48] sm:$0xff] %v2806_v63  ;;  %v2758_v20 = vsel %vm2755_vm15, %v2757_v56, %v2753_v41 }
 0x2d4   :  { %v3666_v9 = vpop.eup %3665 }
 0x2d5   :  { %v2790_v48 = vmul.f32 %v3666_v9, %v2518_v58 }
 0x2d7   :  { %v2796_v0 = vadd.f32 %v2790_v48, %v2784_v42 }
 0x2d9   :  { %3667 = vtanh.f32 %v2796_v0  ;;  %3372 = vst [vmem:[%s6000_s9 + $0x58] sm:$0xf] %v2796_v0  ;;  %s3706_s9 = smov [#allocation5]  }
 0x2da   :  { %s2884_s14 = sshll.u32 %s3706_s9, 4  ;;  %s2885_s14 = int_to_ptr.vmem [resolvable:$true] %s2884_s14 }
 0x2df   :  { %v3668_v24 = vpop.eup %3667 }
 0x2e0   :  { %v2808_v38 = vmul.f32 %v3668_v24, %v2758_v20 }
 0x2e2   :  { %3359 = vmatpush.msk.msrb.mxu0 %vm68_vm0, %v2808_v38  ;;  %3366 = vst [vmem:[%s5999_s8 + $0x58] sm:$0xf] %v2808_v38  ;;  %s3707_s8 = smov 128  }
 0x2e4   :  { %2853 = vmatpush.msrb.mxu0 %v2806_v63 }
 0x2e6   :  { %2854 = vmatpush.msrb.mxu0 %v2804_v61 }
 0x2e7   :  { %3360 = vmatmul.msk.f32.vlgmr.msrb.gmra.mxu0 %vm2332_vm6, %v5898_v51 }
 0x315   :  { %v2359_v35 = vpop.f32.mrf.mxu2 }
 0x31d   :  { %v2379_v39 = vpop.f32.mrf.mxu2 }
 0x31e   :  { %v2384_v1 = vrot.slane %v2379_v39, 4 }
 0x320   :  { %v2385_v19 = vsel %vm68_vm0, %v2359_v35, %v2384_v1 }
 0x321   :  { %2387 = vst [vmem:[#allocation5] sm:$0xff] %v2385_v19 }
 0x34d   :  { %v2836_v32 = vpop.f32.mrf.mxu2 }
 0x364   :  { %v2856_v37 = vpop.f32.mrf.mxu0 }
 0x365   :  { %v2861_v7 = vrot.slane %v2856_v37, 4 }
 0x367   :  { %v2862_v12 = vsel %vm68_vm0, %v2836_v32, %v2861_v7 }
 0x368   :  { %2865 = vst [vmem:[#allocation5 + $0x8] sm:$0xff] %v2862_v12 }
 0x369   :  { %2892 = dma.vmem_to_hbm [thread:$0]  %s2885_s14, 256, %s2887_s18, [#allocation6], %s3707_s8, %s3707_s8, %s3708_s5  }
 0x36a   :  { %3693 = dma.done.wait [#allocation6], 256  }
 0x36b   :  { %3694 = vsyncadd [#allocation6], 4294967040 }
 0x36c   :  { %2905 = vsyncpa [#allocation6], 1 }

</bundles_post_ra>
